<compile_context>
chip_gen: v7x
topology: tpu7x:2x2x1
jax: 0.10.0
libtpu: 0.0.40
codegen_flags: <defaults>
</compile_context>

<pallas_src>
import functools

import jax
import jax.numpy as jnp
from jax.experimental import pallas as pl
from jax.experimental.pallas import tpu as pltpu

BN_EPS = 1e-5
LRELU_SLOPE = 0.2


def _round_up(x, m):
    return ((x + m - 1) // m) * m


def _generator_kernel(
    noise_ref, labels_ref,                     # (B, latent), (B, classes)
    w1n_ref, w1l_ref, b1_ref, g1_ref, be1_ref,  # split Linear1 + BN1
    w2_ref, b2_ref, g2_ref, be2_ref,            # Linear2 + BN2
    w3_ref, b3_ref, g3_ref, be3_ref,            # Linear3 + BN3
    w4_ref, b4_ref,                             # Linear4 (output-padded)
    out_ref,                                    # (B, out_pad)
):
    def matmul(h, w_ref):
        # bf16 x bf16 on the MXU, f32 accumulate.
        return jnp.dot(
            h.astype(w_ref.dtype), w_ref[...],
            preferred_element_type=jnp.float32,
        )

    def bn_lrelu(h, g_ref, be_ref):
        # BatchNorm1d (training mode): batch mean / biased batch variance.
        mean = jnp.mean(h, axis=0, keepdims=True)
        centered = h - mean
        var = jnp.mean(centered * centered, axis=0, keepdims=True)
        hn = centered * jax.lax.rsqrt(var + BN_EPS)
        hn = hn * g_ref[...] + be_ref[...]
        # LeakyReLU(0.2)
        return jnp.where(hn > 0, hn, LRELU_SLOPE * hn)

    # Layer 1: cat([noise, labels]) @ W1  ==  noise@W1n + labels@W1l
    h = matmul(noise_ref[...], w1n_ref) + matmul(labels_ref[...], w1l_ref) + b1_ref[...]
    h = bn_lrelu(h, g1_ref, be1_ref)

    h = bn_lrelu(matmul(h, w2_ref) + b2_ref[...], g2_ref, be2_ref)
    h = bn_lrelu(matmul(h, w3_ref) + b3_ref[...], g3_ref, be3_ref)

    out_ref[...] = jnp.tanh(matmul(h, w4_ref) + b4_ref[...]).astype(out_ref.dtype)


@functools.partial(jax.jit, static_argnames=("output_dim",))
def generator_forward(noise, labels, params, *, output_dim):
    """noise: (B, latent_dim), labels: (B, num_classes) one-hot.
    Returns (B, output_dim) f32 in (-1, 1)."""
    B = noise.shape[0]
    out_pad = params["w4"].shape[1]  # already padded to a multiple of 128

    flat_inputs = (
        noise.astype(jnp.float32), labels.astype(jnp.float32),
        params["w1n"], params["w1l"], params["b1"], params["g1"], params["be1"],
        params["w2"], params["b2"], params["g2"], params["be2"],
        params["w3"], params["b3"], params["g3"], params["be3"],
        params["w4"], params["b4"],
    )

    vmem_spec = pl.BlockSpec(memory_space=pltpu.MemorySpace.VMEM)

    out = pl.pallas_call(
        _generator_kernel,
        out_shape=jax.ShapeDtypeStruct((B, out_pad), jnp.float32),
        in_specs=[vmem_spec] * len(flat_inputs),
        out_specs=vmem_spec,
        compiler_params=pltpu.CompilerParams(vmem_limit_bytes=32 << 20),
    )(*flat_inputs)

    return out[:, :output_dim]


def init_params(key, latent_dim, output_dim, num_classes):
    """Deterministic init mimicking PyTorch defaults (Linear: U(-1/sqrt(fan_in), +),
    BatchNorm1d: gamma=1, beta=0). Weights stored (in, out), cast to bf16;
    final layer output-padded to a multiple of 128 with zero columns."""
    d_in = latent_dim + num_classes
    dims = [d_in, 256, 512, 1024, output_dim]
    out_pad = _round_up(output_dim, 128)

    params = {}
    keys = jax.random.split(key, 8)
    for i in range(4):
        fan_in = dims[i]
        bound = 1.0 / (fan_in ** 0.5)
        w = jax.random.uniform(
            keys[2 * i], (dims[i], dims[i + 1]), jnp.float32, -bound, bound
        )
        b = jax.random.uniform(
            keys[2 * i + 1], (1, dims[i + 1]), jnp.float32, -bound, bound
        )
        if i == 0:
            # Split along the input dim to match cat([noise, labels]) @ W.
            params["w1n"] = w[:latent_dim].astype(jnp.bfloat16)
            params["w1l"] = w[latent_dim:].astype(jnp.bfloat16)
            params["b1"] = b
        elif i == 3:
            # Lane-dense output: zero-pad columns 784 -> 896 (tanh(0)=0,
            # wrapper slices them off).
            w_p = jnp.zeros((dims[i], out_pad), jnp.float32).at[:, :output_dim].set(w)
            b_p = jnp.zeros((1, out_pad), jnp.float32).at[:, :output_dim].set(b)
            params["w4"] = w_p.astype(jnp.bfloat16)
            params["b4"] = b_p
        else:
            params[f"w{i + 1}"] = w.astype(jnp.bfloat16)
            params[f"b{i + 1}"] = b
        if i < 3:  # BatchNorm after first three linears
            params[f"g{i + 1}"] = jnp.ones((1, dims[i + 1]), jnp.float32)
            params[f"be{i + 1}"] = jnp.zeros((1, dims[i + 1]), jnp.float32)
    return params


if __name__ == "__main__":
    latent_dim = 32
    num_classes = 8
    output_dim = 784
    batch = 8

    root = jax.random.PRNGKey(0)
    k_param, k_noise, k_label = jax.random.split(root, 3)

    params = init_params(k_param, latent_dim, output_dim, num_classes)

    noise = jax.random.normal(k_noise, (batch, latent_dim), dtype=jnp.float32)
    label_idx = jax.random.randint(k_label, (batch,), 0, num_classes)
    labels = jax.nn.one_hot(label_idx, num_classes, dtype=jnp.float32)

    out = generator_forward(noise, labels, params, output_dim=output_dim)
    out = jax.block_until_ready(out)

    assert out.shape == (batch, output_dim)
    assert bool(jnp.all(jnp.isfinite(out)))
    assert bool(jnp.all(jnp.abs(out) <= 1.0))  # tanh range
    print("KERNEL_OK")
</pallas_src>

<mosaic_0001>
module attributes {stable_mosaic.version = 11 : i64} {
  func.func @_generator_kernel(%arg0: memref<8x32xf32, #tpu.memory_space<vmem>>, %arg1: memref<8x8xf32, #tpu.memory_space<vmem>>, %arg2: memref<32x256xbf16, #tpu.memory_space<vmem>>, %arg3: memref<8x256xbf16, #tpu.memory_space<vmem>>, %arg4: memref<1x256xf32, #tpu.memory_space<vmem>>, %arg5: memref<1x256xf32, #tpu.memory_space<vmem>>, %arg6: memref<1x256xf32, #tpu.memory_space<vmem>>, %arg7: memref<256x512xbf16, #tpu.memory_space<vmem>>, %arg8: memref<1x512xf32, #tpu.memory_space<vmem>>, %arg9: memref<1x512xf32, #tpu.memory_space<vmem>>, %arg10: memref<1x512xf32, #tpu.memory_space<vmem>>, %arg11: memref<512x1024xbf16, #tpu.memory_space<vmem>>, %arg12: memref<1x1024xf32, #tpu.memory_space<vmem>>, %arg13: memref<1x1024xf32, #tpu.memory_space<vmem>>, %arg14: memref<1x1024xf32, #tpu.memory_space<vmem>>, %arg15: memref<1024x896xbf16, #tpu.memory_space<vmem>>, %arg16: memref<1x896xf32, #tpu.memory_space<vmem>>, %arg17: memref<8x896xf32, #tpu.memory_space<vmem>>) attributes {dimension_semantics = [], scalar_prefetch = 0 : i64, scratch_operands = 0 : i64, tpu.core_type = #tpu.core_type<tc>} {
    %c0 = arith.constant 0 : index
    %c0_0 = arith.constant 0 : index
    %0 = vector.load %arg0[%c0, %c0_0] : memref<8x32xf32, #tpu.memory_space<vmem>>, vector<8x32xf32>
    %1 = arith.truncf %0 : vector<8x32xf32> to vector<8x32xbf16>
    %c0_1 = arith.constant 0 : index
    %c0_2 = arith.constant 0 : index
    %2 = vector.load %arg2[%c0_1, %c0_2] : memref<32x256xbf16, #tpu.memory_space<vmem>>, vector<32x256xbf16>
    %cst = arith.constant dense<0.000000e+00> : vector<8x256xf32>
    %3 = tpu.matmul %1, %2, %cst {dimension_numbers = #tpu.dot_dimension_numbers<[1], [0], [0], [1], [0, 0, 1, 1], [], []>} : vector<8x32xbf16>, vector<32x256xbf16>, vector<8x256xf32> -> vector<8x256xf32>
    %c0_3 = arith.constant 0 : index
    %c0_4 = arith.constant 0 : index
    %4 = vector.load %arg1[%c0_3, %c0_4] : memref<8x8xf32, #tpu.memory_space<vmem>>, vector<8x8xf32>
    %5 = arith.truncf %4 : vector<8x8xf32> to vector<8x8xbf16>
    %c0_5 = arith.constant 0 : index
    %c0_6 = arith.constant 0 : index
    %6 = vector.load %arg3[%c0_5, %c0_6] : memref<8x256xbf16, #tpu.memory_space<vmem>>, vector<8x256xbf16>
    %cst_7 = arith.constant dense<0.000000e+00> : vector<8x256xf32>
    %7 = tpu.matmul %5, %6, %cst_7 {dimension_numbers = #tpu.dot_dimension_numbers<[1], [0], [0], [1], [0, 0, 1, 1], [], []>} : vector<8x8xbf16>, vector<8x256xbf16>, vector<8x256xf32> -> vector<8x256xf32>
    %8 = arith.addf %3, %7 : vector<8x256xf32>
    %c0_8 = arith.constant 0 : index
    %c0_9 = arith.constant 0 : index
    %9 = vector.load %arg4[%c0_8, %c0_9] : memref<1x256xf32, #tpu.memory_space<vmem>>, vector<1x256xf32>
    %10 = vector.broadcast %9 : vector<1x256xf32> to vector<8x256xf32>
    %11 = arith.addf %8, %10 : vector<8x256xf32>
    %cst_10 = arith.constant dense<0.000000e+00> : vector<256xf32>
    %12 = vector.multi_reduction <add>, %11, %cst_10 [0] : vector<8x256xf32> to vector<256xf32>
    %13 = vector.shape_cast %12 : vector<256xf32> to vector<1x256xf32>
    %cst_11 = arith.constant 8.000000e+00 : f32
    %14 = vector.broadcast %cst_11 : f32 to vector<1x256xf32>
    %15 = arith.divf %13, %14 : vector<1x256xf32>
    %16 = vector.broadcast %15 : vector<1x256xf32> to vector<8x256xf32>
    %17 = arith.subf %11, %16 : vector<8x256xf32>
    %18 = arith.mulf %17, %17 : vector<8x256xf32>
    %cst_12 = arith.constant dense<0.000000e+00> : vector<256xf32>
    %19 = vector.multi_reduction <add>, %18, %cst_12 [0] : vector<8x256xf32> to vector<256xf32>
    %20 = vector.shape_cast %19 : vector<256xf32> to vector<1x256xf32>
    %cst_13 = arith.constant 8.000000e+00 : f32
    %21 = vector.broadcast %cst_13 : f32 to vector<1x256xf32>
    %22 = arith.divf %20, %21 : vector<1x256xf32>
    %cst_14 = arith.constant 9.99999974E-6 : f32
    %23 = vector.broadcast %cst_14 : f32 to vector<1x256xf32>
    %24 = arith.addf %22, %23 : vector<1x256xf32>
    %25 = math.rsqrt %24 : vector<1x256xf32>
    %26 = vector.broadcast %25 : vector<1x256xf32> to vector<8x256xf32>
    %27 = arith.mulf %17, %26 : vector<8x256xf32>
    %c0_15 = arith.constant 0 : index
    %c0_16 = arith.constant 0 : index
    %28 = vector.load %arg5[%c0_15, %c0_16] : memref<1x256xf32, #tpu.memory_space<vmem>>, vector<1x256xf32>
    %29 = vector.broadcast %28 : vector<1x256xf32> to vector<8x256xf32>
    %30 = arith.mulf %27, %29 : vector<8x256xf32>
    %c0_17 = arith.constant 0 : index
    %c0_18 = arith.constant 0 : index
    %31 = vector.load %arg6[%c0_17, %c0_18] : memref<1x256xf32, #tpu.memory_space<vmem>>, vector<1x256xf32>
    %32 = vector.broadcast %31 : vector<1x256xf32> to vector<8x256xf32>
    %33 = arith.addf %30, %32 : vector<8x256xf32>
    %cst_19 = arith.constant 0.000000e+00 : f32
    %34 = vector.broadcast %cst_19 : f32 to vector<8x256xf32>
    %35 = arith.cmpf ogt, %33, %34 : vector<8x256xf32>
    %cst_20 = arith.constant 2.000000e-01 : f32
    %36 = vector.broadcast %cst_20 : f32 to vector<8x256xf32>
    %37 = arith.mulf %36, %33 : vector<8x256xf32>
    %38 = arith.select %35, %33, %37 : vector<8x256xi1>, vector<8x256xf32>
    %39 = arith.truncf %38 : vector<8x256xf32> to vector<8x256xbf16>
    %c0_21 = arith.constant 0 : index
    %c0_22 = arith.constant 0 : index
    %40 = vector.load %arg7[%c0_21, %c0_22] : memref<256x512xbf16, #tpu.memory_space<vmem>>, vector<256x512xbf16>
    %cst_23 = arith.constant dense<0.000000e+00> : vector<8x512xf32>
    %41 = tpu.matmul %39, %40, %cst_23 {dimension_numbers = #tpu.dot_dimension_numbers<[1], [0], [0], [1], [0, 0, 1, 1], [], []>} : vector<8x256xbf16>, vector<256x512xbf16>, vector<8x512xf32> -> vector<8x512xf32>
    %c0_24 = arith.constant 0 : index
    %c0_25 = arith.constant 0 : index
    %42 = vector.load %arg8[%c0_24, %c0_25] : memref<1x512xf32, #tpu.memory_space<vmem>>, vector<1x512xf32>
    %43 = vector.broadcast %42 : vector<1x512xf32> to vector<8x512xf32>
    %44 = arith.addf %41, %43 : vector<8x512xf32>
    %cst_26 = arith.constant dense<0.000000e+00> : vector<512xf32>
    %45 = vector.multi_reduction <add>, %44, %cst_26 [0] : vector<8x512xf32> to vector<512xf32>
    %46 = vector.shape_cast %45 : vector<512xf32> to vector<1x512xf32>
    %cst_27 = arith.constant 8.000000e+00 : f32
    %47 = vector.broadcast %cst_27 : f32 to vector<1x512xf32>
    %48 = arith.divf %46, %47 : vector<1x512xf32>
    %49 = vector.broadcast %48 : vector<1x512xf32> to vector<8x512xf32>
    %50 = arith.subf %44, %49 : vector<8x512xf32>
    %51 = arith.mulf %50, %50 : vector<8x512xf32>
    %cst_28 = arith.constant dense<0.000000e+00> : vector<512xf32>
    %52 = vector.multi_reduction <add>, %51, %cst_28 [0] : vector<8x512xf32> to vector<512xf32>
    %53 = vector.shape_cast %52 : vector<512xf32> to vector<1x512xf32>
    %cst_29 = arith.constant 8.000000e+00 : f32
    %54 = vector.broadcast %cst_29 : f32 to vector<1x512xf32>
    %55 = arith.divf %53, %54 : vector<1x512xf32>
    %cst_30 = arith.constant 9.99999974E-6 : f32
    %56 = vector.broadcast %cst_30 : f32 to vector<1x512xf32>
    %57 = arith.addf %55, %56 : vector<1x512xf32>
    %58 = math.rsqrt %57 : vector<1x512xf32>
    %59 = vector.broadcast %58 : vector<1x512xf32> to vector<8x512xf32>
    %60 = arith.mulf %50, %59 : vector<8x512xf32>
    %c0_31 = arith.constant 0 : index
    %c0_32 = arith.constant 0 : index
    %61 = vector.load %arg9[%c0_31, %c0_32] : memref<1x512xf32, #tpu.memory_space<vmem>>, vector<1x512xf32>
    %62 = vector.broadcast %61 : vector<1x512xf32> to vector<8x512xf32>
    %63 = arith.mulf %60, %62 : vector<8x512xf32>
    %c0_33 = arith.constant 0 : index
    %c0_34 = arith.constant 0 : index
    %64 = vector.load %arg10[%c0_33, %c0_34] : memref<1x512xf32, #tpu.memory_space<vmem>>, vector<1x512xf32>
    %65 = vector.broadcast %64 : vector<1x512xf32> to vector<8x512xf32>
    %66 = arith.addf %63, %65 : vector<8x512xf32>
    %cst_35 = arith.constant 0.000000e+00 : f32
    %67 = vector.broadcast %cst_35 : f32 to vector<8x512xf32>
    %68 = arith.cmpf ogt, %66, %67 : vector<8x512xf32>
    %cst_36 = arith.constant 2.000000e-01 : f32
    %69 = vector.broadcast %cst_36 : f32 to vector<8x512xf32>
    %70 = arith.mulf %69, %66 : vector<8x512xf32>
    %71 = arith.select %68, %66, %70 : vector<8x512xi1>, vector<8x512xf32>
    %72 = arith.truncf %71 : vector<8x512xf32> to vector<8x512xbf16>
    %c0_37 = arith.constant 0 : index
    %c0_38 = arith.constant 0 : index
    %73 = vector.load %arg11[%c0_37, %c0_38] : memref<512x1024xbf16, #tpu.memory_space<vmem>>, vector<512x1024xbf16>
    %cst_39 = arith.constant dense<0.000000e+00> : vector<8x1024xf32>
    %74 = tpu.matmul %72, %73, %cst_39 {dimension_numbers = #tpu.dot_dimension_numbers<[1], [0], [0], [1], [0, 0, 1, 1], [], []>} : vector<8x512xbf16>, vector<512x1024xbf16>, vector<8x1024xf32> -> vector<8x1024xf32>
    %c0_40 = arith.constant 0 : index
    %c0_41 = arith.constant 0 : index
    %75 = vector.load %arg12[%c0_40, %c0_41] : memref<1x1024xf32, #tpu.memory_space<vmem>>, vector<1x1024xf32>
    %76 = vector.broadcast %75 : vector<1x1024xf32> to vector<8x1024xf32>
    %77 = arith.addf %74, %76 : vector<8x1024xf32>
    %cst_42 = arith.constant dense<0.000000e+00> : vector<1024xf32>
    %78 = vector.multi_reduction <add>, %77, %cst_42 [0] : vector<8x1024xf32> to vector<1024xf32>
    %79 = vector.shape_cast %78 : vector<1024xf32> to vector<1x1024xf32>
    %cst_43 = arith.constant 8.000000e+00 : f32
    %80 = vector.broadcast %cst_43 : f32 to vector<1x1024xf32>
    %81 = arith.divf %79, %80 : vector<1x1024xf32>
    %82 = vector.broadcast %81 : vector<1x1024xf32> to vector<8x1024xf32>
    %83 = arith.subf %77, %82 : vector<8x1024xf32>
    %84 = arith.mulf %83, %83 : vector<8x1024xf32>
    %cst_44 = arith.constant dense<0.000000e+00> : vector<1024xf32>
    %85 = vector.multi_reduction <add>, %84, %cst_44 [0] : vector<8x1024xf32> to vector<1024xf32>
    %86 = vector.shape_cast %85 : vector<1024xf32> to vector<1x1024xf32>
    %cst_45 = arith.constant 8.000000e+00 : f32
    %87 = vector.broadcast %cst_45 : f32 to vector<1x1024xf32>
    %88 = arith.divf %86, %87 : vector<1x1024xf32>
    %cst_46 = arith.constant 9.99999974E-6 : f32
    %89 = vector.broadcast %cst_46 : f32 to vector<1x1024xf32>
    %90 = arith.addf %88, %89 : vector<1x1024xf32>
    %91 = math.rsqrt %90 : vector<1x1024xf32>
    %92 = vector.broadcast %91 : vector<1x1024xf32> to vector<8x1024xf32>
    %93 = arith.mulf %83, %92 : vector<8x1024xf32>
    %c0_47 = arith.constant 0 : index
    %c0_48 = arith.constant 0 : index
    %94 = vector.load %arg13[%c0_47, %c0_48] : memref<1x1024xf32, #tpu.memory_space<vmem>>, vector<1x1024xf32>
    %95 = vector.broadcast %94 : vector<1x1024xf32> to vector<8x1024xf32>
    %96 = arith.mulf %93, %95 : vector<8x1024xf32>
    %c0_49 = arith.constant 0 : index
    %c0_50 = arith.constant 0 : index
    %97 = vector.load %arg14[%c0_49, %c0_50] : memref<1x1024xf32, #tpu.memory_space<vmem>>, vector<1x1024xf32>
    %98 = vector.broadcast %97 : vector<1x1024xf32> to vector<8x1024xf32>
    %99 = arith.addf %96, %98 : vector<8x1024xf32>
    %cst_51 = arith.constant 0.000000e+00 : f32
    %100 = vector.broadcast %cst_51 : f32 to vector<8x1024xf32>
    %101 = arith.cmpf ogt, %99, %100 : vector<8x1024xf32>
    %cst_52 = arith.constant 2.000000e-01 : f32
    %102 = vector.broadcast %cst_52 : f32 to vector<8x1024xf32>
    %103 = arith.mulf %102, %99 : vector<8x1024xf32>
    %104 = arith.select %101, %99, %103 : vector<8x1024xi1>, vector<8x1024xf32>
    %105 = arith.truncf %104 : vector<8x1024xf32> to vector<8x1024xbf16>
    %c0_53 = arith.constant 0 : index
    %c0_54 = arith.constant 0 : index
    %106 = vector.load %arg15[%c0_53, %c0_54] : memref<1024x896xbf16, #tpu.memory_space<vmem>>, vector<1024x896xbf16>
    %cst_55 = arith.constant dense<0.000000e+00> : vector<8x896xf32>
    %107 = tpu.matmul %105, %106, %cst_55 {dimension_numbers = #tpu.dot_dimension_numbers<[1], [0], [0], [1], [0, 0, 1, 1], [], []>} : vector<8x1024xbf16>, vector<1024x896xbf16>, vector<8x896xf32> -> vector<8x896xf32>
    %c0_56 = arith.constant 0 : index
    %c0_57 = arith.constant 0 : index
    %108 = vector.load %arg16[%c0_56, %c0_57] : memref<1x896xf32, #tpu.memory_space<vmem>>, vector<1x896xf32>
    %109 = vector.broadcast %108 : vector<1x896xf32> to vector<8x896xf32>
    %110 = arith.addf %107, %109 : vector<8x896xf32>
    %111 = math.tanh %110 : vector<8x896xf32>
    %c0_58 = arith.constant 0 : index
    %c0_59 = arith.constant 0 : index
    %112 = vector.load %arg17[%c0_58, %c0_59] : memref<8x896xf32, #tpu.memory_space<vmem>>, vector<8x896xf32>
    tpu.vector_store %arg17[%c0_58, %c0_59], %111 {strides = array<i32>} : memref<8x896xf32, #tpu.memory_space<vmem>>, vector<8x896xf32>,
    return
  }
}

</mosaic_0001>

<bundles_post_ra>
// kernel: generator_forward.1
= control target key start
LH: loop header
LB: loop body
LE: loop exit
PB: predicated region body
PF: predicated region fallthrough
CT: control target
= control target key end

     0   :  { %s9660_s0 = inlined_call_operand.hbm [shape: f32[8,32], index: 0, kind: input, shape index: {}]   ;;  %s9661_s1 = inlined_call_operand.hbm [shape: f32[8,8], index: 1, kind: input, shape index: {}]   ;;  %s9662_s2 = inlined_call_operand.hbm [shape: bf16[32,256], index: 2, kind: input, shape index: {}]   ;;  %s9663_s3 = inlined_call_operand.hbm [shape: bf16[8,256], index: 3, kind: input, shape index: {}]   ;;  %s9664_s4 = inlined_call_operand.hbm [shape: f32[1,256], index: 4, kind: input, shape index: {}]   ;;  %s9665_s5 = inlined_call_operand.hbm [shape: f32[1,256], index: 5, kind: input, shape index: {}]   ;;  %s9666_s6 = inlined_call_operand.hbm [shape: f32[1,256], index: 6, kind: input, shape index: {}]   ;;  %s9667_s7 = inlined_call_operand.hbm [shape: bf16[256,512], index: 7, kind: input, shape index: {}]   ;;  %s9668_s8 = inlined_call_operand.hbm [shape: f32[1,512], index: 8, kind: input, shape index: {}]   ;;  %s9669_s9 = inlined_call_operand.hbm [shape: f32[1,512], index: 9, kind: input, shape index: {}]   ;;  %s9670_s10 = inlined_call_operand.hbm [shape: f32[1,512], index: 10, kind: input, shape index: {}]   ;;  %s9671_s11 = inlined_call_operand.hbm [shape: bf16[512,1024], index: 11, kind: input, shape index: {}]   ;;  %s9672_s12 = inlined_call_operand.hbm [shape: f32[1,1024], index: 12, kind: input, shape index: {}]   ;;  %s9673_s13 = inlined_call_operand.hbm [shape: f32[1,1024], index: 13, kind: input, shape index: {}]   ;;  %s9674_s14 = inlined_call_operand.hbm [shape: f32[1,1024], index: 14, kind: input, shape index: {}]   ;;  %s9675_s15 = inlined_call_operand.hbm [shape: bf16[1024,896], index: 15, kind: input, shape index: {}]   ;;  %s9676_s16 = inlined_call_operand.hbm [shape: f32[1,896], index: 16, kind: input, shape index: {}]   ;;  %s9677_s17 = inlined_call_operand.hbm [shape: f32[8,896], index: 17, kind: output, shape index: {}]  }
   0x1   :  { %9680 = sst [smem:[#allocation40_spill]] %s9660_s0 }
   0x2   :  { %9681 = sst [smem:[#allocation41_spill]] %s9661_s1 }
   0x3   :  { %22 = vsyncpa [#allocation3], 0 }
   0x4   :  { %23 = vsyncpa [#allocation6], 0 }
   0x5   :  { %24 = vsyncpa [#allocation9], 0 }
   0x6   :  { %25 = vsyncpa [#allocation12], 0 }
   0x7   :  { %26 = vsyncpa [#allocation15], 0 }
   0x8   :  { %27 = vsyncpa [#allocation18], 0 }
   0x9   :  { %28 = vsyncpa [#allocation21], 0 }
   0xa   :  { %29 = vsyncpa [#allocation24], 0 }
   0xb   :  { %30 = vsyncpa [#allocation27], 0 }
   0xc   :  { %31 = vsyncpa [#allocation4], 0  ;;  %s9008_s24 = smov [#allocation5]   ;;  %s9009_s26 = smov [#allocation8]  }
   0xd   :  { %s48_s25 = sshll.u32 %s9008_s24, 4  ;;  %s70_s27 = sshll.u32 %s9009_s26, 4  ;;  %s49_s25 = int_to_ptr.vmem [resolvable:$true] %s48_s25  ;;  %s71_s27 = int_to_ptr.vmem [resolvable:$true] %s70_s27 }
   0xe   :  { %s9682_s0 = sld [smem:[#allocation41_spill]] }
  0x14   :  { %s8592_s30 = scalar_lea.hbm %s9682_s0, 128 }
  0x15   :  { %p8593_p0 = scmp.ne.s32.totalorder %s9682_s0, %s8592_s30  ;;  %p8596_p1 = scmp.lt.u32.totalorder %s8592_s30, %s9682_s0 }
  0x17   :  { %p8598_p2 = pnand %p8596_p1, %p8593_p0 }
  0x19   :  { %8601 = shalt.err (!%p8598_p2)
}
  0x1a   :  { %s8602_s21 = scalar_lea.vmem %s49_s25, 128  ;;  %p8607_p4 = scmp.lt.s32.totalorder %s49_s25, %s49_s25 }
  0x1b   :  { %p8603_p3 = scmp.ne.s32.totalorder %s49_s25, %s8602_s21  ;;  %p8608_p5 = scmp.lt.s32.totalorder %s8602_s21, %s8602_s21 }
  0x1d   :  { %p8609_p6 = por %p8608_p5, %p8607_p4 }
  0x1f   :  { %p8610_p7 = pnand %p8609_p6, %p8603_p3 }
  0x21   :  { %8613 = shalt.err (!%p8610_p7)
}
  0x22   :  { %51 = dma.hbm_to_vmem [thread:$0]  %s9682_s0, 128, %s49_s25, [#allocation6]  }
  0x23   :  { %s8614_s28 = scalar_lea.hbm %s9663_s3, 128 }
  0x24   :  { %p8615_p8 = scmp.ne.s32.totalorder %s9663_s3, %s8614_s28  ;;  %p8618_p9 = scmp.lt.u32.totalorder %s8614_s28, %s9663_s3 }
  0x26   :  { %p8620_p10 = pnand %p8618_p9, %p8615_p8 }
  0x28   :  { %8623 = shalt.err (!%p8620_p10)
}
  0x29   :  { %s8624_s1 = scalar_lea.vmem %s71_s27, 128  ;;  %p8629_p12 = scmp.lt.s32.totalorder %s71_s27, %s71_s27 }
  0x2a   :  { %p8625_p11 = scmp.ne.s32.totalorder %s71_s27, %s8624_s1  ;;  %p8630_p13 = scmp.lt.s32.totalorder %s8624_s1, %s8624_s1 }
  0x2c   :  { %p8631_p0 = por %p8630_p13, %p8629_p12 }
  0x2e   :  { %p8632_p1 = pnand %p8631_p0, %p8625_p11 }
  0x30   :  { %8635 = shalt.err (!%p8632_p1)
}
  0x31   :  { %73 = dma.hbm_to_vmem [thread:$0]  %s9663_s3, 128, %s71_s27, [#allocation9]  }
  0x32   :  { %s9010_s20 = smov [#allocation11]   ;;  %s9011_s22 = smov [#allocation14]  }
  0x33   :  { %s90_s21 = sshll.u32 %s9010_s20, 4  ;;  %s109_s23 = sshll.u32 %s9011_s22, 4  ;;  %s91_s21 = int_to_ptr.vmem [resolvable:$true] %s90_s21  ;;  %s9149_s23 = int_to_ptr.vmem [resolvable:$true] %s109_s23 }
  0x34   :  { %s8636_s28 = scalar_lea.hbm %s9665_s5, 32 }
  0x35   :  { %p8637_p2 = scmp.ne.s32.totalorder %s9665_s5, %s8636_s28  ;;  %p8640_p3 = scmp.lt.u32.totalorder %s8636_s28, %s9665_s5 }
  0x37   :  { %p8642_p4 = pnand %p8640_p3, %p8637_p2 }
  0x39   :  { %8645 = shalt.err (!%p8642_p4)
}
  0x3a   :  { %s8646_s3 = scalar_lea.vmem %s91_s21, 32  ;;  %p8651_p6 = scmp.lt.s32.totalorder %s91_s21, %s91_s21 }
  0x3b   :  { %p8647_p5 = scmp.ne.s32.totalorder %s91_s21, %s8646_s3  ;;  %p8652_p7 = scmp.lt.s32.totalorder %s8646_s3, %s8646_s3 }
  0x3d   :  { %p8653_p8 = por %p8652_p7, %p8651_p6 }
  0x3f   :  { %p8654_p9 = pnand %p8653_p8, %p8647_p5 }
  0x41   :  { %8657 = shalt.err (!%p8654_p9)
}
  0x42   :  { %93 = dma.hbm_to_vmem [thread:$0]  %s9665_s5, 32, %s91_s21, [#allocation12]  }
  0x43   :  { %s8658_s20 = scalar_lea.hbm %s9667_s7, 8192 }
  0x44   :  { %p8659_p10 = scmp.ne.s32.totalorder %s9667_s7, %s8658_s20  ;;  %p8662_p11 = scmp.lt.u32.totalorder %s8658_s20, %s9667_s7 }
  0x46   :  { %p8664_p12 = pnand %p8662_p11, %p8659_p10 }
  0x48   :  { %8667 = shalt.err (!%p8664_p12)
}
  0x49   :  { %s8668_s29 = scalar_lea.vmem %s9149_s23, 8192  ;;  %p8673_p0 = scmp.lt.s32.totalorder %s9149_s23, %s9149_s23 }
  0x4a   :  { %p8669_p13 = scmp.ne.s32.totalorder %s9149_s23, %s8668_s29  ;;  %p8674_p1 = scmp.lt.s32.totalorder %s8668_s29, %s8668_s29 }
  0x4c   :  { %p8675_p2 = por %p8674_p1, %p8673_p0 }
  0x4e   :  { %p8676_p3 = pnand %p8675_p2, %p8669_p13 }
  0x50   :  { %8679 = shalt.err (!%p8676_p3)
}
  0x51   :  { %s9012_s5 = smov 256   ;;  %s9013_s21 = smov 16  }
  0x52   :  { %115 = dma.hbm_to_vmem [thread:$0]  %s9667_s7, 8192, %s9149_s23, [#allocation15], %s9012_s5, %s9012_s5, %s9013_s21  }
  0x53   :  { %s9014_s19 = smov [#allocation17]   ;;  %s9015_s27 = smov [#allocation20]  }
  0x54   :  { %s132_s3 = sshll.u32 %s9014_s19, 4  ;;  %s151_s1 = sshll.u32 %s9015_s27, 4  ;;  %s133_s3 = int_to_ptr.vmem [resolvable:$true] %s132_s3  ;;  %s9180_s1 = int_to_ptr.vmem [resolvable:$true] %s151_s1 }
  0x55   :  { %s8680_s20 = scalar_lea.hbm %s9669_s9, 64 }
  0x56   :  { %p8681_p4 = scmp.ne.s32.totalorder %s9669_s9, %s8680_s20  ;;  %p8684_p5 = scmp.lt.u32.totalorder %s8680_s20, %s9669_s9 }
  0x58   :  { %p8686_p6 = pnand %p8684_p5, %p8681_p4 }
  0x5a   :  { %8689 = shalt.err (!%p8686_p6)
}
  0x5b   :  { %s8690_s7 = scalar_lea.vmem %s133_s3, 64  ;;  %p8695_p8 = scmp.lt.s32.totalorder %s133_s3, %s133_s3 }
  0x5c   :  { %p8691_p7 = scmp.ne.s32.totalorder %s133_s3, %s8690_s7  ;;  %p8696_p9 = scmp.lt.s32.totalorder %s8690_s7, %s8690_s7 }
  0x5e   :  { %p8697_p10 = por %p8696_p9, %p8695_p8 }
  0x60   :  { %p8698_p11 = pnand %p8697_p10, %p8691_p7 }
  0x62   :  { %8701 = shalt.err (!%p8698_p11)
}
  0x63   :  { %135 = dma.hbm_to_vmem [thread:$0]  %s9669_s9, 64, %s133_s3, [#allocation18]  }
  0x64   :  { %s8702_s18 = scalar_lea.hbm %s9671_s11, 32768 }
  0x65   :  { %p8703_p12 = scmp.ne.s32.totalorder %s9671_s11, %s8702_s18  ;;  %p8706_p13 = scmp.lt.u32.totalorder %s8702_s18, %s9671_s11 }
  0x67   :  { %p8708_p0 = pnand %p8706_p13, %p8703_p12 }
  0x69   :  { %8711 = shalt.err (!%p8708_p0)
}
  0x6a   :  { %s8712_s0 = scalar_lea.vmem %s9180_s1, 32768  ;;  %p8717_p2 = scmp.lt.s32.totalorder %s9180_s1, %s9180_s1 }
  0x6b   :  { %p8713_p1 = scmp.ne.s32.totalorder %s9180_s1, %s8712_s0  ;;  %p8718_p3 = scmp.lt.s32.totalorder %s8712_s0, %s8712_s0 }
  0x6d   :  { %p8719_p4 = por %p8718_p3, %p8717_p2 }
  0x6f   :  { %p8720_p5 = pnand %p8719_p4, %p8713_p1 }
  0x71   :  { %8723 = shalt.err (!%p8720_p5)
}
  0x72   :  { %s9016_s9 = smov 512   ;;  %s9017_s3 = smov 32  }
  0x73   :  { %157 = dma.hbm_to_vmem [thread:$0]  %s9671_s11, 32768, %s9180_s1, [#allocation21], %s9016_s9, %s9016_s9, %s9017_s3  }
  0x74   :  { %s9018_s24 = smov [#allocation23]   ;;  %s9019_s28 = smov [#allocation26]  }
  0x75   :  { %s174_s26 = sshll.u32 %s9018_s24, 4  ;;  %s193_s7 = sshll.u32 %s9019_s28, 4  ;;  %s175_s26 = int_to_ptr.vmem [resolvable:$true] %s174_s26  ;;  %s9211_s7 = int_to_ptr.vmem [resolvable:$true] %s193_s7 }
  0x76   :  { %s8724_s5 = scalar_lea.hbm %s9673_s13, 128 }
  0x77   :  { %p8725_p6 = scmp.ne.s32.totalorder %s9673_s13, %s8724_s5  ;;  %p8728_p7 = scmp.lt.u32.totalorder %s8724_s5, %s9673_s13 }
  0x79   :  { %p8730_p8 = pnand %p8728_p7, %p8725_p6 }
  0x7b   :  { %8733 = shalt.err (!%p8730_p8)
}
  0x7c   :  { %s8734_s11 = scalar_lea.vmem %s175_s26, 128  ;;  %p8739_p10 = scmp.lt.s32.totalorder %s175_s26, %s175_s26 }
  0x7d   :  { %p8735_p9 = scmp.ne.s32.totalorder %s175_s26, %s8734_s11  ;;  %p8740_p11 = scmp.lt.s32.totalorder %s8734_s11, %s8734_s11 }
  0x7f   :  { %p8741_p12 = por %p8740_p11, %p8739_p10 }
  0x81   :  { %p8742_p13 = pnand %p8741_p12, %p8735_p9 }
  0x83   :  { %8745 = shalt.err (!%p8742_p13)
}
  0x84   :  { %177 = dma.hbm_to_vmem [thread:$0]  %s9673_s13, 128, %s175_s26, [#allocation24]  }
  0x85   :  { %s8746_s9 = scalar_lea.hbm %s9675_s15, 57344 }
  0x86   :  { %p8747_p0 = scmp.ne.s32.totalorder %s9675_s15, %s8746_s9  ;;  %p8750_p1 = scmp.lt.u32.totalorder %s8746_s9, %s9675_s15 }
  0x88   :  { %p8752_p2 = pnand %p8750_p1, %p8747_p0 }
  0x8a   :  { %8755 = shalt.err (!%p8752_p2)
}
  0x8b   :  { %s8756_s28 = scalar_lea.vmem %s9211_s7, 57344  ;;  %p8761_p4 = scmp.lt.s32.totalorder %s9211_s7, %s9211_s7 }
  0x8c   :  { %p8757_p3 = scmp.ne.s32.totalorder %s9211_s7, %s8756_s28  ;;  %p8762_p5 = scmp.lt.s32.totalorder %s8756_s28, %s8756_s28 }
  0x8e   :  { %p8763_p6 = por %p8762_p5, %p8761_p4 }
  0x90   :  { %p8764_p7 = pnand %p8763_p6, %p8757_p3 }
  0x92   :  { %8767 = shalt.err (!%p8764_p7)
}
  0x93   :  { %s9020_s13 = smov 448   ;;  %s9021_s26 = smov 28  }
  0x94   :  { %199 = dma.hbm_to_vmem [thread:$0]  %s9675_s15, 57344, %s9211_s7, [#allocation27], %s9020_s13, %s9020_s13, %s9021_s26  }
  0x95   :  { %s9022_s5 = smov [#allocation2]   ;;  %s9023_s18 = smov [#allocation7]  }
  0x96   :  { %s38_s21 = sshll.u32 %s9022_s5, 4  ;;  %s57_s30 = sshll.u32 %s9023_s18, 4  ;;  %s39_s21 = int_to_ptr.vmem [resolvable:$true] %s38_s21  ;;  %s9242_s30 = int_to_ptr.vmem [resolvable:$true] %s57_s30 }
  0x97   :  { %s9683_s1 = sld [smem:[#allocation40_spill]] }
  0x9d   :  { %s8768_s27 = scalar_lea.hbm %s9683_s1, 128 }
  0x9e   :  { %p8769_p8 = scmp.ne.s32.totalorder %s9683_s1, %s8768_s27  ;;  %p8772_p9 = scmp.lt.u32.totalorder %s8768_s27, %s9683_s1 }
  0xa0   :  { %p8774_p10 = pnand %p8772_p9, %p8769_p8 }
  0xa2   :  { %8777 = shalt.err (!%p8774_p10)
}
  0xa3   :  { %s8778_s15 = scalar_lea.vmem %s39_s21, 128  ;;  %p8783_p12 = scmp.lt.s32.totalorder %s39_s21, %s39_s21 }
  0xa4   :  { %p8779_p11 = scmp.ne.s32.totalorder %s39_s21, %s8778_s15  ;;  %p8784_p13 = scmp.lt.s32.totalorder %s8778_s15, %s8778_s15 }
  0xa6   :  { %p8785_p0 = por %p8784_p13, %p8783_p12 }
  0xa8   :  { %p8786_p1 = pnand %p8785_p0, %p8779_p11 }
  0xaa   :  { %8789 = shalt.err (!%p8786_p1)
}
  0xab   :  { %41 = dma.hbm_to_vmem [thread:$0]  %s9683_s1, 128, %s39_s21, [#allocation3]  }
  0xac   :  { %s8790_s28 = scalar_lea.hbm %s9662_s2, 512 }
  0xad   :  { %p8791_p2 = scmp.ne.s32.totalorder %s9662_s2, %s8790_s28  ;;  %p8794_p3 = scmp.lt.u32.totalorder %s8790_s28, %s9662_s2 }
  0xaf   :  { %p8796_p4 = pnand %p8794_p3, %p8791_p2 }
  0xb1   :  { %8799 = shalt.err (!%p8796_p4)
}
  0xb2   :  { %s8800_s5 = scalar_lea.vmem %s9242_s30, 512  ;;  %p8805_p6 = scmp.lt.s32.totalorder %s9242_s30, %s9242_s30 }
  0xb3   :  { %p8801_p5 = scmp.ne.s32.totalorder %s9242_s30, %s8800_s5  ;;  %p8806_p7 = scmp.lt.s32.totalorder %s8800_s5, %s8800_s5 }
  0xb5   :  { %p8807_p8 = por %p8806_p7, %p8805_p6 }
  0xb7   :  { %p8808_p9 = pnand %p8807_p8, %p8801_p5 }
  0xb9   :  { %8811 = shalt.err (!%p8808_p9)
}
  0xba   :  { %s9024_s21 = smov 128   ;;  %s9025_s18 = smov 8  }
  0xbb   :  { %63 = dma.hbm_to_vmem [thread:$0]  %s9662_s2, 512, %s9242_s30, [#allocation6], %s9024_s21, %s9024_s21, %s9025_s18  }
  0xbc   :  { %s9026_s1 = smov [#allocation10]   ;;  %s9027_s25 = smov [#allocation13]  }
  0xbd   :  { %s80_s27 = sshll.u32 %s9026_s1, 4  ;;  %s100_s0 = sshll.u32 %s9027_s25, 4  ;;  %s81_s27 = int_to_ptr.vmem [resolvable:$true] %s80_s27  ;;  %s101_s0 = int_to_ptr.vmem [resolvable:$true] %s100_s0 }
  0xbe   :  { %s8812_s15 = scalar_lea.hbm %s9664_s4, 32 }
  0xbf   :  { %p8813_p10 = scmp.ne.s32.totalorder %s9664_s4, %s8812_s15  ;;  %p8816_p11 = scmp.lt.u32.totalorder %s8812_s15, %s9664_s4 }
  0xc1   :  { %p8818_p12 = pnand %p8816_p11, %p8813_p10 }
  0xc3   :  { %8821 = shalt.err (!%p8818_p12)
}
  0xc4   :  { %s8822_s2 = scalar_lea.vmem %s81_s27, 32  ;;  %p8827_p0 = scmp.lt.s32.totalorder %s81_s27, %s81_s27 }
  0xc5   :  { %p8823_p13 = scmp.ne.s32.totalorder %s81_s27, %s8822_s2  ;;  %p8828_p1 = scmp.lt.s32.totalorder %s8822_s2, %s8822_s2 }
  0xc7   :  { %p8829_p2 = por %p8828_p1, %p8827_p0 }
  0xc9   :  { %p8830_p3 = pnand %p8829_p2, %p8823_p13 }
  0xcb   :  { %8833 = shalt.err (!%p8830_p3)
}
  0xcc   :  { %83 = dma.hbm_to_vmem [thread:$0]  %s9664_s4, 32, %s81_s27, [#allocation9]  }
  0xcd   :  { %s8834_s23 = scalar_lea.hbm %s9666_s6, 32 }
  0xce   :  { %p8835_p4 = scmp.ne.s32.totalorder %s9666_s6, %s8834_s23  ;;  %p8838_p5 = scmp.lt.u32.totalorder %s8834_s23, %s9666_s6 }
  0xd0   :  { %p8840_p6 = pnand %p8838_p5, %p8835_p4 }
  0xd2   :  { %8843 = shalt.err (!%p8840_p6)
}
  0xd3   :  { %s8844_s19 = scalar_lea.vmem %s101_s0, 32  ;;  %p8849_p8 = scmp.lt.s32.totalorder %s101_s0, %s101_s0 }
  0xd4   :  { %p8845_p7 = scmp.ne.s32.totalorder %s101_s0, %s8844_s19  ;;  %p8850_p9 = scmp.lt.s32.totalorder %s8844_s19, %s8844_s19 }
  0xd6   :  { %p8851_p10 = por %p8850_p9, %p8849_p8 }
  0xd8   :  { %p8852_p11 = pnand %p8851_p10, %p8845_p7 }
  0xda   :  { %8855 = shalt.err (!%p8852_p11)
}
  0xdb   :  { %103 = dma.hbm_to_vmem [thread:$0]  %s9666_s6, 32, %s101_s0, [#allocation12]  }
  0xdc   :  { %s9028_s1 = smov [#allocation16]   ;;  %s9029_s25 = smov [#allocation19]  }
  0xdd   :  { %s122_s27 = sshll.u32 %s9028_s1, 4  ;;  %s142_s9 = sshll.u32 %s9029_s25, 4  ;;  %s123_s27 = int_to_ptr.vmem [resolvable:$true] %s122_s27  ;;  %s143_s9 = int_to_ptr.vmem [resolvable:$true] %s142_s9 }
  0xde   :  { %s8856_s7 = scalar_lea.hbm %s9668_s8, 64 }
  0xdf   :  { %p8857_p12 = scmp.ne.s32.totalorder %s9668_s8, %s8856_s7  ;;  %p8860_p13 = scmp.lt.u32.totalorder %s8856_s7, %s9668_s8 }
  0xe1   :  { %p8862_p0 = pnand %p8860_p13, %p8857_p12 }
  0xe3   :  { %8865 = shalt.err (!%p8862_p0)
}
  0xe4   :  { %s8866_s6 = scalar_lea.vmem %s123_s27, 64  ;;  %p8871_p2 = scmp.lt.s32.totalorder %s123_s27, %s123_s27 }
  0xe5   :  { %p8867_p1 = scmp.ne.s32.totalorder %s123_s27, %s8866_s6  ;;  %p8872_p3 = scmp.lt.s32.totalorder %s8866_s6, %s8866_s6 }
  0xe7   :  { %p8873_p4 = por %p8872_p3, %p8871_p2 }
  0xe9   :  { %p8874_p5 = pnand %p8873_p4, %p8867_p1 }
  0xeb   :  { %8877 = shalt.err (!%p8874_p5)
}
  0xec   :  { %125 = dma.hbm_to_vmem [thread:$0]  %s9668_s8, 64, %s123_s27, [#allocation15]  }
  0xed   :  { %s8878_s26 = scalar_lea.hbm %s9670_s10, 64 }
  0xee   :  { %p8879_p6 = scmp.ne.s32.totalorder %s9670_s10, %s8878_s26  ;;  %p8882_p7 = scmp.lt.u32.totalorder %s8878_s26, %s9670_s10 }
  0xf0   :  { %p8884_p8 = pnand %p8882_p7, %p8879_p6 }
  0xf2   :  { %8887 = shalt.err (!%p8884_p8)
}
  0xf3   :  { %s8888_s18 = scalar_lea.vmem %s143_s9, 64  ;;  %p8893_p10 = scmp.lt.s32.totalorder %s143_s9, %s143_s9 }
  0xf4   :  { %p8889_p9 = scmp.ne.s32.totalorder %s143_s9, %s8888_s18  ;;  %p8894_p11 = scmp.lt.s32.totalorder %s8888_s18, %s8888_s18 }
  0xf6   :  { %p8895_p12 = por %p8894_p11, %p8893_p10 }
  0xf8   :  { %p8896_p13 = pnand %p8895_p12, %p8889_p9 }
  0xfa   :  { %8899 = shalt.err (!%p8896_p13)
}
  0xfb   :  { %145 = dma.hbm_to_vmem [thread:$0]  %s9670_s10, 64, %s143_s9, [#allocation18]  }
  0xfc   :  { %s9030_s4 = smov [#allocation22]   ;;  %s9031_s1 = smov [#allocation25]  }
  0xfd   :  { %s164_s11 = sshll.u32 %s9030_s4, 4  ;;  %s184_s27 = sshll.u32 %s9031_s1, 4  ;;  %s165_s11 = int_to_ptr.vmem [resolvable:$true] %s164_s11  ;;  %s185_s27 = int_to_ptr.vmem [resolvable:$true] %s184_s27 }
  0xfe   :  { %s8900_s15 = scalar_lea.hbm %s9672_s12, 128 }
  0xff   :  { %p8901_p0 = scmp.ne.s32.totalorder %s9672_s12, %s8900_s15  ;;  %p8904_p1 = scmp.lt.u32.totalorder %s8900_s15, %s9672_s12 }
 0x101   :  { %p8906_p2 = pnand %p8904_p1, %p8901_p0 }
 0x103   :  { %8909 = shalt.err (!%p8906_p2)
}
 0x104   :  { %s8910_s10 = scalar_lea.vmem %s165_s11, 128  ;;  %p8915_p4 = scmp.lt.s32.totalorder %s165_s11, %s165_s11 }
 0x105   :  { %p8911_p3 = scmp.ne.s32.totalorder %s165_s11, %s8910_s10  ;;  %p8916_p5 = scmp.lt.s32.totalorder %s8910_s10, %s8910_s10 }
 0x107   :  { %p8917_p6 = por %p8916_p5, %p8915_p4 }
 0x109   :  { %p8918_p7 = pnand %p8917_p6, %p8911_p3 }
 0x10b   :  { %8921 = shalt.err (!%p8918_p7)
}
 0x10c   :  { %167 = dma.hbm_to_vmem [thread:$0]  %s9672_s12, 128, %s165_s11, [#allocation21]  }
 0x10d   :  { %s8922_s30 = scalar_lea.hbm %s9674_s14, 128 }
 0x10e   :  { %p8923_p8 = scmp.ne.s32.totalorder %s9674_s14, %s8922_s30  ;;  %p8926_p9 = scmp.lt.u32.totalorder %s8922_s30, %s9674_s14 }
 0x110   :  { %p8928_p10 = pnand %p8926_p9, %p8923_p8 }
 0x112   :  { %8931 = shalt.err (!%p8928_p10)
}
 0x113   :  { %s8932_s29 = scalar_lea.vmem %s185_s27, 128  ;;  %p8937_p12 = scmp.lt.s32.totalorder %s185_s27, %s185_s27 }
 0x114   :  { %p8933_p11 = scmp.ne.s32.totalorder %s185_s27, %s8932_s29  ;;  %p8938_p13 = scmp.lt.s32.totalorder %s8932_s29, %s8932_s29 }
 0x116   :  { %p8939_p0 = por %p8938_p13, %p8937_p12 }
 0x118   :  { %p8940_p1 = pnand %p8939_p0, %p8933_p11 }
 0x11a   :  { %8943 = shalt.err (!%p8940_p1)
}
 0x11b   :  { %187 = dma.hbm_to_vmem [thread:$0]  %s9674_s14, 128, %s185_s27, [#allocation24]  }
 0x11c   :  { %s9032_s21 = smov [#allocation28]   ;;  %s8944_s4 = scalar_lea.hbm %s9676_s16, 112 }
 0x11d   :  { %s206_s18 = sshll.u32 %s9032_s21, 4  ;;  %p8945_p2 = scmp.ne.s32.totalorder %s9676_s16, %s8944_s4  ;;  %s207_s18 = int_to_ptr.vmem [resolvable:$true] %s206_s18 }
 0x11e   :  { %p8948_p3 = scmp.lt.u32.totalorder %s8944_s4, %s9676_s16 }
 0x120   :  { %p8950_p4 = pnand %p8948_p3, %p8945_p2 }
 0x122   :  { %8953 = shalt.err (!%p8950_p4)
}
 0x123   :  { %s8954_s15 = scalar_lea.vmem %s207_s18, 112  ;;  %s8958_s14 = scalar_lea.vmem %s207_s18, 128 }
 0x124   :  { %p8955_p5 = scmp.ne.s32.totalorder %s207_s18, %s8954_s15  ;;  %p8959_p6 = scmp.lt.s32.totalorder %s207_s18, %s207_s18 }
 0x125   :  { %p8960_p7 = scmp.lt.s32.totalorder %s8958_s14, %s8954_s15 }
 0x127   :  { %p8961_p8 = por %p8960_p7, %p8959_p6 }
 0x129   :  { %p8962_p9 = pnand %p8961_p8, %p8955_p5 }
 0x12b   :  { %8965 = shalt.err (!%p8962_p9)
}
 0x12c   :  { %209 = dma.hbm_to_vmem [thread:$0]  %s9676_s16, 112, %s207_s18, [#allocation27]  }
 0x12d   :  { %8988 = dma.done.wait [#allocation3], 128  }
 0x12e   :  { %8989 = vsyncadd [#allocation3], 4294967168 }
 0x12f   :  { %8990 = dma.done.wait [#allocation6], 640  }
 0x130   :  { %8991 = vsyncadd [#allocation6], 4294966656 }
 0x131   :  { %8992 = dma.done.wait [#allocation9], 160  }
 0x132   :  { %8993 = vsyncadd [#allocation9], 4294967136 }
 0x133   :  { %8994 = dma.done.wait [#allocation12], 64  }
 0x134   :  { %8995 = vsyncadd [#allocation12], 4294967232 }
 0x135   :  { %8996 = dma.done.wait [#allocation15], 8256  }
 0x136   :  { %8997 = vsyncadd [#allocation15], 4294959040 }
 0x137   :  { %8998 = dma.done.wait [#allocation18], 128  }
 0x138   :  { %8999 = vsyncadd [#allocation18], 4294967168 }
 0x139   :  { %9000 = dma.done.wait [#allocation21], 32896  }
 0x13a   :  { %9001 = vsyncadd [#allocation21], 4294934400 }
 0x13b   :  { %9002 = dma.done.wait [#allocation24], 256  }
 0x13c   :  { %9003 = vsyncadd [#allocation24], 4294967040 }
 0x13d   :  { %9004 = dma.done.wait [#allocation27], 57456  }
 0x13e   :  { %9005 = vsyncadd [#allocation27], 4294909840  ;;  %v9033_v0 = vmov 0   ;;  %v7804_v1 = vld [vmem:[#allocation7 + $0x4] ss:$8 sps:$4 sm:$0xff]   ;;  %vm280_vm0 = vcmask 1043456   ;;  %v395_v46 = vlaneseq }
 0x13f   :  { %319 = vmatprep.mubr.bf16.mxu0 %v9033_v0  ;;  %384 = vmatprep.mubr.bf16.mxu1 %v9033_v0  ;;  %v270_v2 = vld [vmem:[#allocation8] sm:$0xff]  ;;  %v7809_v6 = vld [vmem:[#allocation7 + $0x14] ss:$8 sps:$4 sm:$0xff]   ;;  %v7811_v8 = vld [vmem:[#allocation7 + $0x10] ss:$8 sps:$4 sm:$0xff]   ;;  %vm276_vm1 = vcmask 64512  }
 0x140   :  { %v7807_v3 = vld [vmem:[#allocation7] ss:$8 sps:$4 sm:$0xff]   ;;  %352 = vmatprep.subr.bf16.mxu1 %v7804_v1  ;;  %v6847_v4 = vcombine.high %v270_v2, %v270_v2  ;;  %v6846_v5 = vcombine.low %v270_v2, %v270_v2  ;;  %v268_v7 = vld [vmem:[#allocation5] sm:$0xff]  ;;  %v262_v9 = vld [vmem:[#allocation2] sm:$0xff]  ;;  %vm348_vm2 = vcmask 261120   ;;  %v9357_v47 = vshrl.u32 %v395_v46, 7 }
 0x141   :  { %353 = vmatpush1.bf16.msra.mxu1 %v7807_v3  ;;  %v269_v11 = vpack.c.bf16 %v268_v7, %v268_v7  ;;  %v263_v12 = vpack.c.bf16 %v262_v9, %v262_v9  ;;  %v7814_v13 = vld [vmem:[#allocation14 + $0x4] ss:$16 sps:$4 sm:$0xff]   ;;  %v7812_v14 = vld [vmem:[#allocation14] ss:$16 sps:$4 sm:$0xff]   ;;  %v7862_v45 = vld [vmem:[#allocation14 + $0xc] ss:$16 sps:$4 sm:$0xff]  }
 0x142   :  { %6848 = vmatprep.subr.msk.bf16.mxu0 %vm280_vm0, %v6847_v4  ;;  %v282_v10 = vsel %vm280_vm0, %v6846_v5, 0  ;;  %354 = vmatprep.subr.bf16.mxu1 %v7809_v6  ;;  %v7817_v15 = vld [vmem:[#allocation14 + $0x24] ss:$16 sps:$4 sm:$0xff]   ;;  %v7815_v16 = vld [vmem:[#allocation14 + $0x20] ss:$16 sps:$4 sm:$0xff]   ;;  %v9360_v49 = vsub.s32 0, %v9357_v47 }
 0x143   :  { %288 = vmatpush1.bf16.msra.mxu0 %v282_v10  ;;  %v7820_v17 = vld [vmem:[#allocation14 + $0x44] ss:$16 sps:$4 sm:$0xff]   ;;  %v7818_v18 = vld [vmem:[#allocation14 + $0x40] ss:$16 sps:$4 sm:$0xff]   ;;  %v393_v48 = vld [vmem:[#allocation10] sm:$0x3] }
 0x144   :  { %v7823_v19 = vld [vmem:[#allocation14 + $0x64] ss:$16 sps:$4 sm:$0xff]   ;;  %v7821_v20 = vld [vmem:[#allocation14 + $0x60] ss:$16 sps:$4 sm:$0xff]   ;;  %v9363_v50 = vsub.s32 1, %v9357_v47  ;;  %v398_v53 = vrot.slane %v393_v48, %v9360_v49  ;;  %s9034_s16 = smov [#allocation29]  }
 0x145   :  { %355 = vmatpush1.bf16.msra.mxu1 %v7811_v8  ;;  %v7826_v21 = vld [vmem:[#allocation14 + $0x84] ss:$16 sps:$4 sm:$0xff]   ;;  %v7824_v22 = vld [vmem:[#allocation14 + $0x80] ss:$16 sps:$4 sm:$0xff]   ;;  %s6829_s20 = sshll.u32 %s9034_s16, 4  ;;  %s6830_s20 = int_to_ptr.vmem [resolvable:$true] %s6829_s20 }
 0x146   :  { %6849 = vmatmul.mubr.msk.bf16.vlgmr.msra.gmra.mrb[0].mxu0 %vm276_vm1, %v269_v11  ;;  %888 = vmatprep.subr.bf16.mxu1 %v7814_v13  ;;  %v7829_v23 = vld [vmem:[#allocation14 + $0xa4] ss:$16 sps:$4 sm:$0xff]   ;;  %v7827_v24 = vld [vmem:[#allocation14 + $0xa0] ss:$16 sps:$4 sm:$0xff]   ;;  %v402_v58 = vrot.slane %v393_v48, %v9363_v50  ;;  %s8966_s22 = scalar_lea.vmem %s6830_s20, 896  ;;  %p8971_p11 = scmp.lt.s32.totalorder %s6830_s20, %s6830_s20 }
 0x147   :  { %v7832_v25 = vld [vmem:[#allocation14 + $0xc4] ss:$16 sps:$4 sm:$0xff]   ;;  %v7830_v26 = vld [vmem:[#allocation14 + $0xc0] ss:$16 sps:$4 sm:$0xff]   ;;  %p8967_p10 = scmp.ne.s32.totalorder %s6830_s20, %s8966_s22  ;;  %p8972_p12 = scmp.lt.s32.totalorder %s8966_s22, %s8966_s22 }
 0x148   :  { %6854 = vmatmul.mubr.msk.bf16.vlgmr.msra.gmra.mrb[0].mxu1 %vm348_vm2, %v263_v12  ;;  %v7835_v27 = vld [vmem:[#allocation14 + $0xe4] ss:$16 sps:$4 sm:$0xff]   ;;  %v7833_v28 = vld [vmem:[#allocation14 + $0xe0] ss:$16 sps:$4 sm:$0xff]  }
 0x149   :  { %889 = vmatpush1.bf16.msra.mxu1 %v7812_v14  ;;  %v7838_v29 = vld [vmem:[#allocation14 + $0x104] ss:$16 sps:$4 sm:$0xff]   ;;  %v7836_v30 = vld [vmem:[#allocation14 + $0x100] ss:$16 sps:$4 sm:$0xff]   ;;  %p8973_p13 = por %p8972_p12, %p8971_p11 }
 0x14a   :  { %890 = vmatprep.subr.bf16.mxu1 %v7817_v15  ;;  %v7841_v31 = vld [vmem:[#allocation14 + $0x124] ss:$16 sps:$4 sm:$0xff]   ;;  %v7839_v32 = vld [vmem:[#allocation14 + $0x120] ss:$16 sps:$4 sm:$0xff]  }
 0x14b   :  { %v7844_v33 = vld [vmem:[#allocation14 + $0x144] ss:$16 sps:$4 sm:$0xff]   ;;  %v7842_v34 = vld [vmem:[#allocation14 + $0x140] ss:$16 sps:$4 sm:$0xff]   ;;  %p8974_p0 = pnand %p8973_p13, %p8967_p10 }
 0x14c   :  { %v7847_v35 = vld [vmem:[#allocation14 + $0x164] ss:$16 sps:$4 sm:$0xff]   ;;  %v7845_v36 = vld [vmem:[#allocation14 + $0x160] ss:$16 sps:$4 sm:$0xff]  }
 0x14d   :  { %891 = vmatpush1.bf16.msra.mxu1 %v7815_v16  ;;  %v7850_v37 = vld [vmem:[#allocation14 + $0x184] ss:$16 sps:$4 sm:$0xff]   ;;  %v7848_v38 = vld [vmem:[#allocation14 + $0x180] ss:$16 sps:$4 sm:$0xff]  }
 0x14e   :  { %892 = vmatprep.subr.bf16.mxu1 %v7820_v17  ;;  %v7853_v39 = vld [vmem:[#allocation14 + $0x1a4] ss:$16 sps:$4 sm:$0xff]   ;;  %v7851_v40 = vld [vmem:[#allocation14 + $0x1a0] ss:$16 sps:$4 sm:$0xff]  }
 0x14f   :  { %v7854_v41 = vld [vmem:[#allocation14 + $0x1c0] ss:$16 sps:$4 sm:$0xff]   ;;  %v7856_v42 = vld [vmem:[#allocation14 + $0x1c4] ss:$16 sps:$4 sm:$0xff]  }
 0x150   :  { %v7859_v43 = vld [vmem:[#allocation14 + $0x1e4] ss:$16 sps:$4 sm:$0xff]   ;;  %v7857_v44 = vld [vmem:[#allocation14 + $0x1e0] ss:$16 sps:$4 sm:$0xff]  }
 0x151   :  { %893 = vmatpush1.bf16.msra.mxu1 %v7818_v18  ;;  %v1114_v54 = vld [vmem:[#allocation20] sm:$0xff] }
 0x152   :  { %894 = vmatprep.subr.bf16.mxu1 %v7823_v19  ;;  %v1118_v55 = vld [vmem:[#allocation20 + $0x20] sm:$0xff] }
 0x153   :  { %v6919_v59 = vcombine.low %v1114_v54, %v1118_v55  ;;  %v6920_v60 = vcombine.high %v1114_v54, %v1118_v55 }
 0x155   :  { %895 = vmatpush1.bf16.msra.mxu1 %v7821_v20  ;;  %2692 = vmatprep.subr.bf16.mxu0 %v6920_v60 }
 0x156   :  { %896 = vmatprep.subr.bf16.mxu1 %v7826_v21  ;;  %2693 = vmatpush1.bf16.msra.mxu0 %v6919_v59 }
 0x159   :  { %897 = vmatpush1.bf16.msra.mxu1 %v7824_v22 }
 0x15a   :  { %898 = vmatprep.subr.bf16.mxu1 %v7829_v23 }
 0x15d   :  { %899 = vmatpush1.bf16.msra.mxu1 %v7827_v24 }
 0x15e   :  { %900 = vmatprep.subr.bf16.mxu1 %v7832_v25 }
 0x161   :  { %901 = vmatpush1.bf16.msra.mxu1 %v7830_v26 }
 0x162   :  { %902 = vmatprep.subr.bf16.mxu1 %v7835_v27 }
 0x165   :  { %903 = vmatpush1.bf16.msra.mxu1 %v7833_v28 }
 0x166   :  { %904 = vmatprep.subr.bf16.mxu1 %v7838_v29 }
 0x169   :  { %905 = vmatpush1.bf16.msra.mxu1 %v7836_v30 }
 0x16a   :  { %906 = vmatprep.subr.bf16.mxu1 %v7841_v31 }
 0x16d   :  { %907 = vmatpush1.bf16.msra.mxu1 %v7839_v32 }
 0x16e   :  { %908 = vmatprep.subr.bf16.mxu1 %v7844_v33 }
 0x171   :  { %909 = vmatpush1.bf16.msra.mxu1 %v7842_v34 }
 0x172   :  { %910 = vmatprep.subr.bf16.mxu1 %v7847_v35 }
 0x175   :  { %911 = vmatpush1.bf16.msra.mxu1 %v7845_v36 }
 0x176   :  { %912 = vmatprep.subr.bf16.mxu1 %v7850_v37 }
 0x179   :  { %913 = vmatpush1.bf16.msra.mxu1 %v7848_v38 }
 0x17a   :  { %914 = vmatprep.subr.bf16.mxu1 %v7853_v39  ;;  %v446_v39 = vld [vmem:[#allocation11] sm:$0x3] }
 0x17d   :  { %915 = vmatpush1.bf16.msra.mxu1 %v7851_v40  ;;  %v460_v40 = vld [vmem:[#allocation13] sm:$0x3] }
 0x17e   :  { %916 = vmatprep.subr.bf16.mxu1 %v7856_v42  ;;  %v465_v46 = vrot.slane %v460_v40, %v9360_v49 }
 0x181   :  { %917 = vmatpush1.bf16.msra.mxu1 %v7854_v41  ;;  %v451_v41 = vrot.slane %v446_v39, %v9360_v49 }
 0x182   :  { %918 = vmatprep.subr.bf16.mxu1 %v7859_v43  ;;  %v455_v43 = vrot.slane %v446_v39, %v9363_v50 }
 0x185   :  { %919 = vmatpush1.bf16.msra.mxu1 %v7857_v44 }
 0x186   :  { %929 = vmatprep.subr.bf16.mxu1 %v7862_v45 }
 0x219   :  { %v321_v51 = vpop.f32.mrb[0].mxu0 }
 0x21a   :  { %v323_v52 = vpop.f32.mrb[1].mxu0 }
 0x21b   :  { %v325_v56 = vpop.f32.mrb[2].mxu0  ;;  %v386_v57 = vpop.f32.mrb[0].mxu1 }
 0x21c   :  { %v326_v61 = vpop.f32.mrb[3].mxu0  ;;  %v387_v62 = vadd.f32 %v386_v57, %v321_v51  ;;  %v388_v63 = vpop.f32.mrb[1].mxu1  ;;  %v469_v51 = vrot.slane %v460_v40, %v9363_v50 }
 0x21d   :  { %v389_v0 = vadd.f32 %v388_v63, %v323_v52  ;;  %v390_v1 = vpop.f32.mrb[2].mxu1  ;;  %v7860_v61 = vld [vmem:[#allocation14 + $0x8] ss:$16 sps:$4 sm:$0xff]   ;;  %v7865_v63 = vld [vmem:[#allocation14 + $0x2c] ss:$16 sps:$4 sm:$0xff]  }
 0x21e   :  { %v405_v2 = vadd.f32 %v398_v53, %v387_v62  ;;  %v391_v3 = vpop.f32.mrb[3].mxu1  ;;  %v7868_v1 = vld [vmem:[#allocation14 + $0x4c] ss:$16 sps:$4 sm:$0xff]  }
 0x21f   :  { %v406_v4 = vadd.f32 %v402_v58, %v389_v0  ;;  %v7863_v0 = vld [vmem:[#allocation14 + $0x28] ss:$16 sps:$4 sm:$0xff]   ;;  %v7871_v3 = vld [vmem:[#allocation14 + $0x6c] ss:$16 sps:$4 sm:$0xff]  }
 0x220   :  { %v407_v5 = vrot.slane %v405_v2, 4 }
 0x221   :  { %v413_v6 = vrot.slane %v406_v4, 4 }
 0x222   :  { %v408_v7 = vadd.f32 %v407_v5, %v405_v2  ;;  %v7874_v5 = vld [vmem:[#allocation14 + $0x8c] ss:$16 sps:$4 sm:$0xff]  }
 0x223   :  { %v414_v8 = vadd.f32 %v413_v6, %v406_v4  ;;  %v7872_v6 = vld [vmem:[#allocation14 + $0x88] ss:$16 sps:$4 sm:$0xff]  }
 0x224   :  { %v409_v9 = vrot.slane %v408_v7, 2 }
 0x225   :  { %v415_v10 = vrot.slane %v414_v8, 2 }
 0x226   :  { %v410_v11 = vadd.f32 %v409_v9, %v408_v7  ;;  %v7877_v7 = vld [vmem:[#allocation14 + $0xac] ss:$16 sps:$4 sm:$0xff]  }
 0x227   :  { %v416_v12 = vadd.f32 %v415_v10, %v414_v8  ;;  %v7875_v8 = vld [vmem:[#allocation14 + $0xa8] ss:$16 sps:$4 sm:$0xff]   ;;  %v7880_v9 = vld [vmem:[#allocation14 + $0xcc] ss:$16 sps:$4 sm:$0xff]  }
 0x228   :  { %v411_v13 = vrot.slane %v410_v11, 1  ;;  %v7878_v10 = vld [vmem:[#allocation14 + $0xc8] ss:$16 sps:$4 sm:$0xff]  }
 0x229   :  { %v417_v14 = vrot.slane %v416_v12, 1 }
 0x22a   :  { %v412_v15 = vadd.f32 %v411_v13, %v410_v11  ;;  %v7883_v11 = vld [vmem:[#allocation14 + $0xec] ss:$16 sps:$4 sm:$0xff]  }
 0x22b   :  { %v418_v16 = vadd.f32 %v417_v14, %v416_v12  ;;  %v7881_v12 = vld [vmem:[#allocation14 + $0xe8] ss:$16 sps:$4 sm:$0xff]   ;;  %v7886_v13 = vld [vmem:[#allocation14 + $0x10c] ss:$16 sps:$4 sm:$0xff]  }
 0x22c   :  { %v420_v17 = vmul.f32 0.125, %v412_v15  ;;  %v7884_v14 = vld [vmem:[#allocation14 + $0x108] ss:$16 sps:$4 sm:$0xff]   ;;  %v7889_v15 = vld [vmem:[#allocation14 + $0x12c] ss:$16 sps:$4 sm:$0xff]  }
 0x22d   :  { %v421_v18 = vmul.f32 0.125, %v418_v16  ;;  %v7887_v16 = vld [vmem:[#allocation14 + $0x128] ss:$16 sps:$4 sm:$0xff]  }
 0x22e   :  { %v422_v19 = vsub.f32 %v405_v2, %v420_v17  ;;  %v7866_v2 = vld [vmem:[#allocation14 + $0x48] ss:$16 sps:$4 sm:$0xff]   ;;  %v7892_v17 = vld [vmem:[#allocation14 + $0x14c] ss:$16 sps:$4 sm:$0xff]  }
 0x22f   :  { %v423_v20 = vsub.f32 %v406_v4, %v421_v18  ;;  %v7869_v4 = vld [vmem:[#allocation14 + $0x68] ss:$16 sps:$4 sm:$0xff]  }
 0x230   :  { %v424_v21 = vmul.f32 %v422_v19, %v422_v19  ;;  %v7890_v18 = vld [vmem:[#allocation14 + $0x148] ss:$16 sps:$4 sm:$0xff]  }
 0x231   :  { %v425_v22 = vmul.f32 %v423_v20, %v423_v20 }
 0x232   :  { %v426_v23 = vrot.slane %v424_v21, 4 }
 0x233   :  { %v432_v24 = vrot.slane %v425_v22, 4 }
 0x234   :  { %v427_v25 = vadd.f32 %v426_v23, %v424_v21  ;;  %v7898_v21 = vld [vmem:[#allocation14 + $0x18c] ss:$16 sps:$4 sm:$0xff]  }
 0x235   :  { %v433_v26 = vadd.f32 %v432_v24, %v425_v22  ;;  %v7896_v22 = vld [vmem:[#allocation14 + $0x188] ss:$16 sps:$4 sm:$0xff]   ;;  %v7901_v23 = vld [vmem:[#allocation14 + $0x1ac] ss:$16 sps:$4 sm:$0xff]  }
 0x236   :  { %v428_v27 = vrot.slane %v427_v25, 2  ;;  %v7899_v24 = vld [vmem:[#allocation14 + $0x1a8] ss:$16 sps:$4 sm:$0xff]  }
 0x237   :  { %v434_v28 = vrot.slane %v433_v26, 2 }
 0x238   :  { %v429_v29 = vadd.f32 %v428_v27, %v427_v25  ;;  %v7904_v25 = vld [vmem:[#allocation14 + $0x1cc] ss:$16 sps:$4 sm:$0xff]  }
 0x239   :  { %v435_v30 = vadd.f32 %v434_v28, %v433_v26  ;;  %v7902_v26 = vld [vmem:[#allocation14 + $0x1c8] ss:$16 sps:$4 sm:$0xff]   ;;  %v7907_v27 = vld [vmem:[#allocation14 + $0x1ec] ss:$16 sps:$4 sm:$0xff]  }
 0x23a   :  { %v430_v31 = vrot.slane %v429_v29, 1  ;;  %v1115_v28 = vld [vmem:[#allocation20 + $0x8] sm:$0xff] }
 0x23b   :  { %v436_v32 = vrot.slane %v435_v30, 1 }
 0x23c   :  { %v431_v33 = vadd.f32 %v430_v31, %v429_v29  ;;  %v1119_v29 = vld [vmem:[#allocation20 + $0x28] sm:$0xff] }
 0x23d   :  { %v437_v34 = vadd.f32 %v436_v32, %v435_v30  ;;  %v7905_v30 = vld [vmem:[#allocation14 + $0x1e8] ss:$16 sps:$4 sm:$0xff]   ;;  %v6922_v31 = vcombine.high %v1115_v28, %v1119_v29  ;;  %v6921_v32 = vcombine.low %v1115_v28, %v1119_v29  ;;  %v1178_v28 = vld [vmem:[#allocation20 + $0x200] sm:$0xff] }
 0x23e   :  { %v438_v35 = vmul.f32 0.125, %v431_v33  ;;  %v1122_v33 = vld [vmem:[#allocation20 + $0x40] sm:$0xff] }
 0x23f   :  { %v439_v36 = vmul.f32 0.125, %v437_v34  ;;  %v1126_v34 = vld [vmem:[#allocation20 + $0x60] sm:$0xff] }
 0x240   :  { %v440_v37 = vadd.f32 1e-05, %v438_v35  ;;  %v1123_v35 = vld [vmem:[#allocation20 + $0x48] sm:$0xff]  ;;  %v1182_v29 = vld [vmem:[#allocation20 + $0x220] sm:$0xff] }
 0x241   :  { %v441_v38 = vadd.f32 1e-05, %v439_v36  ;;  %v6928_v36 = vcombine.high %v1122_v33, %v1126_v34 }
 0x242   :  { %8548 = vrsqrt.f32 %v440_v37  ;;  %v1127_v37 = vld [vmem:[#allocation20 + $0x68] sm:$0xff] }
 0x243   :  { %8550 = vrsqrt.f32 %v441_v38  ;;  %v6927_v38 = vcombine.low %v1122_v33, %v1126_v34  ;;  %v6929_v39 = vcombine.low %v1123_v35, %v1127_v37  ;;  %v6930_v40 = vcombine.high %v1123_v35, %v1127_v37  ;;  %2694 = vmatprep.subr.bf16.mxu0 %v6928_v36  ;;  %v1186_v36 = vld [vmem:[#allocation20 + $0x240] sm:$0xff] }
 0x244   :  { %v6983_v33 = vcombine.low %v1178_v28, %v1182_v29  ;;  %v1190_v37 = vld [vmem:[#allocation20 + $0x260] sm:$0xff] }
 0x245   :  { %2695 = vmatpush1.bf16.msra.mxu0 %v6927_v38  ;;  %v1187_v38 = vld [vmem:[#allocation20 + $0x248] sm:$0xff] }
 0x24c   :  { %v8549_v42 = vpop.eup %8548 }
 0x24d   :  { %v8551_v44 = vpop.eup %8550  ;;  %v444_v45 = vmul.f32 %v8549_v42, %v422_v19  ;;  %v7895_v19 = vld [vmem:[#allocation14 + $0x16c] ss:$16 sps:$4 sm:$0xff]  }
 0x24e   :  { %v445_v48 = vmul.f32 %v8551_v44, %v423_v20  ;;  %v7893_v20 = vld [vmem:[#allocation14 + $0x168] ss:$16 sps:$4 sm:$0xff]   ;;  %v1134_v42 = vld [vmem:[#allocation20 + $0xa0] sm:$0xff] }
 0x24f   :  { %v458_v52 = vmul.f32 %v451_v41, %v444_v45  ;;  %v1130_v41 = vld [vmem:[#allocation20 + $0x80] sm:$0xff]  ;;  %v1135_v45 = vld [vmem:[#allocation20 + $0xa8] sm:$0xff] }
 0x250   :  { %v459_v53 = vmul.f32 %v455_v43, %v445_v48  ;;  %v1131_v43 = vld [vmem:[#allocation20 + $0x88] sm:$0xff]  ;;  %v6936_v44 = vcombine.high %v1130_v41, %v1134_v42 }
 0x251   :  { %v472_v54 = vadd.f32 %v465_v46, %v458_v52  ;;  %v6935_v46 = vcombine.low %v1130_v41, %v1134_v42  ;;  %v6937_v48 = vcombine.low %v1131_v43, %v1135_v45  ;;  %v1138_v52 = vld [vmem:[#allocation20 + $0xc0] sm:$0xff]  ;;  %v6991_v41 = vcombine.low %v1186_v36, %v1190_v37 }
 0x252   :  { %v473_v55 = vadd.f32 %v469_v51, %v459_v53  ;;  %v6938_v51 = vcombine.high %v1131_v43, %v1135_v45  ;;  %2696 = vmatprep.subr.bf16.mxu0 %v6936_v44  ;;  %v1142_v53 = vld [vmem:[#allocation20 + $0xe0] sm:$0xff] }
 0x253   :  { %vm474_vm3 = vcmp.gt.f32.partialorder %v472_v54, 0.0  ;;  %v476_v56 = vmul.f32 0.2, %v472_v54  ;;  %2697 = vmatpush1.bf16.msra.mxu0 %v6935_v46  ;;  %v1194_v44 = vld [vmem:[#allocation20 + $0x280] sm:$0xff]  ;;  %v1195_v46 = vld [vmem:[#allocation20 + $0x288] sm:$0xff] }
 0x254   :  { %vm475_vm4 = vcmp.gt.f32.partialorder %v473_v55, 0.0  ;;  %v477_v57 = vmul.f32 0.2, %v473_v55  ;;  %v1198_v45 = vld [vmem:[#allocation20 + $0x2a0] sm:$0xff] }
 0x255   :  { %v478_v58 = vsel %vm474_vm3, %v472_v54, %v476_v56  ;;  %v1139_v54 = vld [vmem:[#allocation20 + $0xc8] sm:$0xff] }
 0x256   :  { %v479_v59 = vsel %vm475_vm4, %v473_v55, %v477_v57  ;;  %v9371_v62 = vpack.c.bf16 %v478_v58, %v478_v58  ;;  %v6944_v55 = vcombine.high %v1138_v52, %v1142_v53  ;;  %v1143_v56 = vld [vmem:[#allocation20 + $0xe8] sm:$0xff]  ;;  %v6943_v57 = vcombine.low %v1138_v52, %v1142_v53 }
 0x257   :  { %v481_v60 = vpack.c.bf16 %v479_v59, %v479_v59  ;;  %v6945_v58 = vcombine.low %v1139_v54, %v1143_v56  ;;  %v6946_v59 = vcombine.high %v1139_v54, %v1143_v56  ;;  %v6999_v52 = vcombine.low %v1194_v44, %v1198_v45  ;;  %v1206_v56 = vld [vmem:[#allocation20 + $0x2e0] sm:$0xff] }
 0x258   :  { %2698 = vmatprep.subr.bf16.mxu0 %v6944_v55  ;;  %v1202_v55 = vld [vmem:[#allocation20 + $0x2c0] sm:$0xff] }
 0x259   :  { %920 = vmatprep.mubr.bf16.mxu1 %v481_v60  ;;  %2699 = vmatpush1.bf16.msra.mxu0 %v6943_v57  ;;  %v1203_v57 = vld [vmem:[#allocation20 + $0x2c8] sm:$0xff] }
 0x25a   :  { %921 = vmatmul.mubr.bf16.vlgmr.msra.gmra.mrb[4].mxu1 %v9371_v62 }
 0x25b   :  { %930 = vmatpush1.bf16.msra.mxu1 %v7860_v61  ;;  %961 = vmatprep.mubr.bf16.mxu1 %v481_v60  ;;  %v1146_v60 = vld [vmem:[#allocation20 + $0x100] sm:$0xff] }
 0x25c   :  { %931 = vmatprep.subr.bf16.mxu1 %v7865_v63  ;;  %v1150_v61 = vld [vmem:[#allocation20 + $0x120] sm:$0xff] }
 0x25d   :  { %v6952_v63 = vcombine.high %v1146_v60, %v1150_v61 }
 0x25f   :  { %932 = vmatpush1.bf16.msra.mxu1 %v7863_v0  ;;  %v1151_v0 = vld [vmem:[#allocation20 + $0x128] sm:$0xff]  ;;  %2700 = vmatprep.subr.bf16.mxu0 %v6952_v63  ;;  %v1210_v63 = vld [vmem:[#allocation20 + $0x300] sm:$0xff] }
 0x260   :  { %933 = vmatprep.subr.bf16.mxu1 %v7868_v1  ;;  %v6951_v1 = vcombine.low %v1146_v60, %v1150_v61  ;;  %v7007_v60 = vcombine.low %v1202_v55, %v1206_v56 }
 0x262   :  { %2701 = vmatpush1.bf16.msra.mxu0 %v6951_v1  ;;  %v1211_v1 = vld [vmem:[#allocation20 + $0x308] sm:$0xff] }
 0x263   :  { %934 = vmatpush1.bf16.msra.mxu1 %v7866_v2 }
 0x264   :  { %935 = vmatprep.subr.bf16.mxu1 %v7871_v3 }
 0x267   :  { %936 = vmatpush1.bf16.msra.mxu1 %v7869_v4  ;;  %v1154_v4 = vld [vmem:[#allocation20 + $0x140] sm:$0xff] }
 0x268   :  { %937 = vmatprep.subr.bf16.mxu1 %v7874_v5  ;;  %v1158_v5 = vld [vmem:[#allocation20 + $0x160] sm:$0xff] }
 0x26b   :  { %938 = vmatpush1.bf16.msra.mxu1 %v7872_v6  ;;  %v1155_v6 = vld [vmem:[#allocation20 + $0x148] sm:$0xff] }
 0x26c   :  { %939 = vmatprep.subr.bf16.mxu1 %v7877_v7  ;;  %v6960_v7 = vcombine.high %v1154_v4, %v1158_v5 }
 0x26e   :  { %2702 = vmatprep.subr.bf16.mxu0 %v6960_v7  ;;  %v1218_v7 = vld [vmem:[#allocation20 + $0x340] sm:$0xff] }
 0x26f   :  { %940 = vmatpush1.bf16.msra.mxu1 %v7875_v8  ;;  %v1159_v8 = vld [vmem:[#allocation20 + $0x168] sm:$0xff] }
 0x270   :  { %941 = vmatprep.subr.bf16.mxu1 %v7880_v9  ;;  %v6959_v9 = vcombine.low %v1154_v4, %v1158_v5 }
 0x272   :  { %2703 = vmatpush1.bf16.msra.mxu0 %v6959_v9  ;;  %v1219_v9 = vld [vmem:[#allocation20 + $0x348] sm:$0xff] }
 0x273   :  { %942 = vmatpush1.bf16.msra.mxu1 %v7878_v10  ;;  %v6961_v10 = vcombine.low %v1155_v6, %v1159_v8 }
 0x274   :  { %943 = vmatprep.subr.bf16.mxu1 %v7883_v11  ;;  %v6962_v11 = vcombine.high %v1155_v6, %v1159_v8  ;;  %v1222_v8 = vld [vmem:[#allocation20 + $0x360] sm:$0xff] }
 0x277   :  { %944 = vmatpush1.bf16.msra.mxu1 %v7881_v12  ;;  %v1162_v12 = vld [vmem:[#allocation20 + $0x180] sm:$0xff] }
 0x278   :  { %945 = vmatprep.subr.bf16.mxu1 %v7886_v13  ;;  %v1166_v13 = vld [vmem:[#allocation20 + $0x1a0] sm:$0xff] }
 0x27b   :  { %946 = vmatpush1.bf16.msra.mxu1 %v7884_v14  ;;  %v1163_v14 = vld [vmem:[#allocation20 + $0x188] sm:$0xff] }
 0x27c   :  { %947 = vmatprep.subr.bf16.mxu1 %v7889_v15  ;;  %v6968_v15 = vcombine.high %v1162_v12, %v1166_v13 }
 0x27e   :  { %2704 = vmatprep.subr.bf16.mxu0 %v6968_v15  ;;  %v1226_v15 = vld [vmem:[#allocation20 + $0x380] sm:$0xff] }
 0x27f   :  { %948 = vmatpush1.bf16.msra.mxu1 %v7887_v16  ;;  %v1167_v16 = vld [vmem:[#allocation20 + $0x1a8] sm:$0xff] }
 0x280   :  { %949 = vmatprep.subr.bf16.mxu1 %v7892_v17  ;;  %v6967_v17 = vcombine.low %v1162_v12, %v1166_v13  ;;  %v7023_v12 = vcombine.low %v1218_v7, %v1222_v8 }
 0x282   :  { %2705 = vmatpush1.bf16.msra.mxu0 %v6967_v17 }
 0x283   :  { %950 = vmatpush1.bf16.msra.mxu1 %v7890_v18  ;;  %v6969_v18 = vcombine.low %v1163_v14, %v1167_v16 }
 0x284   :  { %951 = vmatprep.subr.bf16.mxu1 %v7895_v19  ;;  %v6970_v19 = vcombine.high %v1163_v14, %v1167_v16  ;;  %v1230_v16 = vld [vmem:[#allocation20 + $0x3a0] sm:$0xff] }
 0x285   :  { %v7032_v17 = vcombine.high %v1226_v15, %v1230_v16 }
 0x287   :  { %952 = vmatpush1.bf16.msra.mxu1 %v7893_v20  ;;  %v1170_v20 = vld [vmem:[#allocation20 + $0x1c0] sm:$0xff] }
 0x288   :  { %953 = vmatprep.subr.bf16.mxu1 %v7898_v21  ;;  %v1174_v21 = vld [vmem:[#allocation20 + $0x1e0] sm:$0xff] }
 0x28b   :  { %954 = vmatpush1.bf16.msra.mxu1 %v7896_v22  ;;  %v1171_v22 = vld [vmem:[#allocation20 + $0x1c8] sm:$0xff] }
 0x28c   :  { %955 = vmatprep.subr.bf16.mxu1 %v7901_v23  ;;  %v6976_v23 = vcombine.high %v1170_v20, %v1174_v21 }
 0x28e   :  { %2706 = vmatprep.subr.bf16.mxu0 %v6976_v23  ;;  %v1234_v23 = vld [vmem:[#allocation20 + $0x3c0] sm:$0xff] }
 0x28f   :  { %956 = vmatpush1.bf16.msra.mxu1 %v7899_v24  ;;  %v1175_v24 = vld [vmem:[#allocation20 + $0x1e8] sm:$0xff] }
 0x290   :  { %957 = vmatprep.subr.bf16.mxu1 %v7904_v25  ;;  %v6975_v25 = vcombine.low %v1170_v20, %v1174_v21  ;;  %v7031_v20 = vcombine.low %v1226_v15, %v1230_v16 }
 0x292   :  { %2707 = vmatpush1.bf16.msra.mxu0 %v6975_v25  ;;  %v1235_v25 = vld [vmem:[#allocation20 + $0x3c8] sm:$0xff] }
 0x293   :  { %958 = vmatpush1.bf16.msra.mxu1 %v7902_v26  ;;  %v6977_v26 = vcombine.low %v1171_v22, %v1175_v24 }
 0x294   :  { %959 = vmatprep.subr.bf16.mxu1 %v7907_v27  ;;  %v6978_v27 = vcombine.high %v1171_v22, %v1175_v24  ;;  %v1238_v24 = vld [vmem:[#allocation20 + $0x3e0] sm:$0xff] }
 0x297   :  { %960 = vmatpush1.bf16.msra.mxu1 %v7905_v30  ;;  %v1179_v30 = vld [vmem:[#allocation20 + $0x208] sm:$0xff] }
 0x298   :  { %2774 = vmatprep.subr.bf16.mxu1 %v6922_v31  ;;  %v6984_v31 = vcombine.high %v1178_v28, %v1182_v29  ;;  %v1239_v28 = vld [vmem:[#allocation20 + $0x3e8] sm:$0xff] }
 0x299   :  { %v7041_v29 = vcombine.low %v1235_v25, %v1239_v28 }
 0x29a   :  { %962 = vmatmul.mubr.bf16.vlgmr.msra.gmra.mrb[8].mxu1 %v9371_v62  ;;  %v1147_v62 = vld [vmem:[#allocation20 + $0x108] sm:$0xff]  ;;  %2708 = vmatprep.subr.bf16.mxu0 %v6984_v31  ;;  %v9375_v31 = vld [vmem:[#allocation20 + $0x400] sm:$0xff] }
 0x29b   :  { %2775 = vmatpush1.bf16.msra.mxu1 %v6921_v32  ;;  %v6953_v2 = vcombine.low %v1147_v62, %v1151_v0  ;;  %v6954_v3 = vcombine.high %v1147_v62, %v1151_v0  ;;  %v1183_v32 = vld [vmem:[#allocation20 + $0x228] sm:$0xff]  ;;  %2709 = vmatpush1.bf16.msra.mxu0 %v6983_v33  ;;  %v1214_v0 = vld [vmem:[#allocation20 + $0x320] sm:$0xff] }
 0x29c   :  { %2776 = vmatprep.subr.bf16.mxu1 %v6930_v40  ;;  %v6985_v34 = vcombine.low %v1179_v30, %v1183_v32  ;;  %v6986_v35 = vcombine.high %v1179_v30, %v1183_v32  ;;  %v1191_v40 = vld [vmem:[#allocation20 + $0x268] sm:$0xff]  ;;  %v7015_v4 = vcombine.low %v1210_v63, %v1214_v0  ;;  %v7042_v30 = vcombine.high %v1235_v25, %v1239_v28  ;;  %v9377_v32 = vld [vmem:[#allocation20 + $0x420] sm:$0xff] }
 0x29d   :  { %v6993_v42 = vcombine.low %v1187_v38, %v1191_v40  ;;  %v6994_v43 = vcombine.high %v1187_v38, %v1191_v40  ;;  %v9379_v33 = vld [vmem:[#allocation20 + $0x408] sm:$0xff] }
 0x29f   :  { %2777 = vmatpush1.bf16.msra.mxu1 %v6929_v39  ;;  %v6992_v39 = vcombine.high %v1186_v36, %v1190_v37  ;;  %v7047_v36 = vcombine.low %v9375_v31, %v9377_v32 }
 0x2a0   :  { %2778 = vmatprep.subr.bf16.mxu1 %v6938_v51  ;;  %v1199_v51 = vld [vmem:[#allocation20 + $0x2a8] sm:$0xff] }
 0x2a1   :  { %2710 = vmatprep.subr.bf16.mxu0 %v6992_v39  ;;  %v7001_v53 = vcombine.low %v1195_v46, %v1199_v51  ;;  %v7002_v54 = vcombine.high %v1195_v46, %v1199_v51  ;;  %v9391_v39 = vld [vmem:[#allocation16] sm:$0xf] }
 0x2a2   :  { %2711 = vmatpush1.bf16.msra.mxu0 %v6991_v41  ;;  %v551_v40 = vrot.slane %v9391_v39, %v9360_v49  ;;  %v555_v41 = vrot.slane %v9391_v39, %v9363_v50 }
 0x2a3   :  { %2779 = vmatpush1.bf16.msra.mxu1 %v6937_v48  ;;  %v7000_v48 = vcombine.high %v1194_v44, %v1198_v45 }
 0x2a4   :  { %2780 = vmatprep.subr.bf16.mxu1 %v6946_v59  ;;  %v1207_v59 = vld [vmem:[#allocation20 + $0x2e8] sm:$0xff] }
 0x2a5   :  { %2712 = vmatprep.subr.bf16.mxu0 %v7000_v48  ;;  %v7009_v61 = vcombine.low %v1203_v57, %v1207_v59  ;;  %v7010_v62 = vcombine.high %v1203_v57, %v1207_v59 }
 0x2a6   :  { %2713 = vmatpush1.bf16.msra.mxu0 %v6999_v52 }
 0x2a7   :  { %2781 = vmatpush1.bf16.msra.mxu1 %v6945_v58  ;;  %v7008_v58 = vcombine.high %v1202_v55, %v1206_v56 }
 0x2a8   :  { %2782 = vmatprep.subr.bf16.mxu1 %v6954_v3  ;;  %v1215_v3 = vld [vmem:[#allocation20 + $0x328] sm:$0xff] }
 0x2a9   :  { %2714 = vmatprep.subr.bf16.mxu0 %v7008_v58  ;;  %v7017_v5 = vcombine.low %v1211_v1, %v1215_v3  ;;  %v7018_v6 = vcombine.high %v1211_v1, %v1215_v3 }
 0x2aa   :  { %2715 = vmatpush1.bf16.msra.mxu0 %v7007_v60 }
 0x2ab   :  { %2783 = vmatpush1.bf16.msra.mxu1 %v6953_v2  ;;  %v7016_v2 = vcombine.high %v1210_v63, %v1214_v0 }
 0x2ac   :  { %2784 = vmatprep.subr.bf16.mxu1 %v6962_v11  ;;  %v1223_v11 = vld [vmem:[#allocation20 + $0x368] sm:$0xff] }
 0x2ad   :  { %2716 = vmatprep.subr.bf16.mxu0 %v7016_v2  ;;  %v7025_v13 = vcombine.low %v1219_v9, %v1223_v11  ;;  %v7026_v14 = vcombine.high %v1219_v9, %v1223_v11 }
 0x2ae   :  { %2717 = vmatpush1.bf16.msra.mxu0 %v7015_v4 }
 0x2af   :  { %2785 = vmatpush1.bf16.msra.mxu1 %v6961_v10  ;;  %v7024_v10 = vcombine.high %v1218_v7, %v1222_v8 }
 0x2b0   :  { %2786 = vmatprep.subr.bf16.mxu1 %v6970_v19  ;;  %v1231_v19 = vld [vmem:[#allocation20 + $0x3a8] sm:$0xff] }
 0x2b1   :  { %2718 = vmatprep.subr.bf16.mxu0 %v7024_v10 }
 0x2b2   :  { %2719 = vmatpush1.bf16.msra.mxu0 %v7023_v12 }
 0x2b3   :  { %2787 = vmatpush1.bf16.msra.mxu1 %v6969_v18  ;;  %v1227_v18 = vld [vmem:[#allocation20 + $0x388] sm:$0xff]  ;;  %2720 = vmatprep.subr.bf16.mxu0 %v7032_v17 }
 0x2b4   :  { %2788 = vmatprep.subr.bf16.mxu1 %v6978_v27  ;;  %v7033_v21 = vcombine.low %v1227_v18, %v1231_v19  ;;  %v7034_v22 = vcombine.high %v1227_v18, %v1231_v19  ;;  %v7040_v27 = vcombine.high %v1234_v23, %v1238_v24 }
 0x2b6   :  { %2721 = vmatpush1.bf16.msra.mxu0 %v7031_v20 }
 0x2b7   :  { %2789 = vmatpush1.bf16.msra.mxu1 %v6977_v26  ;;  %v7039_v26 = vcombine.low %v1234_v23, %v1238_v24  ;;  %2722 = vmatprep.subr.bf16.mxu0 %v7040_v27 }
 0x2b8   :  { %2790 = vmatprep.subr.bf16.mxu1 %v6986_v35  ;;  %v9383_v35 = vld [vmem:[#allocation20 + $0x428] sm:$0xff] }
 0x2b9   :  { %v7049_v37 = vcombine.low %v9379_v33, %v9383_v35  ;;  %v7050_v38 = vcombine.high %v9379_v33, %v9383_v35 }
 0x2ba   :  { %2723 = vmatpush1.bf16.msra.mxu0 %v7039_v26 }
 0x2bb   :  { %2791 = vmatpush1.bf16.msra.mxu1 %v6985_v34  ;;  %v7048_v34 = vcombine.high %v9375_v31, %v9377_v32 }
 0x2bc   :  { %2792 = vmatprep.subr.bf16.mxu1 %v6994_v43 }
 0x2bd   :  { %2733 = vmatprep.subr.bf16.mxu0 %v7048_v34 }
 0x2bf   :  { %2793 = vmatpush1.bf16.msra.mxu1 %v6993_v42 }
 0x2c0   :  { %2794 = vmatprep.subr.bf16.mxu1 %v7002_v54 }
 0x2c3   :  { %2795 = vmatpush1.bf16.msra.mxu1 %v7001_v53 }
 0x2c4   :  { %2796 = vmatprep.subr.bf16.mxu1 %v7010_v62 }
 0x2c7   :  { %2797 = vmatpush1.bf16.msra.mxu1 %v7009_v61 }
 0x2c8   :  { %2798 = vmatprep.subr.bf16.mxu1 %v7018_v6 }
 0x2cb   :  { %2799 = vmatpush1.bf16.msra.mxu1 %v7017_v5 }
 0x2cc   :  { %2800 = vmatprep.subr.bf16.mxu1 %v7026_v14 }
 0x2cf   :  { %2801 = vmatpush1.bf16.msra.mxu1 %v7025_v13 }
 0x2d0   :  { %2802 = vmatprep.subr.bf16.mxu1 %v7034_v22  ;;  %v9399_v22 = vld [vmem:[#allocation19] sm:$0xf] }
 0x2d1   :  { %v1077_v28 = vrot.slane %v9399_v22, %v9360_v49 }
 0x2d3   :  { %2803 = vmatpush1.bf16.msra.mxu1 %v7033_v21  ;;  %v9397_v21 = vld [vmem:[#allocation17] sm:$0xf] }
 0x2d4   :  { %2804 = vmatprep.subr.bf16.mxu1 %v7042_v30  ;;  %v1051_v23 = vrot.slane %v9397_v21, %v9360_v49  ;;  %v1055_v25 = vrot.slane %v9397_v21, %v9363_v50  ;;  %v1081_v30 = vrot.slane %v9399_v22, %v9363_v50 }
 0x2d7   :  { %2805 = vmatpush1.bf16.msra.mxu1 %v7041_v29 }
 0x2d8   :  { %2815 = vmatprep.subr.bf16.mxu1 %v7050_v38 }
 0x32d   :  { %v922_v42 = vpop.f32.mrb[4].mxu1 }
 0x32e   :  { %v923_v43 = vadd.f32 %v922_v42, %v551_v40  ;;  %v924_v44 = vpop.f32.mrb[5].mxu1 }
 0x32f   :  { %v925_v45 = vadd.f32 %v924_v44, %v555_v41  ;;  %v926_v46 = vpop.f32.mrb[6].mxu1  ;;  %v1250_v44 = vld [vmem:[#allocation20 + $0x440] sm:$0xff] }
 0x330   :  { %v970_v48 = vrot.slane %v923_v43, 4  ;;  %v927_v51 = vpop.f32.mrb[7].mxu1  ;;  %v1254_v46 = vld [vmem:[#allocation20 + $0x460] sm:$0xff] }
 0x331   :  { %v976_v52 = vrot.slane %v925_v45, 4  ;;  %v1255_v51 = vld [vmem:[#allocation20 + $0x468] sm:$0xff] }
 0x332   :  { %v971_v53 = vadd.f32 %v970_v48, %v923_v43  ;;  %v1251_v48 = vld [vmem:[#allocation20 + $0x448] sm:$0xff] }
 0x333   :  { %v977_v54 = vadd.f32 %v976_v52, %v925_v45 }
 0x334   :  { %v972_v55 = vrot.slane %v971_v53, 2 }
 0x335   :  { %v978_v56 = vrot.slane %v977_v54, 2 }
 0x336   :  { %v973_v57 = vadd.f32 %v972_v55, %v971_v53  ;;  %v9410_v53 = vsub.s32 2, %v9357_v47  ;;  %v9415_v55 = vsub.s32 3, %v9357_v47 }
 0x337   :  { %v979_v58 = vadd.f32 %v978_v56, %v977_v54 }
 0x338   :  { %v974_v59 = vrot.slane %v973_v57, 1 }
 0x339   :  { %v980_v60 = vrot.slane %v979_v58, 1 }
 0x33a   :  { %v975_v61 = vadd.f32 %v974_v59, %v973_v57  ;;  %v7056_v57 = vcombine.high %v1250_v44, %v1254_v46  ;;  %v1258_v59 = vld [vmem:[#allocation20 + $0x480] sm:$0xff] }
 0x33b   :  { %v981_v62 = vadd.f32 %v980_v60, %v979_v58  ;;  %v7058_v58 = vcombine.high %v1251_v48, %v1255_v51  ;;  %v1262_v60 = vld [vmem:[#allocation20 + $0x4a0] sm:$0xff] }
 0x33c   :  { %v994_v63 = vmul.f32 0.125, %v975_v61  ;;  %v1259_v61 = vld [vmem:[#allocation20 + $0x488] sm:$0xff]  ;;  %v7063_v35 = vcombine.low %v1258_v59, %v1262_v60 }
 0x33d   :  { %v995_v0 = vmul.f32 0.125, %v981_v62  ;;  %v1263_v62 = vld [vmem:[#allocation20 + $0x4a8] sm:$0xff] }
 0x33e   :  { %v998_v1 = vsub.f32 %v923_v43, %v994_v63  ;;  %v559_v63 = vrot.slane %v9391_v39, %v9410_v53 }
 0x33f   :  { %v999_v2 = vsub.f32 %v925_v45, %v995_v0  ;;  %v563_v0 = vrot.slane %v9391_v39, %v9415_v55 }
 0x340   :  { %v1002_v3 = vmul.f32 %v998_v1, %v998_v1 }
 0x341   :  { %v1003_v4 = vmul.f32 %v999_v2, %v999_v2 }
 0x342   :  { %v1006_v5 = vrot.slane %v1002_v3, 4 }
 0x343   :  { %v1012_v6 = vrot.slane %v1003_v4, 4 }
 0x344   :  { %v1007_v7 = vadd.f32 %v1006_v5, %v1002_v3  ;;  %v7064_v3 = vcombine.high %v1258_v59, %v1262_v60  ;;  %v1266_v5 = vld [vmem:[#allocation20 + $0x4c0] sm:$0xff] }
 0x345   :  { %v1013_v8 = vadd.f32 %v1012_v6, %v1003_v4  ;;  %v7066_v4 = vcombine.high %v1259_v61, %v1263_v62 }
 0x346   :  { %v1008_v9 = vrot.slane %v1007_v7, 2 }
 0x347   :  { %v1014_v10 = vrot.slane %v1013_v8, 2 }
 0x348   :  { %v1009_v11 = vadd.f32 %v1008_v9, %v1007_v7  ;;  %v1270_v7 = vld [vmem:[#allocation20 + $0x4e0] sm:$0xff]  ;;  %v1271_v9 = vld [vmem:[#allocation20 + $0x4e8] sm:$0xff] }
 0x349   :  { %v1015_v12 = vadd.f32 %v1014_v10, %v1013_v8  ;;  %v1267_v8 = vld [vmem:[#allocation20 + $0x4c8] sm:$0xff] }
 0x34a   :  { %v1010_v13 = vrot.slane %v1009_v11, 1 }
 0x34b   :  { %v1016_v14 = vrot.slane %v1015_v12, 1 }
 0x34c   :  { %v1011_v15 = vadd.f32 %v1010_v13, %v1009_v11  ;;  %v7072_v11 = vcombine.high %v1266_v5, %v1270_v7  ;;  %v1274_v13 = vld [vmem:[#allocation20 + $0x500] sm:$0xff] }
 0x34d   :  { %v1017_v16 = vadd.f32 %v1016_v14, %v1015_v12  ;;  %v7074_v12 = vcombine.high %v1267_v8, %v1271_v9 }
 0x34e   :  { %v1030_v17 = vmul.f32 0.125, %v1011_v15  ;;  %v1278_v15 = vld [vmem:[#allocation20 + $0x520] sm:$0xff] }
 0x34f   :  { %v1031_v18 = vmul.f32 0.125, %v1017_v16  ;;  %v1275_v16 = vld [vmem:[#allocation20 + $0x508] sm:$0xff] }
 0x350   :  { %v1034_v19 = vadd.f32 1e-05, %v1030_v17  ;;  %v1279_v17 = vld [vmem:[#allocation20 + $0x528] sm:$0xff] }
 0x351   :  { %v1035_v20 = vadd.f32 1e-05, %v1031_v18 }
 0x352   :  { %8552 = vrsqrt.f32 %v1034_v19 }
 0x353   :  { %8554 = vrsqrt.f32 %v1035_v20  ;;  %v7071_v20 = vcombine.low %v1266_v5, %v1270_v7  ;;  %v1303_v5 = vld [vmem:[#allocation20 + $0x5e8] sm:$0xff] }
 0x35c   :  { %v8553_v24 = vpop.eup %8552 }
 0x35d   :  { %v8555_v26 = vpop.eup %8554  ;;  %v1042_v27 = vmul.f32 %v8553_v24, %v998_v1  ;;  %v7055_v1 = vcombine.low %v1250_v44, %v1254_v46  ;;  %v1290_v46 = vld [vmem:[#allocation20 + $0x580] sm:$0xff] }
 0x35e   :  { %v1043_v29 = vmul.f32 %v8555_v26, %v999_v2  ;;  %v7057_v2 = vcombine.low %v1251_v48, %v1255_v51  ;;  %v7082_v26 = vcombine.high %v1275_v16, %v1279_v17  ;;  %v1294_v51 = vld [vmem:[#allocation20 + $0x5a0] sm:$0xff] }
 0x35f   :  { %v1068_v34 = vmul.f32 %v1051_v23, %v1042_v27  ;;  %v7073_v23 = vcombine.low %v1267_v8, %v1271_v9  ;;  %v1282_v27 = vld [vmem:[#allocation20 + $0x540] sm:$0xff]  ;;  %v7095_v8 = vcombine.low %v1290_v46, %v1294_v51 }
 0x360   :  { %v1069_v38 = vmul.f32 %v1055_v25, %v1043_v29  ;;  %v7080_v25 = vcombine.high %v1274_v13, %v1278_v15  ;;  %v1286_v29 = vld [vmem:[#allocation20 + $0x560] sm:$0xff] }
 0x361   :  { %v1094_v40 = vadd.f32 %v1077_v28, %v1068_v34  ;;  %v1287_v34 = vld [vmem:[#allocation20 + $0x568] sm:$0xff]  ;;  %v7088_v44 = vcombine.high %v1282_v27, %v1286_v29  ;;  %v7087_v60 = vcombine.low %v1282_v27, %v1286_v29 }
 0x362   :  { %v1095_v41 = vadd.f32 %v1081_v30, %v1069_v38  ;;  %v1283_v30 = vld [vmem:[#allocation20 + $0x548] sm:$0xff] }
 0x363   :  { %vm1098_vm5 = vcmp.gt.f32.partialorder %v1094_v40, 0.0  ;;  %v1102_v42 = vmul.f32 0.2, %v1094_v40 }
 0x364   :  { %vm1099_vm6 = vcmp.gt.f32.partialorder %v1095_v41, 0.0  ;;  %v1103_v43 = vmul.f32 0.2, %v1095_v41 }
 0x365   :  { %v1106_v45 = vsel %vm1098_vm5, %v1094_v40, %v1102_v42  ;;  %v7081_v42 = vcombine.low %v1275_v16, %v1279_v17 }
 0x366   :  { %v1107_v52 = vsel %vm1099_vm6, %v1095_v41, %v1103_v43  ;;  %v9417_v56 = vpack.c.bf16 %v1106_v45, %v1106_v45  ;;  %v7079_v41 = vcombine.low %v1274_v13, %v1278_v15  ;;  %v7090_v45 = vcombine.high %v1283_v30, %v1287_v34 }
 0x367   :  { %v9412_v54 = vpack.c.bf16 %v1107_v52, %v1107_v52  ;;  %v1291_v52 = vld [vmem:[#allocation20 + $0x588] sm:$0xff] }
 0x369   :  { %2724 = vmatprep.mubr.bf16.mxu0 %v9412_v54  ;;  %2806 = vmatprep.mubr.bf16.mxu1 %v9412_v54 }
 0x36a   :  { %2725 = vmatmul.mubr.bf16.vlgmr.msra.gmra.mrb[4].mxu0 %v9417_v56  ;;  %2807 = vmatmul.mubr.bf16.vlgmr.msra.gmra.mrb[12].mxu1 %v9417_v56 }
 0x36b   :  { %2734 = vmatpush1.bf16.msra.mxu0 %v7047_v36  ;;  %2816 = vmatpush1.bf16.msra.mxu1 %v7049_v37  ;;  %v7065_v37 = vcombine.low %v1259_v61, %v1263_v62  ;;  %v7089_v61 = vcombine.low %v1283_v30, %v1287_v34 }
 0x36c   :  { %2735 = vmatprep.subr.bf16.mxu0 %v7056_v57  ;;  %2817 = vmatprep.subr.bf16.mxu1 %v7058_v58  ;;  %v1295_v57 = vld [vmem:[#allocation20 + $0x5a8] sm:$0xff] }
 0x36d   :  { %v963_v6 = vpop.f32.mrb[8].mxu1  ;;  %v7097_v9 = vcombine.low %v1291_v52, %v1295_v57 }
 0x36e   :  { %v9433_v31 = vadd.f32 %v963_v6, %v559_v63  ;;  %v965_v32 = vpop.f32.mrb[9].mxu1  ;;  %v7096_v63 = vcombine.high %v1290_v46, %v1294_v51 }
 0x36f   :  { %v9435_v36 = vadd.f32 %v965_v32, %v563_v0  ;;  %v967_v33 = vpop.f32.mrb[10].mxu1  ;;  %2736 = vmatpush1.bf16.msra.mxu0 %v7055_v1  ;;  %2818 = vmatpush1.bf16.msra.mxu1 %v7057_v2  ;;  %v7098_v0 = vcombine.high %v1291_v52, %v1295_v57  ;;  %v1298_v1 = vld [vmem:[#allocation20 + $0x5c0] sm:$0xff] }
 0x370   :  { %v982_v39 = vrot.slane %v9433_v31, 4  ;;  %v968_v10 = vpop.f32.mrb[11].mxu1  ;;  %2737 = vmatprep.subr.bf16.mxu0 %v7064_v3  ;;  %2819 = vmatprep.subr.bf16.mxu1 %v7066_v4  ;;  %v1302_v3 = vld [vmem:[#allocation20 + $0x5e0] sm:$0xff]  ;;  %v1299_v4 = vld [vmem:[#allocation20 + $0x5c8] sm:$0xff] }
 0x371   :  { %v988_v14 = vrot.slane %v9435_v36, 4  ;;  %v7104_v33 = vcombine.high %v1298_v1, %v1302_v3  ;;  %v1307_v10 = vld [vmem:[#allocation20 + $0x608] sm:$0xff]  ;;  %v7103_v13 = vcombine.low %v1298_v1, %v1302_v3 }
 0x372   :  { %v983_v18 = vadd.f32 %v982_v39, %v9433_v31 }
 0x373   :  { %v989_v19 = vadd.f32 %v988_v14, %v9435_v36  ;;  %2738 = vmatpush1.bf16.msra.mxu0 %v7063_v35  ;;  %2820 = vmatpush1.bf16.msra.mxu1 %v7065_v37  ;;  %v7106_v35 = vcombine.high %v1299_v4, %v1303_v5  ;;  %v1306_v37 = vld [vmem:[#allocation20 + $0x600] sm:$0xff]  ;;  %v7105_v14 = vcombine.low %v1299_v4, %v1303_v5 }
 0x374   :  { %v984_v24 = vrot.slane %v983_v18, 2  ;;  %2739 = vmatprep.subr.bf16.mxu0 %v7072_v11  ;;  %2821 = vmatprep.subr.bf16.mxu1 %v7074_v12  ;;  %v1311_v11 = vld [vmem:[#allocation20 + $0x628] sm:$0xff] }
 0x375   :  { %v990_v28 = vrot.slane %v989_v19, 2  ;;  %v7114_v17 = vcombine.high %v1307_v10, %v1311_v11 }
 0x376   :  { %v985_v38 = vadd.f32 %v984_v24, %v983_v18  ;;  %v1314_v18 = vld [vmem:[#allocation20 + $0x640] sm:$0xff]  ;;  %v1319_v24 = vld [vmem:[#allocation20 + $0x668] sm:$0xff] }
 0x377   :  { %v991_v40 = vadd.f32 %v990_v28, %v989_v19  ;;  %2740 = vmatpush1.bf16.msra.mxu0 %v7071_v20  ;;  %2822 = vmatpush1.bf16.msra.mxu1 %v7073_v23  ;;  %v1318_v20 = vld [vmem:[#allocation20 + $0x660] sm:$0xff]  ;;  %v1315_v23 = vld [vmem:[#allocation20 + $0x648] sm:$0xff]  ;;  %v7113_v28 = vcombine.low %v1307_v10, %v1311_v11 }
 0x378   :  { %v986_v43 = vrot.slane %v985_v38, 1  ;;  %2741 = vmatprep.subr.bf16.mxu0 %v7080_v25  ;;  %2823 = vmatprep.subr.bf16.mxu1 %v7082_v26  ;;  %v7120_v30 = vcombine.high %v1314_v18, %v1318_v20  ;;  %v7122_v34 = vcombine.high %v1315_v23, %v1319_v24  ;;  %v7119_v46 = vcombine.low %v1314_v18, %v1318_v20  ;;  %v1346_v11 = vld [vmem:[#allocation20 + $0x740] sm:$0xff]  ;;  %v1355_v20 = vld [vmem:[#allocation20 + $0x788] sm:$0xff] }
 0x379   :  { %v992_v48 = vrot.slane %v991_v40, 1  ;;  %v1354_v18 = vld [vmem:[#allocation20 + $0x780] sm:$0xff] }
 0x37a   :  { %v987_v58 = vadd.f32 %v986_v43, %v985_v38  ;;  %v1322_v38 = vld [vmem:[#allocation20 + $0x680] sm:$0xff]  ;;  %v1327_v43 = vld [vmem:[#allocation20 + $0x6a8] sm:$0xff] }
 0x37b   :  { %v993_v59 = vadd.f32 %v992_v48, %v991_v40  ;;  %2742 = vmatpush1.bf16.msra.mxu0 %v7079_v41  ;;  %2824 = vmatpush1.bf16.msra.mxu1 %v7081_v42  ;;  %v1326_v41 = vld [vmem:[#allocation20 + $0x6a0] sm:$0xff]  ;;  %v1323_v42 = vld [vmem:[#allocation20 + $0x688] sm:$0xff]  ;;  %v7121_v48 = vcombine.low %v1315_v23, %v1319_v24  ;;  %v1059_v24 = vrot.slane %v9397_v21, %v9410_v53 }
 0x37c   :  { %v996_v62 = vmul.f32 0.125, %v987_v58  ;;  %2743 = vmatprep.subr.bf16.mxu0 %v7088_v44  ;;  %2825 = vmatprep.subr.bf16.mxu1 %v7090_v45  ;;  %v7128_v52 = vcombine.high %v1322_v38, %v1326_v41  ;;  %v7130_v57 = vcombine.high %v1323_v42, %v1327_v43  ;;  %v1330_v58 = vld [vmem:[#allocation20 + $0x6c0] sm:$0xff]  ;;  %v7127_v1 = vcombine.low %v1322_v38, %v1326_v41  ;;  %v1359_v23 = vld [vmem:[#allocation20 + $0x7a8] sm:$0xff] }
 0x37d   :  { %v997_v2 = vmul.f32 0.125, %v993_v59  ;;  %v1085_v41 = vrot.slane %v9399_v22, %v9410_v53 }
 0x37e   :  { %v9442_v6 = vsub.f32 %v9433_v31, %v996_v62  ;;  %v1310_v31 = vld [vmem:[#allocation20 + $0x620] sm:$0xff]  ;;  %v1335_v62 = vld [vmem:[#allocation20 + $0x6e8] sm:$0xff] }
 0x37f   :  { %v9445_v7 = vsub.f32 %v9435_v36, %v997_v2  ;;  %2744 = vmatpush1.bf16.msra.mxu0 %v7087_v60  ;;  %2826 = vmatpush1.bf16.msra.mxu1 %v7089_v61  ;;  %v7112_v16 = vcombine.high %v1306_v37, %v1310_v31  ;;  %v7111_v27 = vcombine.low %v1306_v37, %v1310_v31  ;;  %v1334_v60 = vld [vmem:[#allocation20 + $0x6e0] sm:$0xff]  ;;  %v1331_v61 = vld [vmem:[#allocation20 + $0x6c8] sm:$0xff] }
 0x380   :  { %v1004_v32 = vmul.f32 %v9442_v6, %v9442_v6  ;;  %2745 = vmatprep.subr.bf16.mxu0 %v7096_v63  ;;  %2827 = vmatprep.subr.bf16.mxu1 %v7098_v0  ;;  %v7129_v2 = vcombine.low %v1323_v42, %v1327_v43  ;;  %v7136_v4 = vcombine.high %v1330_v58, %v1334_v60  ;;  %v1366_v42 = vld [vmem:[#allocation20 + $0x7e0] sm:$0xff]  ;;  %v1363_v43 = vld [vmem:[#allocation20 + $0x7c8] sm:$0xff] }
 0x381   :  { %v1005_v39 = vmul.f32 %v9445_v7, %v9445_v7  ;;  %v7138_v5 = vcombine.high %v1331_v61, %v1335_v62  ;;  %v7135_v37 = vcombine.low %v1330_v58, %v1334_v60  ;;  %v1116_v58 = vld [vmem:[#allocation20 + $0x10] sm:$0xff] }
 0x382   :  { %v1018_v36 = vrot.slane %v1004_v32, 4  ;;  %v1120_v60 = vld [vmem:[#allocation20 + $0x30] sm:$0xff] }
 0x383   :  { %v1024_v12 = vrot.slane %v1005_v39, 4  ;;  %2746 = vmatpush1.bf16.msra.mxu0 %v7095_v8  ;;  %2828 = vmatpush1.bf16.msra.mxu1 %v7097_v9  ;;  %v1338_v8 = vld [vmem:[#allocation20 + $0x700] sm:$0xff] }
 0x384   :  { %v1019_v15 = vadd.f32 %v1018_v36, %v1004_v32  ;;  %2747 = vmatprep.subr.bf16.mxu0 %v7104_v33  ;;  %2829 = vmatprep.subr.bf16.mxu1 %v7106_v35  ;;  %v1342_v32 = vld [vmem:[#allocation20 + $0x720] sm:$0xff]  ;;  %v1339_v33 = vld [vmem:[#allocation20 + $0x708] sm:$0xff] }
 0x385   :  { %v1025_v19 = vadd.f32 %v1024_v12, %v1005_v39  ;;  %v1343_v35 = vld [vmem:[#allocation20 + $0x728] sm:$0xff]  ;;  %v7137_v39 = vcombine.low %v1331_v61, %v1335_v62  ;;  %v7144_v31 = vcombine.high %v1338_v8, %v1342_v32  ;;  %v1350_v36 = vld [vmem:[#allocation20 + $0x760] sm:$0xff]  ;;  %v1117_v61 = vld [vmem:[#allocation20 + $0x18] sm:$0xff] }
 0x386   :  { %v1020_v25 = vrot.slane %v1019_v15, 2  ;;  %v7146_v10 = vcombine.high %v1339_v33, %v1343_v35  ;;  %v1347_v12 = vld [vmem:[#allocation20 + $0x748] sm:$0xff]  ;;  %v1121_v62 = vld [vmem:[#allocation20 + $0x38] sm:$0xff] }
 0x387   :  { %v1026_v26 = vrot.slane %v1025_v19, 2  ;;  %2748 = vmatpush1.bf16.msra.mxu0 %v7103_v13  ;;  %2830 = vmatpush1.bf16.msra.mxu1 %v7105_v14  ;;  %v1351_v13 = vld [vmem:[#allocation20 + $0x768] sm:$0xff]  ;;  %v7143_v14 = vcombine.low %v1338_v8, %v1342_v32  ;;  %v1125_v32 = vld [vmem:[#allocation20 + $0x58] sm:$0xff] }
 0x388   :  { %v1021_v29 = vadd.f32 %v1020_v25, %v1019_v15  ;;  %2749 = vmatprep.subr.bf16.mxu0 %v7112_v16  ;;  %2831 = vmatprep.subr.bf16.mxu1 %v7114_v17  ;;  %v7145_v15 = vcombine.low %v1339_v33, %v1343_v35  ;;  %v7152_v16 = vcombine.high %v1346_v11, %v1350_v36  ;;  %v1129_v33 = vld [vmem:[#allocation20 + $0x78] sm:$0xff] }
 0x389   :  { %v1027_v40 = vadd.f32 %v1026_v26, %v1025_v19  ;;  %v7154_v17 = vcombine.high %v1347_v12, %v1351_v13  ;;  %v1358_v19 = vld [vmem:[#allocation20 + $0x7a0] sm:$0xff]  ;;  %v7151_v25 = vcombine.low %v1346_v11, %v1350_v36  ;;  %v7153_v26 = vcombine.low %v1347_v12, %v1351_v13  ;;  %v1132_v36 = vld [vmem:[#allocation20 + $0x90] sm:$0xff]  ;;  %v1133_v13 = vld [vmem:[#allocation20 + $0x98] sm:$0xff] }
 0x38a   :  { %v1022_v44 = vrot.slane %v1021_v29, 1  ;;  %v6934_v11 = vcombine.high %v1125_v32, %v1129_v33  ;;  %v1136_v12 = vld [vmem:[#allocation20 + $0xb0] sm:$0xff] }
 0x38b   :  { %v1028_v45 = vrot.slane %v1027_v40, 1  ;;  %2750 = vmatpush1.bf16.msra.mxu0 %v7111_v27  ;;  %2832 = vmatpush1.bf16.msra.mxu1 %v7113_v28  ;;  %v1063_v28 = vrot.slane %v9397_v21, %v9415_v55 }
 0x38c   :  { %v1023_v51 = vadd.f32 %v1022_v44, %v1021_v29  ;;  %2751 = vmatprep.subr.bf16.mxu0 %v7120_v30  ;;  %2833 = vmatprep.subr.bf16.mxu1 %v7122_v34  ;;  %v7160_v29 = vcombine.high %v1354_v18, %v1358_v19  ;;  %v7162_v30 = vcombine.high %v1355_v20, %v1359_v23  ;;  %v1362_v34 = vld [vmem:[#allocation20 + $0x7c0] sm:$0xff]  ;;  %v1367_v44 = vld [vmem:[#allocation20 + $0x7e8] sm:$0xff] }
 0x38d   :  { %v1029_v59 = vadd.f32 %v1028_v45, %v1027_v40 }
 0x38e   :  { %v1032_v63 = vmul.f32 0.125, %v1023_v51  ;;  %v7161_v51 = vcombine.low %v1355_v20, %v1359_v23  ;;  %v1144_v20 = vld [vmem:[#allocation20 + $0xf0] sm:$0xff]  ;;  %v1141_v23 = vld [vmem:[#allocation20 + $0xd8] sm:$0xff] }
 0x38f   :  { %v1033_v0 = vmul.f32 0.125, %v1029_v59  ;;  %2752 = vmatpush1.bf16.msra.mxu0 %v7119_v46  ;;  %2834 = vmatpush1.bf16.msra.mxu1 %v7121_v48  ;;  %v1089_v46 = vrot.slane %v9399_v22, %v9415_v55  ;;  %v7159_v48 = vcombine.low %v1354_v18, %v1358_v19  ;;  %v7169_v22 = vcombine.low %v1363_v43, %v1367_v44  ;;  %v1140_v19 = vld [vmem:[#allocation20 + $0xd0] sm:$0xff] }
 0x390   :  { %v1036_v3 = vadd.f32 1e-05, %v1032_v63  ;;  %2753 = vmatprep.subr.bf16.mxu0 %v7128_v52  ;;  %2835 = vmatprep.subr.bf16.mxu1 %v7130_v57  ;;  %v7170_v57 = vcombine.high %v1363_v43, %v1367_v44  ;;  %v1156_v43 = vld [vmem:[#allocation20 + $0x150] sm:$0xff] }
 0x391   :  { %v1037_v9 = vadd.f32 1e-05, %v1033_v0  ;;  %v1160_v44 = vld [vmem:[#allocation20 + $0x170] sm:$0xff] }
 0x392   :  { %8556 = vrsqrt.f32 %v1036_v3  ;;  %v6926_v3 = vcombine.high %v1117_v61, %v1121_v62 }
 0x393   :  { %8558 = vrsqrt.f32 %v1037_v9  ;;  %2754 = vmatpush1.bf16.msra.mxu0 %v7127_v1  ;;  %2836 = vmatpush1.bf16.msra.mxu1 %v7129_v2  ;;  %v6924_v2 = vcombine.high %v1116_v58, %v1120_v60  ;;  %v1128_v9 = vld [vmem:[#allocation20 + $0x70] sm:$0xff] }
 0x394   :  { %2755 = vmatprep.subr.bf16.mxu0 %v7136_v4  ;;  %2837 = vmatprep.subr.bf16.mxu1 %v7138_v5  ;;  %v1124_v5 = vld [vmem:[#allocation20 + $0x50] sm:$0xff] }
 0x397   :  { %2756 = vmatpush1.bf16.msra.mxu0 %v7135_v37  ;;  %2838 = vmatpush1.bf16.msra.mxu1 %v7137_v39  ;;  %v6923_v37 = vcombine.low %v1116_v58, %v1120_v60  ;;  %v1165_v58 = vld [vmem:[#allocation20 + $0x198] sm:$0xff]  ;;  %v6963_v60 = vcombine.low %v1156_v43, %v1160_v44 }
 0x398   :  { %2757 = vmatprep.subr.bf16.mxu0 %v7144_v31  ;;  %2839 = vmatprep.subr.bf16.mxu1 %v7146_v10  ;;  %v6925_v31 = vcombine.low %v1117_v61, %v1121_v62  ;;  %v6932_v10 = vcombine.high %v1124_v5, %v1128_v9 }
 0x39b   :  { %2758 = vmatpush1.bf16.msra.mxu0 %v7143_v14  ;;  %2840 = vmatpush1.bf16.msra.mxu1 %v7145_v15  ;;  %v1137_v14 = vld [vmem:[#allocation20 + $0xb8] sm:$0xff]  ;;  %v6931_v15 = vcombine.low %v1124_v5, %v1128_v9  ;;  %v1184_v9 = vld [vmem:[#allocation20 + $0x230] sm:$0xff] }
 0x39c   :  { %v8557_v27 = vpop.eup %8556  ;;  %2759 = vmatprep.subr.bf16.mxu0 %v7152_v16  ;;  %2841 = vmatprep.subr.bf16.mxu1 %v7154_v17  ;;  %v6933_v16 = vcombine.low %v1125_v32, %v1129_v33  ;;  %v6940_v17 = vcombine.high %v1132_v36, %v1136_v12  ;;  %v6942_v18 = vcombine.high %v1133_v13, %v1137_v14  ;;  %v1181_v32 = vld [vmem:[#allocation20 + $0x218] sm:$0xff] }
 0x39d   :  { %v8559_v38 = vpop.eup %8558  ;;  %v1044_v40 = vmul.f32 %v8557_v27, %v9442_v6  ;;  %v7168_v6 = vcombine.high %v1362_v34, %v1366_v42  ;;  %v6948_v27 = vcombine.high %v1140_v19, %v1144_v20  ;;  %v1185_v33 = vld [vmem:[#allocation20 + $0x238] sm:$0xff] }
 0x39e   :  { %v1045_v45 = vmul.f32 %v8559_v38, %v9445_v7  ;;  %v7167_v7 = vcombine.low %v1362_v34, %v1366_v42  ;;  %v1153_v34 = vld [vmem:[#allocation20 + $0x138] sm:$0xff]  ;;  %v6947_v38 = vcombine.low %v1140_v19, %v1144_v20  ;;  %v1196_v19 = vld [vmem:[#allocation20 + $0x290] sm:$0xff] }
 0x39f   :  { %v1070_v21 = vmul.f32 %v1059_v24, %v1044_v40  ;;  %2760 = vmatpush1.bf16.msra.mxu0 %v7151_v25  ;;  %2842 = vmatpush1.bf16.msra.mxu1 %v7153_v26  ;;  %v1145_v24 = vld [vmem:[#allocation20 + $0xf8] sm:$0xff]  ;;  %v6939_v25 = vcombine.low %v1132_v36, %v1136_v12  ;;  %v6941_v26 = vcombine.low %v1133_v13, %v1137_v14  ;;  %v1188_v36 = vld [vmem:[#allocation20 + $0x250] sm:$0xff] }
 0x3a0   :  { %v1071_v52 = vmul.f32 %v1063_v28, %v1045_v45  ;;  %2761 = vmatprep.subr.bf16.mxu0 %v7160_v29  ;;  %2843 = vmatprep.subr.bf16.mxu1 %v7162_v30  ;;  %v6950_v28 = vcombine.high %v1141_v23, %v1145_v24  ;;  %v1148_v29 = vld [vmem:[#allocation20 + $0x110] sm:$0xff]  ;;  %v6949_v40 = vcombine.low %v1141_v23, %v1145_v24  ;;  %v1157_v45 = vld [vmem:[#allocation20 + $0x158] sm:$0xff] }
 0x3a1   :  { %v1096_v59 = vadd.f32 %v1085_v41, %v1070_v21  ;;  %v1152_v30 = vld [vmem:[#allocation20 + $0x130] sm:$0xff]  ;;  %v1189_v13 = vld [vmem:[#allocation20 + $0x258] sm:$0xff] }
 0x3a2   :  { %v1097_v63 = vadd.f32 %v1089_v46, %v1071_v52  ;;  %v6956_v41 = vcombine.high %v1148_v29, %v1152_v30  ;;  %v1161_v46 = vld [vmem:[#allocation20 + $0x178] sm:$0xff]  ;;  %v6955_v21 = vcombine.low %v1148_v29, %v1152_v30  ;;  %v1192_v12 = vld [vmem:[#allocation20 + $0x270] sm:$0xff] }
 0x3a3   :  { %2762 = vmatpush1.bf16.msra.mxu0 %v7159_v48  ;;  %2844 = vmatpush1.bf16.msra.mxu1 %v7161_v51  ;;  %vm1100_vm7 = vcmp.gt.f32.partialorder %v1096_v59, 0.0  ;;  %v1104_v0 = vmul.f32 0.2, %v1096_v59  ;;  %v6964_v51 = vcombine.high %v1156_v43, %v1160_v44  ;;  %v6966_v52 = vcombine.high %v1157_v45, %v1161_v46  ;;  %v1193_v14 = vld [vmem:[#allocation20 + $0x278] sm:$0xff]  ;;  %v1200_v20 = vld [vmem:[#allocation20 + $0x2b0] sm:$0xff] }
 0x3a4   :  { %2763 = vmatprep.subr.bf16.mxu0 %v7168_v6  ;;  %2845 = vmatprep.subr.bf16.mxu1 %v7170_v57  ;;  %vm1101_vm8 = vcmp.gt.f32.partialorder %v1097_v63, 0.0  ;;  %v1105_v1 = vmul.f32 0.2, %v1097_v63  ;;  %v1164_v6 = vld [vmem:[#allocation20 + $0x190] sm:$0xff]  ;;  %v6965_v61 = vcombine.low %v1157_v45, %v1161_v46  ;;  %v1197_v23 = vld [vmem:[#allocation20 + $0x298] sm:$0xff] }
 0x3a5   :  { %v1108_v4 = vsel %vm1100_vm7, %v1096_v59, %v1104_v0  ;;  %v1168_v57 = vld [vmem:[#allocation20 + $0x1b0] sm:$0xff]  ;;  %v1169_v59 = vld [vmem:[#allocation20 + $0x1b8] sm:$0xff] }
 0x3a6   :  { %v1109_v8 = vsel %vm1101_vm8, %v1097_v63, %v1105_v1  ;;  %v9463_v39 = vpack.c.bf16 %v1108_v4, %v1108_v4  ;;  %v6972_v62 = vcombine.high %v1164_v6, %v1168_v57  ;;  %v6974_v63 = vcombine.high %v1165_v58, %v1169_v59  ;;  %v1173_v0 = vld [vmem:[#allocation20 + $0x1d8] sm:$0xff]  ;;  %v1204_v29 = vld [vmem:[#allocation20 + $0x2d0] sm:$0xff] }
 0x3a7   :  { %2764 = vmatpush1.bf16.msra.mxu0 %v7167_v7  ;;  %2846 = vmatpush1.bf16.msra.mxu1 %v7169_v22  ;;  %v9461_v35 = vpack.c.bf16 %v1109_v8, %v1109_v8  ;;  %v1172_v7 = vld [vmem:[#allocation20 + $0x1d0] sm:$0xff]  ;;  %v1177_v1 = vld [vmem:[#allocation20 + $0x1f8] sm:$0xff] }
 0x3a8   :  { %2856 = vmatprep.subr.bf16.mxu0 %v6924_v2  ;;  %2938 = vmatprep.subr.bf16.mxu1 %v6926_v3  ;;  %v1176_v22 = vld [vmem:[#allocation20 + $0x1f0] sm:$0xff]  ;;  %v6971_v2 = vcombine.low %v1164_v6, %v1168_v57  ;;  %v6973_v3 = vcombine.low %v1165_v58, %v1169_v59  ;;  %v6982_v5 = vcombine.high %v1173_v0, %v1177_v1  ;;  %v1201_v24 = vld [vmem:[#allocation20 + $0x2b8] sm:$0xff] }
 0x3a9   :  { %2765 = vmatprep.mubr.bf16.mxu0 %v9461_v35  ;;  %2847 = vmatprep.mubr.bf16.mxu1 %v9461_v35  ;;  %v6980_v4 = vcombine.high %v1172_v7, %v1176_v22  ;;  %v1180_v8 = vld [vmem:[#allocation20 + $0x210] sm:$0xff]  ;;  %v1213_v45 = vld [vmem:[#allocation20 + $0x318] sm:$0xff] }
 0x3aa   :  { %2766 = vmatmul.mubr.bf16.vlgmr.msra.gmra.mrb[4].mxu0 %v9463_v39  ;;  %2848 = vmatmul.mubr.bf16.vlgmr.msra.gmra.mrb[12].mxu1 %v9463_v39  ;;  %v1208_v30 = vld [vmem:[#allocation20 + $0x2f0] sm:$0xff]  ;;  %v1217_v46 = vld [vmem:[#allocation20 + $0x338] sm:$0xff] }
 0x3ab   :  { %2857 = vmatpush1.bf16.msra.mxu0 %v6923_v37  ;;  %2888 = vmatprep.mubr.bf16.mxu0 %v9412_v54  ;;  %v6979_v37 = vcombine.low %v1172_v7, %v1176_v22  ;;  %v1212_v43 = vld [vmem:[#allocation20 + $0x310] sm:$0xff]  ;;  %v1221_v58 = vld [vmem:[#allocation20 + $0x358] sm:$0xff] }
 0x3ac   :  { %2939 = vmatpush1.bf16.msra.mxu1 %v6925_v31  ;;  %2970 = vmatprep.mubr.bf16.mxu1 %v9412_v54  ;;  %v1149_v54 = vld [vmem:[#allocation20 + $0x118] sm:$0xff]  ;;  %v6981_v31 = vcombine.low %v1173_v0, %v1177_v1  ;;  %v1216_v44 = vld [vmem:[#allocation20 + $0x330] sm:$0xff] }
 0x3ad   :  { %2858 = vmatprep.subr.bf16.mxu0 %v6932_v10  ;;  %2940 = vmatprep.subr.bf16.mxu1 %v6934_v11  ;;  %v6958_v42 = vcombine.high %v1149_v54, %v1153_v34  ;;  %v6957_v48 = vcombine.low %v1149_v54, %v1153_v34  ;;  %v6988_v10 = vcombine.high %v1180_v8, %v1184_v9  ;;  %v1205_v54 = vld [vmem:[#allocation20 + $0x2d8] sm:$0xff]  ;;  %v1220_v6 = vld [vmem:[#allocation20 + $0x350] sm:$0xff] }
 0x3ae   :  { %v6990_v11 = vcombine.high %v1181_v32, %v1185_v33  ;;  %v1209_v34 = vld [vmem:[#allocation20 + $0x2f8] sm:$0xff]  ;;  %v1224_v57 = vld [vmem:[#allocation20 + $0x370] sm:$0xff] }
 0x3af   :  { %2859 = vmatpush1.bf16.msra.mxu0 %v6931_v15  ;;  %v6987_v15 = vcombine.low %v1180_v8, %v1184_v9  ;;  %v1225_v59 = vld [vmem:[#allocation20 + $0x378] sm:$0xff]  ;;  %v1228_v7 = vld [vmem:[#allocation20 + $0x390] sm:$0xff] }
 0x3b0   :  { %2941 = vmatpush1.bf16.msra.mxu1 %v6933_v16  ;;  %2860 = vmatprep.subr.bf16.mxu0 %v6940_v17  ;;  %v6989_v16 = vcombine.low %v1181_v32, %v1185_v33  ;;  %v6996_v17 = vcombine.high %v1188_v36, %v1192_v12  ;;  %v1232_v22 = vld [vmem:[#allocation20 + $0x3b0] sm:$0xff]  ;;  %v1229_v0 = vld [vmem:[#allocation20 + $0x398] sm:$0xff] }
 0x3b1   :  { %2942 = vmatprep.subr.bf16.mxu1 %v6942_v18  ;;  %v6998_v18 = vcombine.high %v1189_v13, %v1193_v14  ;;  %v1233_v1 = vld [vmem:[#allocation20 + $0x3b8] sm:$0xff]  ;;  %v1236_v8 = vld [vmem:[#allocation20 + $0x3d0] sm:$0xff] }
 0x3b2   :  { %v1240_v9 = vld [vmem:[#allocation20 + $0x3f0] sm:$0xff]  ;;  %v1237_v32 = vld [vmem:[#allocation20 + $0x3d8] sm:$0xff] }
 0x3b3   :  { %2861 = vmatpush1.bf16.msra.mxu0 %v6939_v25  ;;  %v6995_v25 = vcombine.low %v1188_v36, %v1192_v12  ;;  %v1241_v33 = vld [vmem:[#allocation20 + $0x3f8] sm:$0xff]  ;;  %v1244_v36 = vld [vmem:[#allocation20 + $0x410] sm:$0xff] }
 0x3b4   :  { %2943 = vmatpush1.bf16.msra.mxu1 %v6941_v26  ;;  %2862 = vmatprep.subr.bf16.mxu0 %v6948_v27  ;;  %v6997_v26 = vcombine.low %v1189_v13, %v1193_v14  ;;  %v7004_v27 = vcombine.high %v1196_v19, %v1200_v20  ;;  %v1248_v12 = vld [vmem:[#allocation20 + $0x430] sm:$0xff]  ;;  %v1245_v13 = vld [vmem:[#allocation20 + $0x418] sm:$0xff] }
 0x3b5   :  { %2944 = vmatprep.subr.bf16.mxu1 %v6950_v28  ;;  %v7006_v28 = vcombine.high %v1197_v23, %v1201_v24  ;;  %v1249_v14 = vld [vmem:[#allocation20 + $0x438] sm:$0xff] }
 0x3b7   :  { %2863 = vmatpush1.bf16.msra.mxu0 %v6947_v38  ;;  %v7003_v38 = vcombine.low %v1196_v19, %v1200_v20  ;;  %v1252_v19 = vld [vmem:[#allocation20 + $0x450] sm:$0xff] }
 0x3b8   :  { %2945 = vmatpush1.bf16.msra.mxu1 %v6949_v40  ;;  %2864 = vmatprep.subr.bf16.mxu0 %v6956_v41  ;;  %v7005_v40 = vcombine.low %v1197_v23, %v1201_v24  ;;  %v7012_v41 = vcombine.high %v1204_v29, %v1208_v30  ;;  %v1256_v20 = vld [vmem:[#allocation20 + $0x470] sm:$0xff]  ;;  %v7051_v23 = vcombine.low %v1244_v36, %v1248_v12  ;;  %v1253_v24 = vld [vmem:[#allocation20 + $0x458] sm:$0xff] }
 0x3b9   :  { %2946 = vmatprep.subr.bf16.mxu1 %v6958_v42  ;;  %v7014_v42 = vcombine.high %v1205_v54, %v1209_v34 }
 0x3bb   :  { %2865 = vmatpush1.bf16.msra.mxu0 %v6955_v21  ;;  %v7011_v21 = vcombine.low %v1204_v29, %v1208_v30  ;;  %v1264_v29 = vld [vmem:[#allocation20 + $0x4b0] sm:$0xff] }
 0x3bc   :  { %2947 = vmatpush1.bf16.msra.mxu1 %v6957_v48  ;;  %2866 = vmatprep.subr.bf16.mxu0 %v6964_v51  ;;  %v7013_v48 = vcombine.low %v1205_v54, %v1209_v34  ;;  %v7020_v51 = vcombine.high %v1212_v43, %v1216_v44  ;;  %v1261_v54 = vld [vmem:[#allocation20 + $0x498] sm:$0xff] }
 0x3bd   :  { %2948 = vmatprep.subr.bf16.mxu1 %v6966_v52  ;;  %v7022_v52 = vcombine.high %v1213_v45, %v1217_v46  ;;  %v1265_v34 = vld [vmem:[#allocation20 + $0x4b8] sm:$0xff] }
 0x3bf   :  { %2867 = vmatpush1.bf16.msra.mxu0 %v6963_v60  ;;  %v7019_v60 = vcombine.low %v1212_v43, %v1216_v44  ;;  %v1268_v43 = vld [vmem:[#allocation20 + $0x4d0] sm:$0xff] }
 0x3c0   :  { %2949 = vmatpush1.bf16.msra.mxu1 %v6965_v61  ;;  %2868 = vmatprep.subr.bf16.mxu0 %v6972_v62  ;;  %v7021_v61 = vcombine.low %v1213_v45, %v1217_v46  ;;  %v7028_v62 = vcombine.high %v1220_v6, %v1224_v57  ;;  %v1272_v44 = vld [vmem:[#allocation20 + $0x4f0] sm:$0xff]  ;;  %v1269_v45 = vld [vmem:[#allocation20 + $0x4d8] sm:$0xff] }
 0x3c1   :  { %2950 = vmatprep.subr.bf16.mxu1 %v6974_v63  ;;  %v7030_v63 = vcombine.high %v1221_v58, %v1225_v59  ;;  %v1273_v46 = vld [vmem:[#allocation20 + $0x4f8] sm:$0xff] }
 0x3c3   :  { %2869 = vmatpush1.bf16.msra.mxu0 %v6971_v2  ;;  %v7027_v2 = vcombine.low %v1220_v6, %v1224_v57  ;;  %v1280_v6 = vld [vmem:[#allocation20 + $0x530] sm:$0xff]  ;;  %v1277_v57 = vld [vmem:[#allocation20 + $0x518] sm:$0xff] }
 0x3c4   :  { %2951 = vmatpush1.bf16.msra.mxu1 %v6973_v3  ;;  %2870 = vmatprep.subr.bf16.mxu0 %v6980_v4  ;;  %v7029_v3 = vcombine.low %v1221_v58, %v1225_v59  ;;  %v7036_v4 = vcombine.high %v1228_v7, %v1232_v22  ;;  %v1281_v58 = vld [vmem:[#allocation20 + $0x538] sm:$0xff]  ;;  %v7077_v59 = vcombine.low %v1269_v45, %v1273_v46 }
 0x3c5   :  { %2952 = vmatprep.subr.bf16.mxu1 %v6982_v5  ;;  %v7038_v5 = vcombine.high %v1229_v0, %v1233_v1 }
 0x3c7   :  { %2871 = vmatpush1.bf16.msra.mxu0 %v6979_v37  ;;  %v7035_v37 = vcombine.low %v1228_v7, %v1232_v22  ;;  %v1285_v7 = vld [vmem:[#allocation20 + $0x558] sm:$0xff] }
 0x3c8   :  { %2953 = vmatpush1.bf16.msra.mxu1 %v6981_v31  ;;  %2872 = vmatprep.subr.bf16.mxu0 %v6988_v10  ;;  %v7037_v31 = vcombine.low %v1229_v0, %v1233_v1  ;;  %v7044_v10 = vcombine.high %v1236_v8, %v1240_v9  ;;  %v1289_v22 = vld [vmem:[#allocation20 + $0x578] sm:$0xff]  ;;  %v7085_v1 = vcombine.low %v1277_v57, %v1281_v58 }
 0x3c9   :  { %2954 = vmatprep.subr.bf16.mxu1 %v6990_v11  ;;  %v7046_v11 = vcombine.high %v1237_v32, %v1241_v33 }
 0x3cb   :  { %2873 = vmatpush1.bf16.msra.mxu0 %v6987_v15  ;;  %v7043_v15 = vcombine.low %v1236_v8, %v1240_v9  ;;  %v1293_v8 = vld [vmem:[#allocation20 + $0x598] sm:$0xff] }
 0x3cc   :  { %2955 = vmatpush1.bf16.msra.mxu1 %v6989_v16  ;;  %2874 = vmatprep.subr.bf16.mxu0 %v6996_v17  ;;  %v7045_v16 = vcombine.low %v1237_v32, %v1241_v33  ;;  %v7052_v17 = vcombine.high %v1244_v36, %v1248_v12  ;;  %v1297_v9 = vld [vmem:[#allocation20 + $0x5b8] sm:$0xff]  ;;  %v7093_v33 = vcombine.low %v1285_v7, %v1289_v22 }
 0x3cd   :  { %2956 = vmatprep.subr.bf16.mxu1 %v6998_v18  ;;  %v7054_v18 = vcombine.high %v1245_v13, %v1249_v14  ;;  %v1301_v36 = vld [vmem:[#allocation20 + $0x5d8] sm:$0xff] }
 0x3ce   :  { %v1305_v12 = vld [vmem:[#allocation20 + $0x5f8] sm:$0xff] }
 0x3cf   :  { %2875 = vmatpush1.bf16.msra.mxu0 %v6995_v25  ;;  %v1257_v25 = vld [vmem:[#allocation20 + $0x478] sm:$0xff] }
 0x3d0   :  { %2957 = vmatpush1.bf16.msra.mxu1 %v6997_v26  ;;  %2876 = vmatprep.subr.bf16.mxu0 %v7004_v27  ;;  %v7053_v26 = vcombine.low %v1245_v13, %v1249_v14  ;;  %v7060_v27 = vcombine.high %v1252_v19, %v1256_v20  ;;  %v7062_v30 = vcombine.high %v1253_v24, %v1257_v25 }
 0x3d1   :  { %2958 = vmatprep.subr.bf16.mxu1 %v7006_v28  ;;  %v1260_v28 = vld [vmem:[#allocation20 + $0x490] sm:$0xff]  ;;  %v7101_v14 = vcombine.low %v1293_v8, %v1297_v9 }
 0x3d3   :  { %2877 = vmatpush1.bf16.msra.mxu0 %v7003_v38  ;;  %v7059_v38 = vcombine.low %v1252_v19, %v1256_v20  ;;  %v1309_v19 = vld [vmem:[#allocation20 + $0x618] sm:$0xff] }
 0x3d4   :  { %2959 = vmatpush1.bf16.msra.mxu1 %v7005_v40  ;;  %2878 = vmatprep.subr.bf16.mxu0 %v7012_v41  ;;  %v7061_v40 = vcombine.low %v1253_v24, %v1257_v25  ;;  %v7068_v41 = vcombine.high %v1260_v28, %v1264_v29  ;;  %v1313_v20 = vld [vmem:[#allocation20 + $0x638] sm:$0xff]  ;;  %v7109_v24 = vcombine.low %v1301_v36, %v1305_v12 }
 0x3d5   :  { %2960 = vmatprep.subr.bf16.mxu1 %v7014_v42  ;;  %v7070_v42 = vcombine.high %v1261_v54, %v1265_v34 }
 0x3d7   :  { %2879 = vmatpush1.bf16.msra.mxu0 %v7011_v21  ;;  %v7067_v21 = vcombine.low %v1260_v28, %v1264_v29  ;;  %v1320_v28 = vld [vmem:[#allocation20 + $0x670] sm:$0xff]  ;;  %v1317_v29 = vld [vmem:[#allocation20 + $0x658] sm:$0xff] }
 0x3d8   :  { %2961 = vmatpush1.bf16.msra.mxu1 %v7013_v48  ;;  %2880 = vmatprep.subr.bf16.mxu0 %v7020_v51  ;;  %v7076_v48 = vcombine.high %v1268_v43, %v1272_v44  ;;  %v7078_v51 = vcombine.high %v1269_v45, %v1273_v46 }
 0x3d9   :  { %2962 = vmatprep.subr.bf16.mxu1 %v7022_v52  ;;  %v1276_v52 = vld [vmem:[#allocation20 + $0x510] sm:$0xff] }
 0x3da   :  { %v7083_v0 = vcombine.low %v1276_v52, %v1280_v6 }
 0x3db   :  { %2881 = vmatpush1.bf16.msra.mxu0 %v7019_v60  ;;  %v7084_v60 = vcombine.high %v1276_v52, %v1280_v6  ;;  %v1333_v52 = vld [vmem:[#allocation20 + $0x6d8] sm:$0xff] }
 0x3dc   :  { %2963 = vmatpush1.bf16.msra.mxu1 %v7021_v61  ;;  %2882 = vmatprep.subr.bf16.mxu0 %v7028_v62  ;;  %v7086_v61 = vcombine.high %v1277_v57, %v1281_v58  ;;  %v1284_v62 = vld [vmem:[#allocation20 + $0x550] sm:$0xff]  ;;  %v1337_v6 = vld [vmem:[#allocation20 + $0x6f8] sm:$0xff] }
 0x3dd   :  { %2964 = vmatprep.subr.bf16.mxu1 %v7030_v63  ;;  %v1288_v63 = vld [vmem:[#allocation20 + $0x570] sm:$0xff] }
 0x3de   :  { %v7091_v32 = vcombine.low %v1284_v62, %v1288_v63 }
 0x3df   :  { %2883 = vmatpush1.bf16.msra.mxu0 %v7027_v2  ;;  %v7092_v2 = vcombine.high %v1284_v62, %v1288_v63  ;;  %v1341_v62 = vld [vmem:[#allocation20 + $0x718] sm:$0xff] }
 0x3e0   :  { %2965 = vmatpush1.bf16.msra.mxu1 %v7029_v3  ;;  %2884 = vmatprep.subr.bf16.mxu0 %v7036_v4  ;;  %v7094_v3 = vcombine.high %v1285_v7, %v1289_v22  ;;  %v1292_v4 = vld [vmem:[#allocation20 + $0x590] sm:$0xff]  ;;  %v1345_v63 = vld [vmem:[#allocation20 + $0x738] sm:$0xff]  ;;  %v7141_v22 = vcombine.low %v1333_v52, %v1337_v6 }
 0x3e1   :  { %2966 = vmatprep.subr.bf16.mxu1 %v7038_v5  ;;  %v1296_v5 = vld [vmem:[#allocation20 + $0x5b0] sm:$0xff] }
 0x3e2   :  { %v7099_v13 = vcombine.low %v1292_v4, %v1296_v5 }
 0x3e3   :  { %2885 = vmatpush1.bf16.msra.mxu0 %v7035_v37  ;;  %v7100_v37 = vcombine.high %v1292_v4, %v1296_v5  ;;  %v1349_v4 = vld [vmem:[#allocation20 + $0x758] sm:$0xff] }
 0x3e4   :  { %2967 = vmatpush1.bf16.msra.mxu1 %v7037_v31  ;;  %2886 = vmatprep.subr.bf16.mxu0 %v7044_v10  ;;  %v7102_v31 = vcombine.high %v1293_v8, %v1297_v9  ;;  %v1300_v10 = vld [vmem:[#allocation20 + $0x5d0] sm:$0xff]  ;;  %v1353_v5 = vld [vmem:[#allocation20 + $0x778] sm:$0xff]  ;;  %v7149_v9 = vcombine.low %v1341_v62, %v1345_v63 }
 0x3e5   :  { %2968 = vmatprep.subr.bf16.mxu1 %v7046_v11  ;;  %v1304_v11 = vld [vmem:[#allocation20 + $0x5f0] sm:$0xff] }
 0x3e7   :  { %2887 = vmatpush1.bf16.msra.mxu0 %v7043_v15  ;;  %v7108_v15 = vcombine.high %v1300_v10, %v1304_v11 }
 0x3e8   :  { %2969 = vmatpush1.bf16.msra.mxu1 %v7045_v16  ;;  %2897 = vmatprep.subr.bf16.mxu0 %v7052_v17  ;;  %v7110_v16 = vcombine.high %v1301_v36, %v1305_v12  ;;  %v1308_v17 = vld [vmem:[#allocation20 + $0x610] sm:$0xff]  ;;  %v7157_v12 = vcombine.low %v1349_v4, %v1353_v5 }
 0x3e9   :  { %2979 = vmatprep.subr.bf16.mxu1 %v7054_v18  ;;  %v1312_v18 = vld [vmem:[#allocation20 + $0x630] sm:$0xff] }
 0x3ea   :  { %2889 = vmatmul.mubr.bf16.vlgmr.msra.gmra.mrb[8].mxu0 %v9417_v56  ;;  %v7116_v25 = vcombine.high %v1308_v17, %v1312_v18 }
 0x3eb   :  { %2971 = vmatmul.mubr.bf16.vlgmr.msra.gmra.mrb[16].mxu1 %v9417_v56  ;;  %2898 = vmatpush1.bf16.msra.mxu0 %v7051_v23  ;;  %v7069_v56 = vcombine.low %v1261_v54, %v1265_v34  ;;  %v7107_v23 = vcombine.low %v1300_v10, %v1304_v11  ;;  %v7115_v54 = vcombine.low %v1308_v17, %v1312_v18  ;;  %v1357_v10 = vld [vmem:[#allocation20 + $0x798] sm:$0xff] }
 0x3ec   :  { %2929 = vmatprep.mubr.bf16.mxu0 %v9461_v35  ;;  %2980 = vmatpush1.bf16.msra.mxu1 %v7053_v26  ;;  %v7118_v26 = vcombine.high %v1309_v19, %v1313_v20  ;;  %v7117_v34 = vcombine.low %v1309_v19, %v1313_v20  ;;  %v1361_v11 = vld [vmem:[#allocation20 + $0x7b8] sm:$0xff] }
 0x3ed   :  { %3011 = vmatprep.mubr.bf16.mxu1 %v9461_v35  ;;  %2899 = vmatprep.subr.bf16.mxu0 %v7060_v27  ;;  %v7075_v35 = vcombine.low %v1268_v43, %v1272_v44  ;;  %v1316_v27 = vld [vmem:[#allocation20 + $0x650] sm:$0xff]  ;;  %v1325_v43 = vld [vmem:[#allocation20 + $0x698] sm:$0xff]  ;;  %v7165_v20 = vcombine.low %v1357_v10, %v1361_v11 }
 0x3ee   :  { %2981 = vmatprep.subr.bf16.mxu1 %v7062_v30  ;;  %v1321_v30 = vld [vmem:[#allocation20 + $0x678] sm:$0xff]  ;;  %v7123_v45 = vcombine.low %v1316_v27, %v1320_v28 }
 0x3ef   :  { %2900 = vmatpush1.bf16.msra.mxu0 %v7059_v38  ;;  %v7124_v38 = vcombine.high %v1316_v27, %v1320_v28  ;;  %v1329_v44 = vld [vmem:[#allocation20 + $0x6b8] sm:$0xff]  ;;  %v7125_v46 = vcombine.low %v1317_v29, %v1321_v30  ;;  %v7913_v28 = vld [vmem:[#allocation26 + $0xc] ss:$28 sps:$4 sm:$0xff]  }
 0x3f0   :  { %2982 = vmatpush1.bf16.msra.mxu1 %v7061_v40  ;;  %2901 = vmatprep.subr.bf16.mxu0 %v7068_v41  ;;  %v7126_v40 = vcombine.high %v1317_v29, %v1321_v30  ;;  %v1324_v41 = vld [vmem:[#allocation20 + $0x690] sm:$0xff]  ;;  %v7133_v58 = vcombine.low %v1325_v43, %v1329_v44  ;;  %v1365_v17 = vld [vmem:[#allocation20 + $0x7d8] sm:$0xff] }
 0x3f1   :  { %2983 = vmatprep.subr.bf16.mxu1 %v7070_v42  ;;  %v1328_v42 = vld [vmem:[#allocation20 + $0x6b0] sm:$0xff]  ;;  %v1369_v18 = vld [vmem:[#allocation20 + $0x7f8] sm:$0xff] }
 0x3f2   :  { %v7131_v57 = vcombine.low %v1324_v41, %v1328_v42  ;;  %v7910_v27 = vld [vmem:[#allocation26 + $0x4] ss:$28 sps:$4 sm:$0xff]  }
 0x3f3   :  { %2902 = vmatpush1.bf16.msra.mxu0 %v7067_v21  ;;  %v7132_v21 = vcombine.high %v1324_v41, %v1328_v42  ;;  %v7908_v29 = vld [vmem:[#allocation26] ss:$28 sps:$4 sm:$0xff]   ;;  %v7911_v30 = vld [vmem:[#allocation26 + $0x8] ss:$28 sps:$4 sm:$0xff]   ;;  %v7922_v41 = vld [vmem:[#allocation26 + $0x74] ss:$28 sps:$4 sm:$0xff]  }
 0x3f4   :  { %2984 = vmatpush1.bf16.msra.mxu1 %v7069_v56  ;;  %2903 = vmatprep.subr.bf16.mxu0 %v7076_v48  ;;  %v7134_v56 = vcombine.high %v1325_v43, %v1329_v44  ;;  %v1332_v48 = vld [vmem:[#allocation20 + $0x6d0] sm:$0xff]  ;;  %v7920_v43 = vld [vmem:[#allocation26 + $0x70] ss:$28 sps:$4 sm:$0xff]  }
 0x3f5   :  { %2985 = vmatprep.subr.bf16.mxu1 %v7078_v51  ;;  %v1336_v51 = vld [vmem:[#allocation20 + $0x6f0] sm:$0xff] }
 0x3f6   :  { %v7139_v7 = vcombine.low %v1332_v48, %v1336_v51  ;;  %v7925_v42 = vld [vmem:[#allocation26 + $0x7c] ss:$28 sps:$4 sm:$0xff]  }
 0x3f7   :  { %2904 = vmatpush1.bf16.msra.mxu0 %v7075_v35  ;;  %v7140_v35 = vcombine.high %v1332_v48, %v1336_v51  ;;  %v7923_v44 = vld [vmem:[#allocation26 + $0x78] ss:$28 sps:$4 sm:$0xff]   ;;  %v7937_v48 = vld [vmem:[#allocation26 + $0xec] ss:$28 sps:$4 sm:$0xff]   ;;  %v7932_v51 = vld [vmem:[#allocation26 + $0xe0] ss:$28 sps:$4 sm:$0xff]  }
 0x3f8   :  { %2986 = vmatpush1.bf16.msra.mxu1 %v7077_v59  ;;  %2905 = vmatprep.subr.bf16.mxu0 %v7084_v60  ;;  %v7142_v59 = vcombine.high %v1333_v52, %v1337_v6  ;;  %v1340_v60 = vld [vmem:[#allocation20 + $0x710] sm:$0xff]  ;;  %v7935_v52 = vld [vmem:[#allocation26 + $0xe8] ss:$28 sps:$4 sm:$0xff]  }
 0x3f9   :  { %2987 = vmatprep.subr.bf16.mxu1 %v7086_v61  ;;  %v1344_v61 = vld [vmem:[#allocation20 + $0x730] sm:$0xff] }
 0x3fa   :  { %v7147_v8 = vcombine.low %v1340_v60, %v1344_v61  ;;  %v7940_v6 = vld [vmem:[#allocation26 + $0x11c] ss:$28 sps:$4 sm:$0xff]  }
 0x3fb   :  { %2906 = vmatpush1.bf16.msra.mxu0 %v7083_v0  ;;  %v7148_v0 = vcombine.high %v1340_v60, %v1344_v61  ;;  %v7949_v60 = vld [vmem:[#allocation26 + $0x15c] ss:$28 sps:$4 sm:$0xff]   ;;  %v7944_v61 = vld [vmem:[#allocation26 + $0x150] ss:$28 sps:$4 sm:$0xff]  }
 0x3fc   :  { %2988 = vmatpush1.bf16.msra.mxu1 %v7085_v1  ;;  %2907 = vmatprep.subr.bf16.mxu0 %v7092_v2  ;;  %v7150_v1 = vcombine.high %v1341_v62, %v1345_v63  ;;  %v1348_v2 = vld [vmem:[#allocation20 + $0x750] sm:$0xff]  ;;  %v7952_v63 = vld [vmem:[#allocation26 + $0x18c] ss:$28 sps:$4 sm:$0xff]  }
 0x3fd   :  { %2989 = vmatprep.subr.bf16.mxu1 %v7094_v3  ;;  %v1352_v3 = vld [vmem:[#allocation20 + $0x770] sm:$0xff] }
 0x3fe   :  { %v7155_v36 = vcombine.low %v1348_v2, %v1352_v3  ;;  %v7947_v62 = vld [vmem:[#allocation26 + $0x158] ss:$28 sps:$4 sm:$0xff]  }
 0x3ff   :  { %2908 = vmatpush1.bf16.msra.mxu0 %v7091_v32  ;;  %v7156_v32 = vcombine.high %v1348_v2, %v1352_v3  ;;  %v7961_v2 = vld [vmem:[#allocation26 + $0x1cc] ss:$28 sps:$4 sm:$0xff]   ;;  %v7956_v3 = vld [vmem:[#allocation26 + $0x1c0] ss:$28 sps:$4 sm:$0xff]  }
 0x400   :  { %2990 = vmatpush1.bf16.msra.mxu1 %v7093_v33  ;;  %2909 = vmatprep.subr.bf16.mxu0 %v7100_v37  ;;  %v7158_v33 = vcombine.high %v1349_v4, %v1353_v5  ;;  %v1356_v37 = vld [vmem:[#allocation20 + $0x790] sm:$0xff]  ;;  %v7959_v4 = vld [vmem:[#allocation26 + $0x1c8] ss:$28 sps:$4 sm:$0xff]  }
 0x401   :  { %2991 = vmatprep.subr.bf16.mxu1 %v7102_v31  ;;  %v1360_v31 = vld [vmem:[#allocation20 + $0x7b0] sm:$0xff] }
 0x402   :  { %v7163_v19 = vcombine.low %v1356_v37, %v1360_v31  ;;  %v7964_v5 = vld [vmem:[#allocation26 + $0x1fc] ss:$28 sps:$4 sm:$0xff]  }
 0x403   :  { %2910 = vmatpush1.bf16.msra.mxu0 %v7099_v13  ;;  %v7164_v13 = vcombine.high %v1356_v37, %v1360_v31  ;;  %v7973_v37 = vld [vmem:[#allocation26 + $0x23c] ss:$28 sps:$4 sm:$0xff]   ;;  %v7968_v31 = vld [vmem:[#allocation26 + $0x230] ss:$28 sps:$4 sm:$0xff]  }
 0x404   :  { %2992 = vmatpush1.bf16.msra.mxu1 %v7101_v14  ;;  %2911 = vmatprep.subr.bf16.mxu0 %v7108_v15  ;;  %v7166_v14 = vcombine.high %v1357_v10, %v1361_v11  ;;  %v1364_v15 = vld [vmem:[#allocation20 + $0x7d0] sm:$0xff]  ;;  %v7976_v11 = vld [vmem:[#allocation26 + $0x26c] ss:$28 sps:$4 sm:$0xff]  }
 0x405   :  { %2993 = vmatprep.subr.bf16.mxu1 %v7110_v16  ;;  %v1368_v16 = vld [vmem:[#allocation20 + $0x7f0] sm:$0xff] }
 0x406   :  { %v7971_v10 = vld [vmem:[#allocation26 + $0x238] ss:$28 sps:$4 sm:$0xff]  }
 0x407   :  { %2912 = vmatpush1.bf16.msra.mxu0 %v7107_v23  ;;  %v7172_v23 = vcombine.high %v1364_v15, %v1368_v16 }
 0x408   :  { %2994 = vmatpush1.bf16.msra.mxu1 %v7109_v24  ;;  %2913 = vmatprep.subr.bf16.mxu0 %v7116_v25  ;;  %v7174_v24 = vcombine.high %v1365_v17, %v1369_v18  ;;  %v7171_v25 = vcombine.low %v1364_v15, %v1368_v16  ;;  %v7985_v15 = vld [vmem:[#allocation26 + $0x2ac] ss:$28 sps:$4 sm:$0xff]   ;;  %v7980_v16 = vld [vmem:[#allocation26 + $0x2a0] ss:$28 sps:$4 sm:$0xff]  }
 0x409   :  { %2995 = vmatprep.subr.bf16.mxu1 %v7118_v26  ;;  %v7173_v26 = vcombine.low %v1365_v17, %v1369_v18  ;;  %v7983_v17 = vld [vmem:[#allocation26 + $0x2a8] ss:$28 sps:$4 sm:$0xff]   ;;  %v7988_v18 = vld [vmem:[#allocation26 + $0x2dc] ss:$28 sps:$4 sm:$0xff]  }
 0x40b   :  { %2914 = vmatpush1.bf16.msra.mxu0 %v7115_v54  ;;  %v7916_v54 = vld [vmem:[#allocation26 + $0x3c] ss:$28 sps:$4 sm:$0xff]  }
 0x40c   :  { %2996 = vmatpush1.bf16.msra.mxu1 %v7117_v34  ;;  %2915 = vmatprep.subr.bf16.mxu0 %v7124_v38  ;;  %v7919_v34 = vld [vmem:[#allocation26 + $0x44] ss:$28 sps:$4 sm:$0xff]   ;;  %v7914_v38 = vld [vmem:[#allocation26 + $0x38] ss:$28 sps:$4 sm:$0xff]  }
 0x40d   :  { %2997 = vmatprep.subr.bf16.mxu1 %v7126_v40  ;;  %v7917_v40 = vld [vmem:[#allocation26 + $0x40] ss:$28 sps:$4 sm:$0xff]  }
 0x40f   :  { %2916 = vmatpush1.bf16.msra.mxu0 %v7123_v45  ;;  %v7928_v45 = vld [vmem:[#allocation26 + $0xac] ss:$28 sps:$4 sm:$0xff]  }
 0x410   :  { %2998 = vmatpush1.bf16.msra.mxu1 %v7125_v46  ;;  %2917 = vmatprep.subr.bf16.mxu0 %v7132_v21  ;;  %v7931_v46 = vld [vmem:[#allocation26 + $0xb4] ss:$28 sps:$4 sm:$0xff]   ;;  %v7926_v21 = vld [vmem:[#allocation26 + $0xa8] ss:$28 sps:$4 sm:$0xff]  }
 0x411   :  { %2999 = vmatprep.subr.bf16.mxu1 %v7134_v56  ;;  %v7934_v56 = vld [vmem:[#allocation26 + $0xe4] ss:$28 sps:$4 sm:$0xff]  }
 0x413   :  { %2918 = vmatpush1.bf16.msra.mxu0 %v7131_v57  ;;  %v7943_v57 = vld [vmem:[#allocation26 + $0x124] ss:$28 sps:$4 sm:$0xff]  }
 0x414   :  { %3000 = vmatpush1.bf16.msra.mxu1 %v7133_v58  ;;  %2919 = vmatprep.subr.bf16.mxu0 %v7140_v35  ;;  %v7938_v58 = vld [vmem:[#allocation26 + $0x118] ss:$28 sps:$4 sm:$0xff]   ;;  %v7941_v35 = vld [vmem:[#allocation26 + $0x120] ss:$28 sps:$4 sm:$0xff]  }
 0x415   :  { %3001 = vmatprep.subr.bf16.mxu1 %v7142_v59  ;;  %v7946_v59 = vld [vmem:[#allocation26 + $0x154] ss:$28 sps:$4 sm:$0xff]  }
 0x417   :  { %2920 = vmatpush1.bf16.msra.mxu0 %v7139_v7  ;;  %v7955_v7 = vld [vmem:[#allocation26 + $0x194] ss:$28 sps:$4 sm:$0xff]  }
 0x418   :  { %3002 = vmatpush1.bf16.msra.mxu1 %v7141_v22  ;;  %2921 = vmatprep.subr.bf16.mxu0 %v7148_v0  ;;  %v7950_v22 = vld [vmem:[#allocation26 + $0x188] ss:$28 sps:$4 sm:$0xff]   ;;  %v7953_v0 = vld [vmem:[#allocation26 + $0x190] ss:$28 sps:$4 sm:$0xff]  }
 0x419   :  { %3003 = vmatprep.subr.bf16.mxu1 %v7150_v1  ;;  %v7958_v1 = vld [vmem:[#allocation26 + $0x1c4] ss:$28 sps:$4 sm:$0xff]  }
 0x41b   :  { %2922 = vmatpush1.bf16.msra.mxu0 %v7147_v8  ;;  %v7967_v8 = vld [vmem:[#allocation26 + $0x204] ss:$28 sps:$4 sm:$0xff]  }
 0x41c   :  { %3004 = vmatpush1.bf16.msra.mxu1 %v7149_v9  ;;  %2923 = vmatprep.subr.bf16.mxu0 %v7156_v32  ;;  %v7962_v9 = vld [vmem:[#allocation26 + $0x1f8] ss:$28 sps:$4 sm:$0xff]   ;;  %v7965_v32 = vld [vmem:[#allocation26 + $0x200] ss:$28 sps:$4 sm:$0xff]  }
 0x41d   :  { %3005 = vmatprep.subr.bf16.mxu1 %v7158_v33  ;;  %v7970_v33 = vld [vmem:[#allocation26 + $0x234] ss:$28 sps:$4 sm:$0xff]  }
 0x41f   :  { %2924 = vmatpush1.bf16.msra.mxu0 %v7155_v36  ;;  %v7979_v36 = vld [vmem:[#allocation26 + $0x274] ss:$28 sps:$4 sm:$0xff]  }
 0x420   :  { %3006 = vmatpush1.bf16.msra.mxu1 %v7157_v12  ;;  %2925 = vmatprep.subr.bf16.mxu0 %v7164_v13  ;;  %v7974_v12 = vld [vmem:[#allocation26 + $0x268] ss:$28 sps:$4 sm:$0xff]   ;;  %v7977_v13 = vld [vmem:[#allocation26 + $0x270] ss:$28 sps:$4 sm:$0xff]  }
 0x421   :  { %3007 = vmatprep.subr.bf16.mxu1 %v7166_v14  ;;  %v7982_v14 = vld [vmem:[#allocation26 + $0x2a4] ss:$28 sps:$4 sm:$0xff]  }
 0x423   :  { %2926 = vmatpush1.bf16.msra.mxu0 %v7163_v19  ;;  %v7991_v19 = vld [vmem:[#allocation26 + $0x2e4] ss:$28 sps:$4 sm:$0xff]  }
 0x424   :  { %3008 = vmatpush1.bf16.msra.mxu1 %v7165_v20  ;;  %2927 = vmatprep.subr.bf16.mxu0 %v7172_v23  ;;  %v7986_v20 = vld [vmem:[#allocation26 + $0x2d8] ss:$28 sps:$4 sm:$0xff]   ;;  %v7989_v23 = vld [vmem:[#allocation26 + $0x2e0] ss:$28 sps:$4 sm:$0xff]  }
 0x425   :  { %3009 = vmatprep.subr.bf16.mxu1 %v7174_v24  ;;  %v7994_v24 = vld [vmem:[#allocation26 + $0x314] ss:$28 sps:$4 sm:$0xff]  }
 0x427   :  { %2928 = vmatpush1.bf16.msra.mxu0 %v7171_v25  ;;  %v7997_v25 = vld [vmem:[#allocation26 + $0x31c] ss:$28 sps:$4 sm:$0xff]  }
 0x428   :  { %3010 = vmatpush1.bf16.msra.mxu1 %v7173_v26  ;;  %6157 = vmatprep.subr.bf16.mxu0 %v7910_v27  ;;  %v7992_v26 = vld [vmem:[#allocation26 + $0x310] ss:$28 sps:$4 sm:$0xff]   ;;  %v7995_v27 = vld [vmem:[#allocation26 + $0x318] ss:$28 sps:$4 sm:$0xff]  }
 0x429   :  { %6321 = vmatprep.subr.bf16.mxu1 %v7913_v28  ;;  %v8000_v28 = vld [vmem:[#allocation26 + $0x34c] ss:$28 sps:$4 sm:$0xff]  }
 0x42a   :  { %2930 = vmatmul.mubr.bf16.vlgmr.msra.gmra.mrb[8].mxu0 %v9463_v39 }
 0x42b   :  { %3012 = vmatmul.mubr.bf16.vlgmr.msra.gmra.mrb[16].mxu1 %v9463_v39  ;;  %6158 = vmatpush1.bf16.msra.mxu0 %v7908_v29  ;;  %v7929_v39 = vld [vmem:[#allocation26 + $0xb0] ss:$28 sps:$4 sm:$0xff]  }
 0x42c   :  { %6322 = vmatpush1.bf16.msra.mxu1 %v7911_v30  ;;  %6159 = vmatprep.subr.bf16.mxu0 %v7916_v54  ;;  %v8003_v29 = vld [vmem:[#allocation26 + $0x354] ss:$28 sps:$4 sm:$0xff]   ;;  %v7998_v30 = vld [vmem:[#allocation26 + $0x348] ss:$28 sps:$4 sm:$0xff]  }
 0x42d   :  { %6323 = vmatprep.subr.bf16.mxu1 %v7919_v34  ;;  %v8001_v54 = vld [vmem:[#allocation26 + $0x350] ss:$28 sps:$4 sm:$0xff]   ;;  %v8006_v34 = vld [vmem:[#allocation26 + $0x384] ss:$28 sps:$4 sm:$0xff]  }
 0x42f   :  { %6160 = vmatpush1.bf16.msra.mxu0 %v7914_v38  ;;  %v8009_v38 = vld [vmem:[#allocation26 + $0x38c] ss:$28 sps:$4 sm:$0xff]  }
 0x430   :  { %6324 = vmatpush1.bf16.msra.mxu1 %v7917_v40  ;;  %6161 = vmatprep.subr.bf16.mxu0 %v7922_v41  ;;  %v9477_v40 = vld [vmem:[#allocation22] sm:$0xff] }
 0x431   :  { %6325 = vmatprep.subr.bf16.mxu1 %v7925_v42  ;;  %v1375_v41 = vrot.slane %v9477_v40, %v9360_v49  ;;  %v1379_v42 = vrot.slane %v9477_v40, %v9363_v50 }
 0x433   :  { %6162 = vmatpush1.bf16.msra.mxu0 %v7920_v43  ;;  %v1387_v43 = vrot.slane %v9477_v40, %v9415_v55 }
 0x434   :  { %6326 = vmatpush1.bf16.msra.mxu1 %v7923_v44  ;;  %6163 = vmatprep.subr.bf16.mxu0 %v7928_v45 }
 0x435   :  { %6327 = vmatprep.subr.bf16.mxu1 %v7931_v46 }
 0x437   :  { %6164 = vmatpush1.bf16.msra.mxu0 %v7926_v21 }
 0x438   :  { %6328 = vmatpush1.bf16.msra.mxu1 %v7929_v39  ;;  %6165 = vmatprep.subr.bf16.mxu0 %v7934_v56 }
 0x439   :  { %6329 = vmatprep.subr.bf16.mxu1 %v7937_v48 }
 0x43b   :  { %6166 = vmatpush1.bf16.msra.mxu0 %v7932_v51 }
 0x43c   :  { %6330 = vmatpush1.bf16.msra.mxu1 %v7935_v52  ;;  %6167 = vmatprep.subr.bf16.mxu0 %v7940_v6 }
 0x43d   :  { %6331 = vmatprep.subr.bf16.mxu1 %v7943_v57 }
 0x43f   :  { %6168 = vmatpush1.bf16.msra.mxu0 %v7938_v58 }
 0x440   :  { %6332 = vmatpush1.bf16.msra.mxu1 %v7941_v35  ;;  %6169 = vmatprep.subr.bf16.mxu0 %v7946_v59 }
 0x441   :  { %6333 = vmatprep.subr.bf16.mxu1 %v7949_v60 }
 0x443   :  { %6170 = vmatpush1.bf16.msra.mxu0 %v7944_v61 }
 0x444   :  { %6334 = vmatpush1.bf16.msra.mxu1 %v7947_v62  ;;  %6171 = vmatprep.subr.bf16.mxu0 %v7952_v63 }
 0x445   :  { %6335 = vmatprep.subr.bf16.mxu1 %v7955_v7 }
 0x447   :  { %6172 = vmatpush1.bf16.msra.mxu0 %v7950_v22 }
 0x448   :  { %6336 = vmatpush1.bf16.msra.mxu1 %v7953_v0  ;;  %6173 = vmatprep.subr.bf16.mxu0 %v7958_v1 }
 0x449   :  { %6337 = vmatprep.subr.bf16.mxu1 %v7961_v2 }
 0x44b   :  { %6174 = vmatpush1.bf16.msra.mxu0 %v7956_v3 }
 0x44c   :  { %6338 = vmatpush1.bf16.msra.mxu1 %v7959_v4  ;;  %6175 = vmatprep.subr.bf16.mxu0 %v7964_v5 }
 0x44d   :  { %6339 = vmatprep.subr.bf16.mxu1 %v7967_v8 }
 0x44f   :  { %6176 = vmatpush1.bf16.msra.mxu0 %v7962_v9 }
 0x450   :  { %6340 = vmatpush1.bf16.msra.mxu1 %v7965_v32  ;;  %6177 = vmatprep.subr.bf16.mxu0 %v7970_v33 }
 0x451   :  { %6341 = vmatprep.subr.bf16.mxu1 %v7973_v37  ;;  %v1383_v37 = vrot.slane %v9477_v40, %v9410_v53 }
 0x453   :  { %6178 = vmatpush1.bf16.msra.mxu0 %v7968_v31 }
 0x454   :  { %6342 = vmatpush1.bf16.msra.mxu1 %v7971_v10  ;;  %6179 = vmatprep.subr.bf16.mxu0 %v7976_v11 }
 0x455   :  { %6343 = vmatprep.subr.bf16.mxu1 %v7979_v36 }
 0x457   :  { %6180 = vmatpush1.bf16.msra.mxu0 %v7974_v12 }
 0x458   :  { %6344 = vmatpush1.bf16.msra.mxu1 %v7977_v13  ;;  %6181 = vmatprep.subr.bf16.mxu0 %v7982_v14 }
 0x459   :  { %6345 = vmatprep.subr.bf16.mxu1 %v7985_v15 }
 0x45b   :  { %6182 = vmatpush1.bf16.msra.mxu0 %v7980_v16 }
 0x45c   :  { %6346 = vmatpush1.bf16.msra.mxu1 %v7983_v17  ;;  %6183 = vmatprep.subr.bf16.mxu0 %v7988_v18 }
 0x45d   :  { %6347 = vmatprep.subr.bf16.mxu1 %v7991_v19 }
 0x45f   :  { %6184 = vmatpush1.bf16.msra.mxu0 %v7986_v20 }
 0x460   :  { %6348 = vmatpush1.bf16.msra.mxu1 %v7989_v23  ;;  %6185 = vmatprep.subr.bf16.mxu0 %v7994_v24 }
 0x461   :  { %6349 = vmatprep.subr.bf16.mxu1 %v7997_v25 }
 0x463   :  { %6186 = vmatpush1.bf16.msra.mxu0 %v7992_v26 }
 0x464   :  { %6350 = vmatpush1.bf16.msra.mxu1 %v7995_v27  ;;  %6187 = vmatprep.subr.bf16.mxu0 %v8000_v28 }
 0x465   :  { %6351 = vmatprep.subr.bf16.mxu1 %v8003_v29 }
 0x467   :  { %6188 = vmatpush1.bf16.msra.mxu0 %v7998_v30 }
 0x468   :  { %6352 = vmatpush1.bf16.msra.mxu1 %v8001_v54  ;;  %6198 = vmatprep.subr.bf16.mxu0 %v8006_v34 }
 0x469   :  { %6362 = vmatprep.subr.bf16.mxu1 %v8009_v38 }
 0x47d   :  { %v2767_v44 = vpop.f32.mrb[4].mxu0  ;;  %v2849_v45 = vpop.f32.mrb[12].mxu1 }
 0x47e   :  { %v7711_v46 = vadd.f32 %v2767_v44, %v1375_v41  ;;  %v2769_v21 = vpop.f32.mrb[5].mxu0  ;;  %v2851_v39 = vpop.f32.mrb[13].mxu1  ;;  %v7713_v14 = vadd.f32 %v2849_v45, %v1383_v37 }
 0x47f   :  { %v7712_v56 = vadd.f32 %v2769_v21, %v1379_v42  ;;  %v7714_v48 = vadd.f32 %v2851_v39, %v1387_v43  ;;  %v2771_v51 = vpop.f32.mrb[6].mxu0  ;;  %v2853_v52 = vpop.f32.mrb[14].mxu1 }
 0x480   :  { %v3020_v6 = vrot.slane %v7711_v46, 4  ;;  %v2772_v57 = vpop.f32.mrb[7].mxu0  ;;  %v2854_v58 = vpop.f32.mrb[15].mxu1  ;;  %v3032_v23 = vrot.slane %v7713_v14, 4 }
 0x481   :  { %v3026_v35 = vrot.slane %v7712_v56, 4  ;;  %v3038_v59 = vrot.slane %v7714_v48, 4  ;;  %v9487_v58 = vld [vmem:[#allocation23] sm:$0xff] }
 0x482   :  { %v3021_v60 = vadd.f32 %v7711_v46, %v3020_v6  ;;  %v3033_v30 = vadd.f32 %v7713_v14, %v3032_v23 }
 0x483   :  { %v3027_v61 = vadd.f32 %v7712_v56, %v3026_v35  ;;  %v3039_v62 = vadd.f32 %v7714_v48, %v3038_v59  ;;  %v9489_v59 = vld [vmem:[#allocation25] sm:$0xff] }
 0x484   :  { %v3022_v63 = vrot.slane %v3021_v60, 2  ;;  %v3034_v44 = vrot.slane %v3033_v30, 2 }
 0x485   :  { %v3028_v7 = vrot.slane %v3027_v61, 2  ;;  %v3040_v22 = vrot.slane %v3039_v62, 2 }
 0x486   :  { %v3023_v0 = vadd.f32 %v3022_v63, %v3021_v60  ;;  %v3035_v51 = vadd.f32 %v3034_v44, %v3033_v30  ;;  %v3177_v60 = vrot.slane %v9487_v58, %v9360_v49  ;;  %v3227_v63 = vrot.slane %v9489_v59, %v9360_v49  ;;  %v8027_v44 = vld [vmem:[#allocation26 + $0x434] ss:$28 sps:$4 sm:$0xff]  }
 0x487   :  { %v3029_v1 = vadd.f32 %v3028_v7, %v3027_v61  ;;  %v3041_v2 = vadd.f32 %v3040_v22, %v3039_v62  ;;  %v3181_v22 = vrot.slane %v9487_v58, %v9363_v50 }
 0x488   :  { %v3024_v3 = vrot.slane %v3023_v0, 1  ;;  %v3036_v57 = vrot.slane %v3035_v51, 1 }
 0x489   :  { %v3030_v4 = vrot.slane %v3029_v1, 1  ;;  %v3042_v5 = vrot.slane %v3041_v2, 1 }
 0x48a   :  { %v3025_v8 = vadd.f32 %v3024_v3, %v3023_v0  ;;  %v3037_v35 = vadd.f32 %v3036_v57, %v3035_v51  ;;  %v8031_v51 = vld [vmem:[#allocation26 + $0x468] ss:$28 sps:$4 sm:$0xff]  }
 0x48b   :  { %v3031_v9 = vadd.f32 %v3030_v4, %v3029_v1  ;;  %v3043_v32 = vadd.f32 %v3042_v5, %v3041_v2  ;;  %v3189_v1 = vrot.slane %v9487_v58, %v9415_v55  ;;  %v3231_v5 = vrot.slane %v9489_v59, %v9363_v50  ;;  %v8039_v57 = vld [vmem:[#allocation26 + $0x4a4] ss:$28 sps:$4 sm:$0xff]  }
 0x48c   :  { %v3068_v33 = vmul.f32 0.125, %v3025_v8  ;;  %v3070_v7 = vmul.f32 0.125, %v3037_v35  ;;  %v8034_v35 = vld [vmem:[#allocation26 + $0x498] ss:$28 sps:$4 sm:$0xff]  }
 0x48d   :  { %v3069_v31 = vmul.f32 0.125, %v3031_v9  ;;  %v3071_v10 = vmul.f32 0.125, %v3043_v32  ;;  %v3239_v9 = vrot.slane %v9489_v59, %v9415_v55 }
 0x48e   :  { %v3076_v11 = vsub.f32 %v7711_v46, %v3068_v33  ;;  %v9503_v33 = vsub.f32 %v7713_v14, %v3070_v7  ;;  %v8007_v14 = vld [vmem:[#allocation26 + $0x388] ss:$28 sps:$4 sm:$0xff]   ;;  %v8040_v7 = vld [vmem:[#allocation26 + $0x4d0] ss:$28 sps:$4 sm:$0xff]  }
 0x48f   :  { %v3077_v36 = vsub.f32 %v7712_v56, %v3069_v31  ;;  %v3079_v12 = vsub.f32 %v7714_v48, %v3071_v10 }
 0x490   :  { %v3084_v13 = vmul.f32 %v3076_v11, %v3076_v11 }
 0x491   :  { %v3085_v15 = vmul.f32 %v3077_v36, %v3077_v36  ;;  %v3087_v16 = vmul.f32 %v3079_v12, %v3079_v12 }
 0x492   :  { %v3092_v17 = vrot.slane %v3084_v13, 4 }
 0x493   :  { %v3098_v18 = vrot.slane %v3085_v15, 4  ;;  %v3110_v19 = vrot.slane %v3087_v16, 4 }
 0x494   :  { %v3093_v20 = vadd.f32 %v3092_v17, %v3084_v13 }
 0x495   :  { %v3099_v24 = vadd.f32 %v3098_v18, %v3085_v15  ;;  %v3111_v25 = vadd.f32 %v3110_v19, %v3087_v16  ;;  %v3086_v15 = vmul.f32 %v9503_v33, %v9503_v33  ;;  %v8004_v19 = vld [vmem:[#allocation26 + $0x380] ss:$28 sps:$4 sm:$0xff]  }
 0x496   :  { %v3094_v26 = vrot.slane %v3093_v20, 2 }
 0x497   :  { %v3100_v27 = vrot.slane %v3099_v24, 2  ;;  %v3112_v28 = vrot.slane %v3111_v25, 2  ;;  %v3104_v23 = vrot.slane %v3086_v15, 4 }
 0x498   :  { %v3095_v29 = vadd.f32 %v3094_v26, %v3093_v20  ;;  %v8015_v26 = vld [vmem:[#allocation26 + $0x3c4] ss:$28 sps:$4 sm:$0xff]  }
 0x499   :  { %v3101_v54 = vadd.f32 %v3100_v27, %v3099_v24  ;;  %v3113_v34 = vadd.f32 %v3112_v28, %v3111_v25  ;;  %v8012_v25 = vld [vmem:[#allocation26 + $0x3bc] ss:$28 sps:$4 sm:$0xff]   ;;  %v3105_v30 = vadd.f32 %v3104_v23, %v3086_v15  ;;  %v8066_v15 = vld [vmem:[#allocation26 + $0x5b4] ss:$28 sps:$4 sm:$0xff]  }
 0x49a   :  { %v3096_v38 = vrot.slane %v3095_v29, 1  ;;  %v8010_v28 = vld [vmem:[#allocation26 + $0x3b8] ss:$28 sps:$4 sm:$0xff]   ;;  %v8073_v23 = vld [vmem:[#allocation26 + $0x5f0] ss:$28 sps:$4 sm:$0xff]  }
 0x49b   :  { %v3102_v41 = vrot.slane %v3101_v54, 1  ;;  %v3114_v42 = vrot.slane %v3113_v34, 1 }
 0x49c   :  { %v3097_v43 = vadd.f32 %v3096_v38, %v3095_v29  ;;  %v8013_v29 = vld [vmem:[#allocation26 + $0x3c0] ss:$28 sps:$4 sm:$0xff]   ;;  %v8016_v38 = vld [vmem:[#allocation26 + $0x3f0] ss:$28 sps:$4 sm:$0xff]  }
 0x49d   :  { %v3103_v45 = vadd.f32 %v3102_v41, %v3101_v54  ;;  %v3115_v46 = vadd.f32 %v3114_v42, %v3113_v34  ;;  %v8018_v54 = vld [vmem:[#allocation26 + $0x3f4] ss:$28 sps:$4 sm:$0xff]   ;;  %v8021_v34 = vld [vmem:[#allocation26 + $0x3fc] ss:$28 sps:$4 sm:$0xff]   ;;  %v3106_v42 = vrot.slane %v3105_v30, 2 }
 0x49e   :  { %v3140_v21 = vmul.f32 0.125, %v3097_v43  ;;  %v8019_v41 = vld [vmem:[#allocation26 + $0x3f8] ss:$28 sps:$4 sm:$0xff]   ;;  %v8024_v43 = vld [vmem:[#allocation26 + $0x42c] ss:$28 sps:$4 sm:$0xff]  }
 0x49f   :  { %v3141_v39 = vmul.f32 0.125, %v3103_v45  ;;  %v3143_v56 = vmul.f32 0.125, %v3115_v46  ;;  %v8022_v45 = vld [vmem:[#allocation26 + $0x428] ss:$28 sps:$4 sm:$0xff]   ;;  %v8025_v46 = vld [vmem:[#allocation26 + $0x430] ss:$28 sps:$4 sm:$0xff]  }
 0x4a0   :  { %v3148_v48 = vadd.f32 1e-05, %v3140_v21  ;;  %v3107_v21 = vadd.f32 %v3106_v42, %v3105_v30  ;;  %v8076_v30 = vld [vmem:[#allocation26 + $0x620] ss:$28 sps:$4 sm:$0xff]   ;;  %v3235_v42 = vrot.slane %v9489_v59, %v9410_v53 }
 0x4a1   :  { %v3149_v52 = vadd.f32 1e-05, %v3141_v39  ;;  %v3151_v6 = vadd.f32 1e-05, %v3143_v56  ;;  %v8030_v39 = vld [vmem:[#allocation26 + $0x464] ss:$28 sps:$4 sm:$0xff]  }
 0x4a2   :  { %8560 = vrsqrt.f32 %v3148_v48  ;;  %v8033_v56 = vld [vmem:[#allocation26 + $0x46c] ss:$28 sps:$4 sm:$0xff]   ;;  %v8028_v48 = vld [vmem:[#allocation26 + $0x460] ss:$28 sps:$4 sm:$0xff]  }
 0x4a3   :  { %8562 = vrsqrt.f32 %v3149_v52  ;;  %v3108_v52 = vrot.slane %v3107_v21, 1 }
 0x4a4   :  { %8564 = vrsqrt.f32 %v3151_v6  ;;  %v8036_v6 = vld [vmem:[#allocation26 + $0x49c] ss:$28 sps:$4 sm:$0xff]  }
 0x4ac   :  { %v8561_v61 = vpop.eup %8560 }
 0x4ad   :  { %v3164_v62 = vmul.f32 %v8561_v61, %v3076_v11  ;;  %v8563_v0 = vpop.eup %8562  ;;  %v3109_v61 = vadd.f32 %v3108_v52, %v3107_v21  ;;  %v8088_v21 = vld [vmem:[#allocation26 + $0x690] ss:$28 sps:$4 sm:$0xff]   ;;  %v8094_v52 = vld [vmem:[#allocation26 + $0x6c8] ss:$28 sps:$4 sm:$0xff]  }
 0x4ae   :  { %v8565_v2 = vpop.eup %8564  ;;  %v3165_v4 = vmul.f32 %v8563_v0, %v3077_v36 }
 0x4af   :  { %v3214_v3 = vmul.f32 %v3177_v60, %v3164_v62  ;;  %v3167_v8 = vmul.f32 %v8565_v2, %v3079_v12  ;;  %v8037_v60 = vld [vmem:[#allocation26 + $0x4a0] ss:$28 sps:$4 sm:$0xff]   ;;  %v8042_v62 = vld [vmem:[#allocation26 + $0x4d4] ss:$28 sps:$4 sm:$0xff]   ;;  %v3142_v0 = vmul.f32 0.125, %v3109_v61  ;;  %v9525_v61 = vsub.s32 4, %v9357_v47 }
 0x4b0   :  { %v3215_v37 = vmul.f32 %v3181_v22, %v3165_v4  ;;  %v8043_v22 = vld [vmem:[#allocation26 + $0x4d8] ss:$28 sps:$4 sm:$0xff]   ;;  %v8049_v4 = vld [vmem:[#allocation26 + $0x510] ss:$28 sps:$4 sm:$0xff]  }
 0x4b1   :  { %v3264_v32 = vadd.f32 %v3227_v63, %v3214_v3  ;;  %v3217_v31 = vmul.f32 %v3189_v1, %v3167_v8  ;;  %v8045_v63 = vld [vmem:[#allocation26 + $0x4dc] ss:$28 sps:$4 sm:$0xff]   ;;  %v8048_v1 = vld [vmem:[#allocation26 + $0x50c] ss:$28 sps:$4 sm:$0xff]   ;;  %v8051_v2 = vld [vmem:[#allocation26 + $0x514] ss:$28 sps:$4 sm:$0xff]  }
 0x4b2   :  { %v3265_v10 = vadd.f32 %v3231_v5, %v3215_v37  ;;  %v8046_v3 = vld [vmem:[#allocation26 + $0x508] ss:$28 sps:$4 sm:$0xff]   ;;  %v3150_v5 = vadd.f32 1e-05, %v3142_v0 }
 0x4b3   :  { %vm3272_vm9 = vcmp.gt.f32.partialorder %v3264_v32, 0.0  ;;  %v3280_v11 = vmul.f32 0.2, %v3264_v32  ;;  %v3267_v13 = vadd.f32 %v3239_v9, %v3217_v31  ;;  %v8054_v8 = vld [vmem:[#allocation26 + $0x544] ss:$28 sps:$4 sm:$0xff]  }
 0x4b4   :  { %vm3273_vm10 = vcmp.gt.f32.partialorder %v3265_v10, 0.0  ;;  %v3281_v36 = vmul.f32 0.2, %v3265_v10  ;;  %v8057_v9 = vld [vmem:[#allocation26 + $0x54c] ss:$28 sps:$4 sm:$0xff]   ;;  %8566 = vrsqrt.f32 %v3150_v5 }
 0x4b5   :  { %v3288_v16 = vsel %vm3272_vm9, %v3264_v32, %v3280_v11  ;;  %vm3275_vm11 = vcmp.gt.f32.partialorder %v3267_v13, 0.0  ;;  %v3283_v12 = vmul.f32 0.2, %v3267_v13  ;;  %v8052_v32 = vld [vmem:[#allocation26 + $0x540] ss:$28 sps:$4 sm:$0xff]  }
 0x4b6   :  { %v3289_v17 = vsel %vm3273_vm10, %v3265_v10, %v3281_v36  ;;  %v9509_v24 = vpack.c.bf16 %v3288_v16, %v3288_v16  ;;  %v8055_v37 = vld [vmem:[#allocation26 + $0x548] ss:$28 sps:$4 sm:$0xff]   ;;  %v8060_v31 = vld [vmem:[#allocation26 + $0x57c] ss:$28 sps:$4 sm:$0xff]   ;;  %v8064_v16 = vld [vmem:[#allocation26 + $0x5b0] ss:$28 sps:$4 sm:$0xff]  }
 0x4b7   :  { %v9507_v18 = vpack.c.bf16 %v3289_v17, %v3289_v17  ;;  %v3291_v20 = vsel %vm3275_vm11, %v3267_v13, %v3283_v12  ;;  %v8063_v10 = vld [vmem:[#allocation26 + $0x584] ss:$28 sps:$4 sm:$0xff]   ;;  %v8058_v11 = vld [vmem:[#allocation26 + $0x578] ss:$28 sps:$4 sm:$0xff]   ;;  %v8072_v17 = vld [vmem:[#allocation26 + $0x5ec] ss:$28 sps:$4 sm:$0xff]  }
 0x4b8   :  { %v9515_v27 = vpack.c.bf16 %v3291_v20, %v3291_v20  ;;  %v8061_v13 = vld [vmem:[#allocation26 + $0x580] ss:$28 sps:$4 sm:$0xff]   ;;  %v8067_v12 = vld [vmem:[#allocation26 + $0x5b8] ss:$28 sps:$4 sm:$0xff]   ;;  %v8070_v20 = vld [vmem:[#allocation26 + $0x5e8] ss:$28 sps:$4 sm:$0xff]  }
 0x4b9   :  { %6189 = vmatprep.mubr.bf16.mxu0 %v9507_v18  ;;  %6353 = vmatprep.mubr.bf16.mxu1 %v9507_v18  ;;  %v8069_v36 = vld [vmem:[#allocation26 + $0x5bc] ss:$28 sps:$4 sm:$0xff]  }
 0x4ba   :  { %6190 = vmatmul.mubr.bf16.vlgmr.msra.gmra.mrb[12].mxu0 %v9509_v24  ;;  %6354 = vmatmul.mubr.bf16.vlgmr.msra.gmra.mrb[20].mxu1 %v9509_v24  ;;  %v8106_v5 = vld [vmem:[#allocation26 + $0x738] ss:$28 sps:$4 sm:$0xff]  }
 0x4bb   :  { %6199 = vmatpush1.bf16.msra.mxu0 %v8004_v19  ;;  %6363 = vmatpush1.bf16.msra.mxu1 %v8007_v14  ;;  %v8075_v19 = vld [vmem:[#allocation26 + $0x5f4] ss:$28 sps:$4 sm:$0xff]  }
 0x4bc   :  { %6230 = vmatprep.mubr.bf16.mxu0 %v9515_v27  ;;  %6394 = vmatprep.mubr.bf16.mxu1 %v9515_v27 }
 0x4bd   :  { %6200 = vmatprep.subr.bf16.mxu0 %v8012_v25  ;;  %6364 = vmatprep.subr.bf16.mxu1 %v8015_v26  ;;  %v8078_v25 = vld [vmem:[#allocation26 + $0x624] ss:$28 sps:$4 sm:$0xff]   ;;  %v8081_v26 = vld [vmem:[#allocation26 + $0x62c] ss:$28 sps:$4 sm:$0xff]  }
 0x4be   :  { %v8567_v14 = vpop.eup %8566 }
 0x4bf   :  { %6201 = vmatpush1.bf16.msra.mxu0 %v8010_v28  ;;  %6365 = vmatpush1.bf16.msra.mxu1 %v8013_v29  ;;  %v3166_v28 = vmul.f32 %v8567_v14, %v9503_v33  ;;  %v3185_v29 = vrot.slane %v9487_v58, %v9410_v53  ;;  %v8090_v33 = vld [vmem:[#allocation26 + $0x694] ss:$28 sps:$4 sm:$0xff]  }
 0x4c0   :  { %6202 = vmatprep.subr.bf16.mxu0 %v8018_v54  ;;  %6366 = vmatprep.subr.bf16.mxu1 %v8021_v34  ;;  %v8079_v54 = vld [vmem:[#allocation26 + $0x628] ss:$28 sps:$4 sm:$0xff]   ;;  %v8084_v34 = vld [vmem:[#allocation26 + $0x65c] ss:$28 sps:$4 sm:$0xff]  }
 0x4c3   :  { %6203 = vmatpush1.bf16.msra.mxu0 %v8016_v38  ;;  %6367 = vmatpush1.bf16.msra.mxu1 %v8019_v41  ;;  %v8087_v38 = vld [vmem:[#allocation26 + $0x664] ss:$28 sps:$4 sm:$0xff]   ;;  %v3216_v41 = vmul.f32 %v3185_v29, %v3166_v28  ;;  %v8120_v28 = vld [vmem:[#allocation26 + $0x7ac] ss:$28 sps:$4 sm:$0xff]   ;;  %v8123_v29 = vld [vmem:[#allocation26 + $0x7b4] ss:$28 sps:$4 sm:$0xff]  }
 0x4c4   :  { %6204 = vmatprep.subr.bf16.mxu0 %v8024_v43  ;;  %6368 = vmatprep.subr.bf16.mxu1 %v8027_v44  ;;  %v8082_v43 = vld [vmem:[#allocation26 + $0x658] ss:$28 sps:$4 sm:$0xff]   ;;  %v8085_v44 = vld [vmem:[#allocation26 + $0x660] ss:$28 sps:$4 sm:$0xff]  }
 0x4c7   :  { %6205 = vmatpush1.bf16.msra.mxu0 %v8022_v45  ;;  %6369 = vmatpush1.bf16.msra.mxu1 %v8025_v46  ;;  %v8093_v45 = vld [vmem:[#allocation26 + $0x69c] ss:$28 sps:$4 sm:$0xff]   ;;  %v3266_v46 = vadd.f32 %v3235_v42, %v3216_v41  ;;  %v8118_v42 = vld [vmem:[#allocation26 + $0x7a8] ss:$28 sps:$4 sm:$0xff]  }
 0x4c8   :  { %6206 = vmatprep.subr.bf16.mxu0 %v8030_v39  ;;  %6370 = vmatprep.subr.bf16.mxu1 %v8033_v56  ;;  %v8091_v39 = vld [vmem:[#allocation26 + $0x698] ss:$28 sps:$4 sm:$0xff]   ;;  %v8096_v56 = vld [vmem:[#allocation26 + $0x6cc] ss:$28 sps:$4 sm:$0xff]  }
 0x4c9   :  { %vm3274_vm12 = vcmp.gt.f32.partialorder %v3266_v46, 0.0 }
 0x4cb   :  { %6207 = vmatpush1.bf16.msra.mxu0 %v8028_v48  ;;  %6371 = vmatpush1.bf16.msra.mxu1 %v8031_v51  ;;  %v8099_v48 = vld [vmem:[#allocation26 + $0x6d4] ss:$28 sps:$4 sm:$0xff]   ;;  %v3282_v51 = vmul.f32 0.2, %v3266_v46 }
 0x4cc   :  { %6208 = vmatprep.subr.bf16.mxu0 %v8036_v6  ;;  %6372 = vmatprep.subr.bf16.mxu1 %v8039_v57  ;;  %v8097_v6 = vld [vmem:[#allocation26 + $0x6d0] ss:$28 sps:$4 sm:$0xff]   ;;  %v8102_v57 = vld [vmem:[#allocation26 + $0x704] ss:$28 sps:$4 sm:$0xff]  }
 0x4cf   :  { %6209 = vmatpush1.bf16.msra.mxu0 %v8034_v35  ;;  %6373 = vmatpush1.bf16.msra.mxu1 %v8037_v60  ;;  %v8105_v35 = vld [vmem:[#allocation26 + $0x70c] ss:$28 sps:$4 sm:$0xff]   ;;  %v3290_v60 = vsel %vm3274_vm12, %v3266_v46, %v3282_v51  ;;  %v8124_v51 = vld [vmem:[#allocation26 + $0x7e0] ss:$28 sps:$4 sm:$0xff]  }
 0x4d0   :  { %6210 = vmatprep.subr.bf16.mxu0 %v8042_v62  ;;  %6374 = vmatprep.subr.bf16.mxu1 %v8045_v63  ;;  %v9528_v62 = vsub.s32 5, %v9357_v47  ;;  %v8100_v63 = vld [vmem:[#allocation26 + $0x700] ss:$28 sps:$4 sm:$0xff]   ;;  %v9533_v0 = vpack.c.bf16 %v3290_v60, %v3290_v60 }
 0x4d1   :  { %v8135_v60 = vld [vmem:[#allocation26 + $0x824] ss:$28 sps:$4 sm:$0xff]  }
 0x4d3   :  { %6211 = vmatpush1.bf16.msra.mxu0 %v8040_v7  ;;  %6375 = vmatpush1.bf16.msra.mxu1 %v8043_v22  ;;  %v8103_v7 = vld [vmem:[#allocation26 + $0x708] ss:$28 sps:$4 sm:$0xff]   ;;  %v9531_v22 = vsub.s32 7, %v9357_v47 }
 0x4d4   :  { %6212 = vmatprep.subr.bf16.mxu0 %v8048_v1  ;;  %6376 = vmatprep.subr.bf16.mxu1 %v8051_v2  ;;  %v8108_v1 = vld [vmem:[#allocation26 + $0x73c] ss:$28 sps:$4 sm:$0xff]   ;;  %v8111_v2 = vld [vmem:[#allocation26 + $0x744] ss:$28 sps:$4 sm:$0xff]  }
 0x4d7   :  { %6213 = vmatpush1.bf16.msra.mxu0 %v8046_v3  ;;  %6377 = vmatpush1.bf16.msra.mxu1 %v8049_v4  ;;  %v1391_v3 = vrot.slane %v9477_v40, %v9525_v61  ;;  %v1395_v4 = vrot.slane %v9477_v40, %v9528_v62 }
 0x4d8   :  { %6214 = vmatprep.subr.bf16.mxu0 %v8054_v8  ;;  %6378 = vmatprep.subr.bf16.mxu1 %v8057_v9  ;;  %v8109_v8 = vld [vmem:[#allocation26 + $0x740] ss:$28 sps:$4 sm:$0xff]   ;;  %v1403_v9 = vrot.slane %v9477_v40, %v9531_v22 }
 0x4db   :  { %6215 = vmatpush1.bf16.msra.mxu0 %v8052_v32  ;;  %6379 = vmatpush1.bf16.msra.mxu1 %v8055_v37  ;;  %v8114_v37 = vld [vmem:[#allocation26 + $0x774] ss:$28 sps:$4 sm:$0xff]  }
 0x4dc   :  { %6216 = vmatprep.subr.bf16.mxu0 %v8060_v31  ;;  %6380 = vmatprep.subr.bf16.mxu1 %v8063_v10  ;;  %v8117_v31 = vld [vmem:[#allocation26 + $0x77c] ss:$28 sps:$4 sm:$0xff]  }
 0x4df   :  { %6217 = vmatpush1.bf16.msra.mxu0 %v8058_v11  ;;  %6381 = vmatpush1.bf16.msra.mxu1 %v8061_v13 }
 0x4e0   :  { %6218 = vmatprep.subr.bf16.mxu0 %v8066_v15  ;;  %6382 = vmatprep.subr.bf16.mxu1 %v8069_v36 }
 0x4e3   :  { %6219 = vmatpush1.bf16.msra.mxu0 %v8064_v16  ;;  %6383 = vmatpush1.bf16.msra.mxu1 %v8067_v12  ;;  %v8112_v12 = vld [vmem:[#allocation26 + $0x770] ss:$28 sps:$4 sm:$0xff]  }
 0x4e4   :  { %6220 = vmatprep.subr.bf16.mxu0 %v8072_v17  ;;  %6384 = vmatprep.subr.bf16.mxu1 %v8075_v19 }
 0x4e7   :  { %6221 = vmatpush1.bf16.msra.mxu0 %v8070_v20  ;;  %6385 = vmatpush1.bf16.msra.mxu1 %v8073_v23  ;;  %v8115_v23 = vld [vmem:[#allocation26 + $0x778] ss:$28 sps:$4 sm:$0xff]  }
 0x4e8   :  { %6222 = vmatprep.subr.bf16.mxu0 %v8078_v25  ;;  %6386 = vmatprep.subr.bf16.mxu1 %v8081_v26 }
 0x4eb   :  { %6223 = vmatpush1.bf16.msra.mxu0 %v8076_v30  ;;  %6387 = vmatpush1.bf16.msra.mxu1 %v8079_v54 }
 0x4ec   :  { %6224 = vmatprep.subr.bf16.mxu0 %v8084_v34  ;;  %6388 = vmatprep.subr.bf16.mxu1 %v8087_v38 }
 0x4ef   :  { %6225 = vmatpush1.bf16.msra.mxu0 %v8082_v43  ;;  %6389 = vmatpush1.bf16.msra.mxu1 %v8085_v44  ;;  %v8121_v43 = vld [vmem:[#allocation26 + $0x7b0] ss:$28 sps:$4 sm:$0xff]  }
 0x4f0   :  { %6226 = vmatprep.subr.bf16.mxu0 %v8090_v33  ;;  %6390 = vmatprep.subr.bf16.mxu1 %v8093_v45  ;;  %v8126_v33 = vld [vmem:[#allocation26 + $0x7e4] ss:$28 sps:$4 sm:$0xff]   ;;  %v8129_v45 = vld [vmem:[#allocation26 + $0x7ec] ss:$28 sps:$4 sm:$0xff]  }
 0x4f3   :  { %6227 = vmatpush1.bf16.msra.mxu0 %v8088_v21  ;;  %6391 = vmatpush1.bf16.msra.mxu1 %v8091_v39 }
 0x4f4   :  { %6228 = vmatprep.subr.bf16.mxu0 %v8096_v56  ;;  %6392 = vmatprep.subr.bf16.mxu1 %v8099_v48 }
 0x4f7   :  { %6229 = vmatpush1.bf16.msra.mxu0 %v8094_v52  ;;  %6393 = vmatpush1.bf16.msra.mxu1 %v8097_v6  ;;  %v8127_v52 = vld [vmem:[#allocation26 + $0x7e8] ss:$28 sps:$4 sm:$0xff]   ;;  %v9554_v6 = vsub.s32 6, %v9357_v47  ;;  %v8138_v47 = vld [vmem:[#allocation26 + $0x854] ss:$28 sps:$4 sm:$0xff]  }
 0x4f8   :  { %6239 = vmatprep.subr.bf16.mxu0 %v8102_v57  ;;  %6403 = vmatprep.subr.bf16.mxu1 %v8105_v35  ;;  %v8132_v35 = vld [vmem:[#allocation26 + $0x81c] ss:$28 sps:$4 sm:$0xff]  }
 0x4fa   :  { %6231 = vmatmul.mubr.bf16.vlgmr.msra.gmra.mrb[12].mxu0 %v9533_v0  ;;  %6395 = vmatmul.mubr.bf16.vlgmr.msra.gmra.mrb[20].mxu1 %v9533_v0 }
 0x4fb   :  { %6240 = vmatpush1.bf16.msra.mxu0 %v8100_v63  ;;  %6404 = vmatpush1.bf16.msra.mxu1 %v8103_v7 }
 0x4fc   :  { %6241 = vmatprep.subr.bf16.mxu0 %v8108_v1  ;;  %6405 = vmatprep.subr.bf16.mxu1 %v8111_v2 }
 0x4fd   :  { %v2931_v32 = vpop.f32.mrb[8].mxu0 }
 0x4fe   :  { %v9543_v10 = vadd.f32 %v2931_v32, %v1391_v3  ;;  %v9545_v11 = vpop.f32.mrb[16].mxu1  ;;  %v2933_v13 = vpop.f32.mrb[9].mxu0  ;;  %v8141_v32 = vld [vmem:[#allocation26 + $0x85c] ss:$28 sps:$4 sm:$0xff]  }
 0x4ff   :  { %v9547_v15 = vadd.f32 %v2933_v13, %v1395_v4  ;;  %v3015_v36 = vpop.f32.mrb[17].mxu1  ;;  %v2935_v16 = vpop.f32.mrb[10].mxu0  ;;  %6242 = vmatpush1.bf16.msra.mxu0 %v8106_v5  ;;  %6406 = vmatpush1.bf16.msra.mxu1 %v8109_v8  ;;  %v8130_v4 = vld [vmem:[#allocation26 + $0x818] ss:$28 sps:$4 sm:$0xff]   ;;  %v8133_v5 = vld [vmem:[#allocation26 + $0x820] ss:$28 sps:$4 sm:$0xff]   ;;  %v1399_v8 = vrot.slane %v9477_v40, %v9554_v6 }
 0x500   :  { %v3044_v17 = vrot.slane %v9543_v10, 4  ;;  %v7718_v19 = vadd.f32 %v3015_v36, %v1403_v9  ;;  %v3017_v14 = vpop.f32.mrb[18].mxu1  ;;  %v2936_v20 = vpop.f32.mrb[11].mxu0  ;;  %6243 = vmatprep.subr.bf16.mxu0 %v8114_v37  ;;  %6407 = vmatprep.subr.bf16.mxu1 %v8117_v31  ;;  %v8136_v40 = vld [vmem:[#allocation26 + $0x850] ss:$28 sps:$4 sm:$0xff]  }
 0x501   :  { %v3050_v25 = vrot.slane %v9547_v15, 4  ;;  %v3018_v26 = vpop.f32.mrb[19].mxu1  ;;  %v8144_v14 = vld [vmem:[#allocation26 + $0x88c] ss:$28 sps:$4 sm:$0xff]  }
 0x502   :  { %v3045_v30 = vadd.f32 %v9543_v10, %v3044_v17  ;;  %v3062_v54 = vrot.slane %v7718_v19, 4  ;;  %v9569_v17 = vadd.f32 %v9545_v11, %v1399_v8 }
 0x503   :  { %v3051_v34 = vadd.f32 %v9547_v15, %v3050_v25  ;;  %6244 = vmatpush1.bf16.msra.mxu0 %v8112_v12  ;;  %6408 = vmatpush1.bf16.msra.mxu1 %v8115_v23  ;;  %v8139_v12 = vld [vmem:[#allocation26 + $0x858] ss:$28 sps:$4 sm:$0xff]  }
 0x504   :  { %v3046_v38 = vrot.slane %v3045_v30, 2  ;;  %v3063_v41 = vadd.f32 %v7718_v19, %v3062_v54  ;;  %6245 = vmatprep.subr.bf16.mxu0 %v8120_v28  ;;  %6409 = vmatprep.subr.bf16.mxu1 %v8123_v29  ;;  %v8142_v28 = vld [vmem:[#allocation26 + $0x888] ss:$28 sps:$4 sm:$0xff]   ;;  %v8145_v29 = vld [vmem:[#allocation26 + $0x890] ss:$28 sps:$4 sm:$0xff]   ;;  %v3056_v11 = vrot.slane %v9569_v17, 4 }
 0x505   :  { %v3052_v44 = vrot.slane %v3051_v34, 2  ;;  %v8150_v54 = vld [vmem:[#allocation26 + $0x8c4] ss:$28 sps:$4 sm:$0xff]  }
 0x506   :  { %v3047_v46 = vadd.f32 %v3046_v38, %v3045_v30  ;;  %v3064_v21 = vrot.slane %v3063_v41, 2 }
 0x507   :  { %v3053_v39 = vadd.f32 %v3052_v44, %v3051_v34  ;;  %6246 = vmatpush1.bf16.msra.mxu0 %v8118_v42  ;;  %6410 = vmatpush1.bf16.msra.mxu1 %v8121_v43  ;;  %v8153_v34 = vld [vmem:[#allocation26 + $0x8cc] ss:$28 sps:$4 sm:$0xff]  }
 0x508   :  { %v3048_v56 = vrot.slane %v3047_v46, 1  ;;  %v3065_v48 = vadd.f32 %v3064_v21, %v3063_v41  ;;  %6247 = vmatprep.subr.bf16.mxu0 %v8126_v33  ;;  %6411 = vmatprep.subr.bf16.mxu1 %v8129_v45  ;;  %v8148_v33 = vld [vmem:[#allocation26 + $0x8c0] ss:$28 sps:$4 sm:$0xff]   ;;  %v8151_v45 = vld [vmem:[#allocation26 + $0x8c8] ss:$28 sps:$4 sm:$0xff]  }
 0x509   :  { %v3054_v57 = vrot.slane %v3053_v39, 1 }
 0x50a   :  { %v3049_v63 = vadd.f32 %v3048_v56, %v3047_v46  ;;  %v3066_v7 = vrot.slane %v3065_v48, 1  ;;  %v3057_v46 = vadd.f32 %v9569_v17, %v3056_v11  ;;  %v8159_v56 = vld [vmem:[#allocation26 + $0x904] ss:$28 sps:$4 sm:$0xff]   ;;  %v8180_v11 = vld [vmem:[#allocation26 + $0x9dc] ss:$28 sps:$4 sm:$0xff]  }
 0x50b   :  { %v3055_v1 = vadd.f32 %v3054_v57, %v3053_v39  ;;  %6248 = vmatpush1.bf16.msra.mxu0 %v8124_v51  ;;  %6412 = vmatpush1.bf16.msra.mxu1 %v8127_v52  ;;  %v8156_v39 = vld [vmem:[#allocation26 + $0x8fc] ss:$28 sps:$4 sm:$0xff]  }
 0x50c   :  { %v3072_v2 = vmul.f32 0.125, %v3049_v63  ;;  %v3067_v3 = vadd.f32 %v3066_v7, %v3065_v48  ;;  %6249 = vmatprep.subr.bf16.mxu0 %v8132_v35  ;;  %6413 = vmatprep.subr.bf16.mxu1 %v8135_v60  ;;  %v8154_v60 = vld [vmem:[#allocation26 + $0x8f8] ss:$28 sps:$4 sm:$0xff]   ;;  %v8157_v63 = vld [vmem:[#allocation26 + $0x900] ss:$28 sps:$4 sm:$0xff]   ;;  %v3058_v7 = vrot.slane %v3057_v46, 2 }
 0x50d   :  { %v3073_v9 = vmul.f32 0.125, %v3055_v1 }
 0x50e   :  { %v9559_v37 = vsub.f32 %v9543_v10, %v3072_v2  ;;  %v3075_v31 = vmul.f32 0.125, %v3067_v3  ;;  %v8162_v2 = vld [vmem:[#allocation26 + $0x934] ss:$28 sps:$4 sm:$0xff]   ;;  %v8165_v3 = vld [vmem:[#allocation26 + $0x93c] ss:$28 sps:$4 sm:$0xff]  }
 0x50f   :  { %v9562_v13 = vsub.f32 %v9547_v15, %v3073_v9  ;;  %6250 = vmatpush1.bf16.msra.mxu0 %v8130_v4  ;;  %6414 = vmatpush1.bf16.msra.mxu1 %v8133_v5  ;;  %v8147_v15 = vld [vmem:[#allocation26 + $0x894] ss:$28 sps:$4 sm:$0xff]  }
 0x510   :  { %v3088_v36 = vmul.f32 %v9559_v37, %v9559_v37  ;;  %v9566_v16 = vsub.f32 %v7718_v19, %v3075_v31  ;;  %6251 = vmatprep.subr.bf16.mxu0 %v8138_v47  ;;  %6415 = vmatprep.subr.bf16.mxu1 %v8141_v32  ;;  %v8160_v9 = vld [vmem:[#allocation26 + $0x930] ss:$28 sps:$4 sm:$0xff]   ;;  %v8163_v31 = vld [vmem:[#allocation26 + $0x938] ss:$28 sps:$4 sm:$0xff]  }
 0x511   :  { %v3089_v10 = vmul.f32 %v9562_v13, %v9562_v13 }
 0x512   :  { %v3116_v20 = vrot.slane %v3088_v36, 4  ;;  %v3091_v23 = vmul.f32 %v9566_v16, %v9566_v16 }
 0x513   :  { %v3122_v19 = vrot.slane %v3089_v10, 4  ;;  %6252 = vmatpush1.bf16.msra.mxu0 %v8136_v40  ;;  %6416 = vmatpush1.bf16.msra.mxu1 %v8139_v12  ;;  %v8168_v12 = vld [vmem:[#allocation26 + $0x96c] ss:$28 sps:$4 sm:$0xff]  }
 0x514   :  { %v3117_v25 = vadd.f32 %v3116_v20, %v3088_v36  ;;  %v3134_v26 = vrot.slane %v3091_v23, 4  ;;  %6253 = vmatprep.subr.bf16.mxu0 %v8144_v14  ;;  %6417 = vmatprep.subr.bf16.mxu1 %v8147_v15  ;;  %v3059_v36 = vadd.f32 %v3058_v7, %v3057_v46  ;;  %v8166_v15 = vld [vmem:[#allocation26 + $0x968] ss:$28 sps:$4 sm:$0xff]   ;;  %v8169_v20 = vld [vmem:[#allocation26 + $0x970] ss:$28 sps:$4 sm:$0xff]  }
 0x515   :  { %v3123_v30 = vadd.f32 %v3122_v19, %v3089_v10  ;;  %v8171_v10 = vld [vmem:[#allocation26 + $0x974] ss:$28 sps:$4 sm:$0xff]   ;;  %v8174_v19 = vld [vmem:[#allocation26 + $0x9a4] ss:$28 sps:$4 sm:$0xff]   ;;  %v8189_v46 = vld [vmem:[#allocation26 + $0xa1c] ss:$28 sps:$4 sm:$0xff]  }
 0x516   :  { %v3118_v38 = vrot.slane %v3117_v25, 2  ;;  %v3135_v41 = vadd.f32 %v3134_v26, %v3091_v23  ;;  %v3060_v23 = vrot.slane %v3059_v36, 1  ;;  %v8172_v26 = vld [vmem:[#allocation26 + $0x9a0] ss:$28 sps:$4 sm:$0xff]  }
 0x517   :  { %v3124_v42 = vrot.slane %v3123_v30, 2  ;;  %6254 = vmatpush1.bf16.msra.mxu0 %v8142_v28  ;;  %6418 = vmatpush1.bf16.msra.mxu1 %v8145_v29  ;;  %v8175_v28 = vld [vmem:[#allocation26 + $0x9a8] ss:$28 sps:$4 sm:$0xff]  }
 0x518   :  { %v3119_v43 = vadd.f32 %v3118_v38, %v3117_v25  ;;  %v3136_v44 = vrot.slane %v3135_v41, 2  ;;  %6255 = vmatprep.subr.bf16.mxu0 %v8150_v54  ;;  %6419 = vmatprep.subr.bf16.mxu1 %v8153_v34  ;;  %v8177_v25 = vld [vmem:[#allocation26 + $0x9ac] ss:$28 sps:$4 sm:$0xff]   ;;  %v3061_v29 = vadd.f32 %v3060_v23, %v3059_v36  ;;  %v3193_v54 = vrot.slane %v9487_v58, %v9525_v61  ;;  %v8178_v38 = vld [vmem:[#allocation26 + $0x9d8] ss:$28 sps:$4 sm:$0xff]  }
 0x519   :  { %v3125_v21 = vadd.f32 %v3124_v42, %v3123_v30  ;;  %v8183_v30 = vld [vmem:[#allocation26 + $0x9e4] ss:$28 sps:$4 sm:$0xff]  }
 0x51a   :  { %v3120_v48 = vrot.slane %v3119_v43, 1  ;;  %v3137_v51 = vadd.f32 %v3136_v44, %v3135_v41  ;;  %v8181_v41 = vld [vmem:[#allocation26 + $0x9e0] ss:$28 sps:$4 sm:$0xff]   ;;  %v3074_v44 = vmul.f32 0.125, %v3061_v29  ;;  %v8210_v29 = vld [vmem:[#allocation26 + $0xaf4] ss:$28 sps:$4 sm:$0xff]  }
 0x51b   :  { %v3126_v52 = vrot.slane %v3125_v21, 1  ;;  %6256 = vmatpush1.bf16.msra.mxu0 %v8148_v33  ;;  %6420 = vmatpush1.bf16.msra.mxu1 %v8151_v45  ;;  %v3197_v33 = vrot.slane %v9487_v58, %v9528_v62  ;;  %v8186_v45 = vld [vmem:[#allocation26 + $0xa14] ss:$28 sps:$4 sm:$0xff]   ;;  %v8207_v23 = vld [vmem:[#allocation26 + $0xac4] ss:$28 sps:$4 sm:$0xff]  }
 0x51c   :  { %v3121_v57 = vadd.f32 %v3120_v48, %v3119_v43  ;;  %v3138_v35 = vrot.slane %v3137_v51, 1  ;;  %6257 = vmatprep.subr.bf16.mxu0 %v8156_v39  ;;  %6421 = vmatprep.subr.bf16.mxu1 %v8159_v56  ;;  %v3243_v43 = vrot.slane %v9489_v59, %v9525_v61  ;;  %v3205_v39 = vrot.slane %v9487_v58, %v9531_v22 }
 0x51d   :  { %v3127_v1 = vadd.f32 %v3126_v52, %v3125_v21  ;;  %v9593_v7 = vsub.f32 %v9569_v17, %v3074_v44 }
 0x51e   :  { %v3144_v4 = vmul.f32 0.125, %v3121_v57  ;;  %v3139_v5 = vadd.f32 %v3138_v35, %v3137_v51  ;;  %v3255_v57 = vrot.slane %v9489_v59, %v9531_v22  ;;  %v8184_v35 = vld [vmem:[#allocation26 + $0xa10] ss:$28 sps:$4 sm:$0xff]  }
 0x51f   :  { %v3145_v8 = vmul.f32 0.125, %v3127_v1  ;;  %6258 = vmatpush1.bf16.msra.mxu0 %v8154_v60  ;;  %6422 = vmatpush1.bf16.msra.mxu1 %v8157_v63  ;;  %v8187_v60 = vld [vmem:[#allocation26 + $0xa18] ss:$28 sps:$4 sm:$0xff]   ;;  %v8193_v22 = vld [vmem:[#allocation26 + $0xa50] ss:$28 sps:$4 sm:$0xff]  }
 0x520   :  { %v3152_v47 = vadd.f32 1e-05, %v3144_v4  ;;  %v3147_v32 = vmul.f32 0.125, %v3139_v5  ;;  %6259 = vmatprep.subr.bf16.mxu0 %v8162_v2  ;;  %6423 = vmatprep.subr.bf16.mxu1 %v8165_v3  ;;  %v8195_v1 = vld [vmem:[#allocation26 + $0xa54] ss:$28 sps:$4 sm:$0xff]  }
 0x521   :  { %v3153_v40 = vadd.f32 1e-05, %v3145_v8  ;;  %v8198_v5 = vld [vmem:[#allocation26 + $0xa84] ss:$28 sps:$4 sm:$0xff]   ;;  %v3090_v8 = vmul.f32 %v9593_v7, %v9593_v7 }
 0x522   :  { %8568 = vrsqrt.f32 %v3152_v47  ;;  %v3155_v14 = vadd.f32 1e-05, %v3147_v32 }
 0x523   :  { %8570 = vrsqrt.f32 %v3153_v40  ;;  %6260 = vmatpush1.bf16.msra.mxu0 %v8160_v9  ;;  %6424 = vmatpush1.bf16.msra.mxu1 %v8163_v31  ;;  %v8201_v9 = vld [vmem:[#allocation26 + $0xa8c] ss:$28 sps:$4 sm:$0xff]   ;;  %v8196_v40 = vld [vmem:[#allocation26 + $0xa80] ss:$28 sps:$4 sm:$0xff]  }
 0x524   :  { %8572 = vrsqrt.f32 %v3155_v14  ;;  %6261 = vmatprep.subr.bf16.mxu0 %v8168_v12  ;;  %6425 = vmatprep.subr.bf16.mxu1 %v8171_v10  ;;  %v8199_v12 = vld [vmem:[#allocation26 + $0xa88] ss:$28 sps:$4 sm:$0xff]   ;;  %v3128_v14 = vrot.slane %v3090_v8, 4 }
 0x527   :  { %6262 = vmatpush1.bf16.msra.mxu0 %v8166_v15  ;;  %6426 = vmatpush1.bf16.msra.mxu1 %v8169_v20  ;;  %v8204_v20 = vld [vmem:[#allocation26 + $0xabc] ss:$28 sps:$4 sm:$0xff]  }
 0x528   :  { %6263 = vmatprep.subr.bf16.mxu0 %v8174_v19  ;;  %6427 = vmatprep.subr.bf16.mxu1 %v8177_v25  ;;  %v8202_v25 = vld [vmem:[#allocation26 + $0xab8] ss:$28 sps:$4 sm:$0xff]  }
 0x52b   :  { %6264 = vmatpush1.bf16.msra.mxu0 %v8172_v26  ;;  %6428 = vmatpush1.bf16.msra.mxu1 %v8175_v28  ;;  %v8205_v26 = vld [vmem:[#allocation26 + $0xac0] ss:$28 sps:$4 sm:$0xff]   ;;  %v3129_v28 = vadd.f32 %v3128_v14, %v3090_v8  ;;  %v8267_v14 = vld [vmem:[#allocation26 + $0xcf4] ss:$28 sps:$4 sm:$0xff]  }
 0x52c   :  { %v8569_v34 = vpop.eup %8568  ;;  %6265 = vmatprep.subr.bf16.mxu0 %v8180_v11  ;;  %6429 = vmatprep.subr.bf16.mxu1 %v8183_v30  ;;  %v8213_v11 = vld [vmem:[#allocation26 + $0xafc] ss:$28 sps:$4 sm:$0xff]   ;;  %v8208_v30 = vld [vmem:[#allocation26 + $0xaf0] ss:$28 sps:$4 sm:$0xff]  }
 0x52d   :  { %v3168_v42 = vmul.f32 %v8569_v34, %v9559_v37  ;;  %v8571_v21 = vpop.eup %8570  ;;  %v3247_v37 = vrot.slane %v9489_v59, %v9528_v62  ;;  %v8190_v59 = vld [vmem:[#allocation26 + $0xa48] ss:$28 sps:$4 sm:$0xff]   ;;  %v3130_v34 = vrot.slane %v3129_v28, 2  ;;  %v8252_v8 = vld [vmem:[#allocation26 + $0xc7c] ss:$28 sps:$4 sm:$0xff]  }
 0x52e   :  { %v8573_v56 = vpop.eup %8572  ;;  %v3169_v51 = vmul.f32 %v8571_v21, %v9562_v13  ;;  %v8192_v13 = vld [vmem:[#allocation26 + $0xa4c] ss:$28 sps:$4 sm:$0xff]  }
 0x52f   :  { %v3218_v48 = vmul.f32 %v3193_v54, %v3168_v42  ;;  %v3171_v52 = vmul.f32 %v8573_v56, %v9566_v16  ;;  %6266 = vmatpush1.bf16.msra.mxu0 %v8178_v38  ;;  %6430 = vmatpush1.bf16.msra.mxu1 %v8181_v41  ;;  %v8211_v54 = vld [vmem:[#allocation26 + $0xaf8] ss:$28 sps:$4 sm:$0xff]   ;;  %v8216_v38 = vld [vmem:[#allocation26 + $0xb2c] ss:$28 sps:$4 sm:$0xff]   ;;  %v3131_v44 = vadd.f32 %v3130_v34, %v3129_v28 }
 0x530   :  { %v3219_v58 = vmul.f32 %v3197_v33, %v3169_v51  ;;  %6267 = vmatprep.subr.bf16.mxu0 %v8186_v45  ;;  %6431 = vmatprep.subr.bf16.mxu1 %v8189_v46  ;;  %v8219_v41 = vld [vmem:[#allocation26 + $0xb34] ss:$28 sps:$4 sm:$0xff]   ;;  %v8214_v42 = vld [vmem:[#allocation26 + $0xb28] ss:$28 sps:$4 sm:$0xff]   ;;  %v8220_v46 = vld [vmem:[#allocation26 + $0xb60] ss:$28 sps:$4 sm:$0xff]  }
 0x531   :  { %v3268_v63 = vadd.f32 %v3243_v43, %v3218_v48  ;;  %v3221_v2 = vmul.f32 %v3205_v39, %v3171_v52  ;;  %v8217_v43 = vld [vmem:[#allocation26 + $0xb30] ss:$28 sps:$4 sm:$0xff]   ;;  %v8222_v33 = vld [vmem:[#allocation26 + $0xb64] ss:$28 sps:$4 sm:$0xff]   ;;  %v3132_v39 = vrot.slane %v3131_v44, 1 }
 0x532   :  { %v3269_v3 = vadd.f32 %v3247_v37, %v3219_v58  ;;  %v8225_v45 = vld [vmem:[#allocation26 + $0xb6c] ss:$28 sps:$4 sm:$0xff]   ;;  %v8228_v56 = vld [vmem:[#allocation26 + $0xb9c] ss:$28 sps:$4 sm:$0xff]   ;;  %v8231_v48 = vld [vmem:[#allocation26 + $0xba4] ss:$28 sps:$4 sm:$0xff]  }
 0x533   :  { %vm3276_vm13 = vcmp.gt.f32.partialorder %v3268_v63, 0.0  ;;  %v3284_v16 = vmul.f32 0.2, %v3268_v63  ;;  %v3271_v4 = vadd.f32 %v3255_v57, %v3221_v2  ;;  %6268 = vmatpush1.bf16.msra.mxu0 %v8184_v35  ;;  %6432 = vmatpush1.bf16.msra.mxu1 %v8187_v60  ;;  %v8223_v21 = vld [vmem:[#allocation26 + $0xb68] ss:$28 sps:$4 sm:$0xff]   ;;  %v3133_v52 = vadd.f32 %v3132_v39, %v3131_v44 }
 0x534   :  { %6269 = vmatprep.subr.bf16.mxu0 %v8192_v13  ;;  %6433 = vmatprep.subr.bf16.mxu1 %v8195_v1  ;;  %vm3277_vm14 = vcmp.gt.f32.partialorder %v3269_v3, 0.0  ;;  %v3285_v17 = vmul.f32 0.2, %v3269_v3  ;;  %v8226_v51 = vld [vmem:[#allocation26 + $0xb98] ss:$28 sps:$4 sm:$0xff]  }
 0x535   :  { %v3292_v47 = vsel %vm3276_vm13, %v3268_v63, %v3284_v16  ;;  %vm3279_vm15 = vcmp.gt.f32.partialorder %v3271_v4, 0.0  ;;  %v3287_v32 = vmul.f32 0.2, %v3271_v4  ;;  %v8229_v37 = vld [vmem:[#allocation26 + $0xba0] ss:$28 sps:$4 sm:$0xff]   ;;  %v3146_v58 = vmul.f32 0.125, %v3133_v52 }
 0x536   :  { %v3293_v31 = vsel %vm3277_vm14, %v3269_v3, %v3285_v17  ;;  %v9599_v15 = vpack.c.bf16 %v3292_v47, %v3292_v47  ;;  %v8234_v57 = vld [vmem:[#allocation26 + $0xbd4] ss:$28 sps:$4 sm:$0xff]   ;;  %v8237_v35 = vld [vmem:[#allocation26 + $0xbdc] ss:$28 sps:$4 sm:$0xff]   ;;  %v8240_v13 = vld [vmem:[#allocation26 + $0xc0c] ss:$28 sps:$4 sm:$0xff]  }
 0x537   :  { %6270 = vmatpush1.bf16.msra.mxu0 %v8190_v59  ;;  %6434 = vmatpush1.bf16.msra.mxu1 %v8193_v22  ;;  %v9597_v36 = vpack.c.bf16 %v3293_v31, %v3293_v31  ;;  %v3295_v10 = vsel %vm3279_vm15, %v3271_v4, %v3287_v32  ;;  %v8232_v60 = vld [vmem:[#allocation26 + $0xbd0] ss:$28 sps:$4 sm:$0xff]   ;;  %v8235_v63 = vld [vmem:[#allocation26 + $0xbd8] ss:$28 sps:$4 sm:$0xff]   ;;  %v8238_v2 = vld [vmem:[#allocation26 + $0xc08] ss:$28 sps:$4 sm:$0xff]  }
 0x538   :  { %6280 = vmatprep.subr.bf16.mxu0 %v8198_v5  ;;  %6444 = vmatprep.subr.bf16.mxu1 %v8201_v9  ;;  %v9605_v19 = vpack.c.bf16 %v3295_v10, %v3295_v10  ;;  %v8243_v1 = vld [vmem:[#allocation26 + $0xc14] ss:$28 sps:$4 sm:$0xff]   ;;  %v3154_v16 = vadd.f32 1e-05, %v3146_v58  ;;  %v8246_v4 = vld [vmem:[#allocation26 + $0xc44] ss:$28 sps:$4 sm:$0xff]  }
 0x539   :  { %6271 = vmatprep.mubr.bf16.mxu0 %v9597_v36  ;;  %6435 = vmatprep.mubr.bf16.mxu1 %v9597_v36  ;;  %v8241_v3 = vld [vmem:[#allocation26 + $0xc10] ss:$28 sps:$4 sm:$0xff]   ;;  %v8244_v22 = vld [vmem:[#allocation26 + $0xc40] ss:$28 sps:$4 sm:$0xff]   ;;  %v8247_v5 = vld [vmem:[#allocation26 + $0xc48] ss:$28 sps:$4 sm:$0xff]  }
 0x53a   :  { %6272 = vmatmul.mubr.bf16.vlgmr.msra.gmra.mrb[12].mxu0 %v9599_v15  ;;  %6436 = vmatmul.mubr.bf16.vlgmr.msra.gmra.mrb[20].mxu1 %v9599_v15  ;;  %v8249_v59 = vld [vmem:[#allocation26 + $0xc4c] ss:$28 sps:$4 sm:$0xff]   ;;  %8574 = vrsqrt.f32 %v3154_v16  ;;  %v8255_v17 = vld [vmem:[#allocation26 + $0xc84] ss:$28 sps:$4 sm:$0xff]   ;;  %v8250_v9 = vld [vmem:[#allocation26 + $0xc78] ss:$28 sps:$4 sm:$0xff]  }
 0x53b   :  { %6281 = vmatpush1.bf16.msra.mxu0 %v8196_v40  ;;  %6445 = vmatpush1.bf16.msra.mxu1 %v8199_v12  ;;  %v8253_v47 = vld [vmem:[#allocation26 + $0xc80] ss:$28 sps:$4 sm:$0xff]   ;;  %v8258_v32 = vld [vmem:[#allocation26 + $0xcb4] ss:$28 sps:$4 sm:$0xff]   ;;  %v8264_v10 = vld [vmem:[#allocation26 + $0xcec] ss:$28 sps:$4 sm:$0xff]  }
 0x53c   :  { %6312 = vmatprep.mubr.bf16.mxu0 %v9605_v19  ;;  %6476 = vmatprep.mubr.bf16.mxu1 %v9605_v19  ;;  %v8261_v31 = vld [vmem:[#allocation26 + $0xcbc] ss:$28 sps:$4 sm:$0xff]   ;;  %v8256_v40 = vld [vmem:[#allocation26 + $0xcb0] ss:$28 sps:$4 sm:$0xff]   ;;  %v8271_v34 = vld [vmem:[#allocation26 + $0xd28] ss:$28 sps:$4 sm:$0xff]  }
 0x53d   :  { %6282 = vmatprep.subr.bf16.mxu0 %v8204_v20  ;;  %6446 = vmatprep.subr.bf16.mxu1 %v8207_v23  ;;  %v8259_v12 = vld [vmem:[#allocation26 + $0xcb8] ss:$28 sps:$4 sm:$0xff]   ;;  %v8262_v23 = vld [vmem:[#allocation26 + $0xce8] ss:$28 sps:$4 sm:$0xff]   ;;  %v8280_v39 = vld [vmem:[#allocation26 + $0xd90] ss:$28 sps:$4 sm:$0xff]  }
 0x53e   :  { %v8273_v28 = vld [vmem:[#allocation26 + $0xd2c] ss:$28 sps:$4 sm:$0xff]  }
 0x53f   :  { %6283 = vmatpush1.bf16.msra.mxu0 %v8202_v25  ;;  %6447 = vmatpush1.bf16.msra.mxu1 %v8205_v26  ;;  %v8265_v25 = vld [vmem:[#allocation26 + $0xcf0] ss:$28 sps:$4 sm:$0xff]   ;;  %v8270_v26 = vld [vmem:[#allocation26 + $0xd24] ss:$28 sps:$4 sm:$0xff]  }
 0x540   :  { %6284 = vmatprep.subr.bf16.mxu0 %v8210_v29  ;;  %6448 = vmatprep.subr.bf16.mxu1 %v8213_v11  ;;  %v8590_v11 = vld [vmem:[#allocation23] sm:$0xff]  ;;  %v8286_v52 = vld [vmem:[#allocation26 + $0xdc8] ss:$28 sps:$4 sm:$0xff]  }
 0x541   :  { %v8292_v58 = vld [vmem:[#allocation26 + $0x10] ss:$28 sps:$4 sm:$0xff]   ;;  %v8297_v16 = vld [vmem:[#allocation26 + $0x48] ss:$28 sps:$4 sm:$0xff]  }
 0x543   :  { %6285 = vmatpush1.bf16.msra.mxu0 %v8208_v30  ;;  %6449 = vmatpush1.bf16.msra.mxu1 %v8211_v54  ;;  %v3201_v30 = vrot.slane %v8590_v11, %v9554_v6  ;;  %v8268_v54 = vld [vmem:[#allocation26 + $0xd20] ss:$28 sps:$4 sm:$0xff]  }
 0x544   :  { %6286 = vmatprep.subr.bf16.mxu0 %v8216_v38  ;;  %6450 = vmatprep.subr.bf16.mxu1 %v8219_v41  ;;  %v8575_v20 = vpop.eup %8574  ;;  %v8276_v38 = vld [vmem:[#allocation26 + $0xd5c] ss:$28 sps:$4 sm:$0xff]   ;;  %v8279_v41 = vld [vmem:[#allocation26 + $0xd64] ss:$28 sps:$4 sm:$0xff]  }
 0x545   :  { %v3170_v29 = vmul.f32 %v8575_v20, %v9593_v7  ;;  %v8282_v7 = vld [vmem:[#allocation26 + $0xd94] ss:$28 sps:$4 sm:$0xff]   ;;  %v8317_v20 = vld [vmem:[#allocation26 + $0x128] ss:$28 sps:$4 sm:$0xff]   ;;  %v8329_v11 = vld [vmem:[#allocation26 + $0x19c] ss:$28 sps:$4 sm:$0xff]  }
 0x547   :  { %6287 = vmatpush1.bf16.msra.mxu0 %v8214_v42  ;;  %6451 = vmatpush1.bf16.msra.mxu1 %v8217_v43  ;;  %v3220_v42 = vmul.f32 %v3201_v30, %v3170_v29  ;;  %v8591_v43 = vld [vmem:[#allocation25] sm:$0xff]  ;;  %v8326_v29 = vld [vmem:[#allocation26 + $0x168] ss:$28 sps:$4 sm:$0xff]  }
 0x548   :  { %6288 = vmatprep.subr.bf16.mxu0 %v8222_v33  ;;  %6452 = vmatprep.subr.bf16.mxu1 %v8225_v45  ;;  %v3251_v44 = vrot.slane %v8591_v43, %v9554_v6  ;;  %v8274_v33 = vld [vmem:[#allocation26 + $0xd58] ss:$28 sps:$4 sm:$0xff]   ;;  %v8277_v45 = vld [vmem:[#allocation26 + $0xd60] ss:$28 sps:$4 sm:$0xff]  }
 0x549   :  { %v8330_v30 = vld [vmem:[#allocation26 + $0x360] ss:$28 sps:$4 sm:$0xff]   ;;  %v8336_v43 = vld [vmem:[#allocation26 + $0x398] ss:$28 sps:$4 sm:$0xff]  }
 0x54b   :  { %6289 = vmatpush1.bf16.msra.mxu0 %v8220_v46  ;;  %6453 = vmatpush1.bf16.msra.mxu1 %v8223_v21  ;;  %v8285_v46 = vld [vmem:[#allocation26 + $0xd9c] ss:$28 sps:$4 sm:$0xff]   ;;  %v3270_v21 = vadd.f32 %v3251_v44, %v3220_v42  ;;  %v8332_v42 = vld [vmem:[#allocation26 + $0x1d0] ss:$28 sps:$4 sm:$0xff]  }
 0x54c   :  { %6290 = vmatprep.subr.bf16.mxu0 %v8228_v56  ;;  %6454 = vmatprep.subr.bf16.mxu1 %v8231_v48  ;;  %v8283_v56 = vld [vmem:[#allocation26 + $0xd98] ss:$28 sps:$4 sm:$0xff]   ;;  %v8288_v48 = vld [vmem:[#allocation26 + $0xdcc] ss:$28 sps:$4 sm:$0xff]  }
 0x54d   :  { %vm3278_vm0 = vcmp.gt.f32.partialorder %v3270_v21, 0.0  ;;  %v8339_v44 = vld [vmem:[#allocation26 + $0x20c] ss:$28 sps:$4 sm:$0xff]  }
 0x54f   :  { %6291 = vmatpush1.bf16.msra.mxu0 %v8226_v51  ;;  %6455 = vmatpush1.bf16.msra.mxu1 %v8229_v37  ;;  %v8291_v51 = vld [vmem:[#allocation26 + $0xdd4] ss:$28 sps:$4 sm:$0xff]   ;;  %v3286_v37 = vmul.f32 0.2, %v3270_v21 }
 0x550   :  { %6292 = vmatprep.subr.bf16.mxu0 %v8234_v57  ;;  %6456 = vmatprep.subr.bf16.mxu1 %v8237_v35  ;;  %v8289_v57 = vld [vmem:[#allocation26 + $0xdd0] ss:$28 sps:$4 sm:$0xff]  }
 0x551   :  { %v8294_v35 = vld [vmem:[#allocation26 + $0x14] ss:$28 sps:$4 sm:$0xff]  }
 0x553   :  { %6293 = vmatpush1.bf16.msra.mxu0 %v8232_v60  ;;  %6457 = vmatpush1.bf16.msra.mxu1 %v8235_v63  ;;  %v8295_v60 = vld [vmem:[#allocation26 + $0x1d8] ss:$28 sps:$4 sm:$0xff]   ;;  %v3294_v63 = vsel %vm3278_vm0, %v3270_v21, %v3286_v37  ;;  %v8345_v21 = vld [vmem:[#allocation26 + $0x5c8] ss:$28 sps:$4 sm:$0xff]  }
 0x554   :  { %6294 = vmatprep.subr.bf16.mxu0 %v8240_v13  ;;  %6458 = vmatprep.subr.bf16.mxu1 %v8243_v1  ;;  %v9612_v13 = vpack.c.bf16 %v3294_v63, %v3294_v63  ;;  %v8296_v1 = vld [vmem:[#allocation26 + $0x18] ss:$28 sps:$4 sm:$0xff]  }
 0x555   :  { %v8347_v37 = vld [vmem:[#allocation26 + $0x278] ss:$28 sps:$4 sm:$0xff]  }
 0x556   :  { %v8356_v63 = vld [vmem:[#allocation26 + $0x478] ss:$28 sps:$4 sm:$0xff]  }
 0x557   :  { %6295 = vmatpush1.bf16.msra.mxu0 %v8238_v2  ;;  %6459 = vmatpush1.bf16.msra.mxu1 %v8241_v3  ;;  %v8299_v2 = vld [vmem:[#allocation26 + $0x4c] ss:$28 sps:$4 sm:$0xff]  }
 0x558   :  { %6296 = vmatprep.subr.bf16.mxu0 %v8246_v4  ;;  %6460 = vmatprep.subr.bf16.mxu1 %v8249_v59  ;;  %v8300_v3 = vld [vmem:[#allocation26 + $0x210] ss:$28 sps:$4 sm:$0xff]   ;;  %v8304_v59 = vld [vmem:[#allocation26 + $0x84] ss:$28 sps:$4 sm:$0xff]  }
 0x559   :  { %v8301_v4 = vld [vmem:[#allocation26 + $0x50] ss:$28 sps:$4 sm:$0xff]  }
 0x55b   :  { %6297 = vmatpush1.bf16.msra.mxu0 %v8244_v22  ;;  %6461 = vmatpush1.bf16.msra.mxu1 %v8247_v5  ;;  %v8305_v22 = vld [vmem:[#allocation26 + $0x248] ss:$28 sps:$4 sm:$0xff]   ;;  %v8302_v5 = vld [vmem:[#allocation26 + $0x80] ss:$28 sps:$4 sm:$0xff]  }
 0x55c   :  { %6298 = vmatprep.subr.bf16.mxu0 %v8252_v8  ;;  %6462 = vmatprep.subr.bf16.mxu1 %v8255_v17  ;;  %v8306_v8 = vld [vmem:[#allocation26 + $0x88] ss:$28 sps:$4 sm:$0xff]   ;;  %v8309_v17 = vld [vmem:[#allocation26 + $0xbc] ss:$28 sps:$4 sm:$0xff]  }
 0x55f   :  { %6299 = vmatpush1.bf16.msra.mxu0 %v8250_v9  ;;  %6463 = vmatpush1.bf16.msra.mxu1 %v8253_v47  ;;  %v8310_v9 = vld [vmem:[#allocation26 + $0x280] ss:$28 sps:$4 sm:$0xff]   ;;  %v8307_v47 = vld [vmem:[#allocation26 + $0xb8] ss:$28 sps:$4 sm:$0xff]  }
 0x560   :  { %6300 = vmatprep.subr.bf16.mxu0 %v8258_v32  ;;  %6464 = vmatprep.subr.bf16.mxu1 %v8261_v31  ;;  %v8311_v32 = vld [vmem:[#allocation26 + $0xc0] ss:$28 sps:$4 sm:$0xff]   ;;  %v8314_v31 = vld [vmem:[#allocation26 + $0xf4] ss:$28 sps:$4 sm:$0xff]  }
 0x563   :  { %6301 = vmatpush1.bf16.msra.mxu0 %v8256_v40  ;;  %6465 = vmatpush1.bf16.msra.mxu1 %v8259_v12  ;;  %v8312_v40 = vld [vmem:[#allocation26 + $0xf0] ss:$28 sps:$4 sm:$0xff]   ;;  %v8316_v12 = vld [vmem:[#allocation26 + $0xf8] ss:$28 sps:$4 sm:$0xff]  }
 0x564   :  { %6302 = vmatprep.subr.bf16.mxu0 %v8264_v10  ;;  %6466 = vmatprep.subr.bf16.mxu1 %v8267_v14  ;;  %v8319_v10 = vld [vmem:[#allocation26 + $0x12c] ss:$28 sps:$4 sm:$0xff]  }
 0x565   :  { %v8320_v14 = vld [vmem:[#allocation26 + $0x2f0] ss:$28 sps:$4 sm:$0xff]  }
 0x567   :  { %6303 = vmatpush1.bf16.msra.mxu0 %v8262_v23  ;;  %6467 = vmatpush1.bf16.msra.mxu1 %v8265_v25  ;;  %v8321_v23 = vld [vmem:[#allocation26 + $0x130] ss:$28 sps:$4 sm:$0xff]   ;;  %v8324_v25 = vld [vmem:[#allocation26 + $0x164] ss:$28 sps:$4 sm:$0xff]  }
 0x568   :  { %6304 = vmatprep.subr.bf16.mxu0 %v8270_v26  ;;  %6468 = vmatprep.subr.bf16.mxu1 %v8273_v28  ;;  %v8325_v26 = vld [vmem:[#allocation26 + $0x328] ss:$28 sps:$4 sm:$0xff]   ;;  %v8322_v28 = vld [vmem:[#allocation26 + $0x160] ss:$28 sps:$4 sm:$0xff]  }
 0x56b   :  { %6305 = vmatpush1.bf16.msra.mxu0 %v8268_v54  ;;  %6469 = vmatpush1.bf16.msra.mxu1 %v8271_v34  ;;  %v8327_v54 = vld [vmem:[#allocation26 + $0x198] ss:$28 sps:$4 sm:$0xff]   ;;  %v8331_v34 = vld [vmem:[#allocation26 + $0x1a0] ss:$28 sps:$4 sm:$0xff]  }
 0x56c   :  { %6306 = vmatprep.subr.bf16.mxu0 %v8276_v38  ;;  %6470 = vmatprep.subr.bf16.mxu1 %v8279_v41  ;;  %v8334_v38 = vld [vmem:[#allocation26 + $0x1d4] ss:$28 sps:$4 sm:$0xff]  }
 0x56d   :  { %v8335_v41 = vld [vmem:[#allocation26 + $0x558] ss:$28 sps:$4 sm:$0xff]  }
 0x56f   :  { %6307 = vmatpush1.bf16.msra.mxu0 %v8274_v33  ;;  %6471 = vmatpush1.bf16.msra.mxu1 %v8277_v45  ;;  %v8340_v33 = vld [vmem:[#allocation26 + $0x590] ss:$28 sps:$4 sm:$0xff]   ;;  %v8337_v45 = vld [vmem:[#allocation26 + $0x208] ss:$28 sps:$4 sm:$0xff]  }
 0x570   :  { %6308 = vmatprep.subr.bf16.mxu0 %v8282_v7  ;;  %6472 = vmatprep.subr.bf16.mxu1 %v8285_v46  ;;  %v8341_v7 = vld [vmem:[#allocation26 + $0x3d0] ss:$28 sps:$4 sm:$0xff]   ;;  %v8344_v46 = vld [vmem:[#allocation26 + $0x244] ss:$28 sps:$4 sm:$0xff]  }
 0x573   :  { %6309 = vmatpush1.bf16.msra.mxu0 %v8280_v39  ;;  %6473 = vmatpush1.bf16.msra.mxu1 %v8283_v56  ;;  %v8342_v39 = vld [vmem:[#allocation26 + $0x240] ss:$28 sps:$4 sm:$0xff]   ;;  %v8346_v56 = vld [vmem:[#allocation26 + $0x408] ss:$28 sps:$4 sm:$0xff]  }
 0x574   :  { %6310 = vmatprep.subr.bf16.mxu0 %v8288_v48  ;;  %6474 = vmatprep.subr.bf16.mxu1 %v8291_v51  ;;  %v8349_v48 = vld [vmem:[#allocation26 + $0x27c] ss:$28 sps:$4 sm:$0xff]  }
 0x575   :  { %v8350_v51 = vld [vmem:[#allocation26 + $0x600] ss:$28 sps:$4 sm:$0xff]  }
 0x577   :  { %6311 = vmatpush1.bf16.msra.mxu0 %v8286_v52  ;;  %6475 = vmatpush1.bf16.msra.mxu1 %v8289_v57  ;;  %v8351_v52 = vld [vmem:[#allocation26 + $0x440] ss:$28 sps:$4 sm:$0xff]   ;;  %v8354_v57 = vld [vmem:[#allocation26 + $0x2b4] ss:$28 sps:$4 sm:$0xff]  }
 0x578   :  { %6485 = vmatprep.subr.bf16.mxu0 %v8294_v35  ;;  %7623 = vmatprep.subr.bf16.mxu1 %v8295_v60  ;;  %v8355_v35 = vld [vmem:[#allocation26 + $0x638] ss:$28 sps:$4 sm:$0xff]   ;;  %v8352_v60 = vld [vmem:[#allocation26 + $0x2b0] ss:$28 sps:$4 sm:$0xff]  }
 0x57a   :  { %6313 = vmatmul.mubr.bf16.vlgmr.msra.gmra.mrb[12].mxu0 %v9612_v13  ;;  %6477 = vmatmul.mubr.bf16.vlgmr.msra.gmra.mrb[20].mxu1 %v9612_v13 }
 0x57b   :  { %6486 = vmatpush1.bf16.msra.mxu0 %v8292_v58  ;;  %6517 = vmatprep.mubr.bf16.mxu0 %v9507_v18  ;;  %v8359_v58 = vld [vmem:[#allocation26 + $0x2ec] ss:$28 sps:$4 sm:$0xff]  }
 0x57c   :  { %7624 = vmatpush3.bf16.msra.mxu1 %v8296_v1  ;;  %6681 = vmatprep.mubr.bf16.mxu1 %v9507_v18  ;;  %v8315_v18 = vld [vmem:[#allocation26 + $0x2b8] ss:$28 sps:$4 sm:$0xff]   ;;  %v8360_v1 = vld [vmem:[#allocation26 + $0x670] ss:$28 sps:$4 sm:$0xff]  }
 0x57d   :  { %6487 = vmatprep.subr.bf16.mxu0 %v8299_v2  ;;  %7625 = vmatprep.subr.bf16.mxu1 %v8300_v3  ;;  %v8357_v2 = vld [vmem:[#allocation26 + $0x2e8] ss:$28 sps:$4 sm:$0xff]   ;;  %v8361_v3 = vld [vmem:[#allocation26 + $0x4b0] ss:$28 sps:$4 sm:$0xff]  }
 0x57f   :  { %6488 = vmatpush1.bf16.msra.mxu0 %v8297_v16  ;;  %v8364_v16 = vld [vmem:[#allocation26 + $0x324] ss:$28 sps:$4 sm:$0xff]  }
 0x580   :  { %7626 = vmatpush3.bf16.msra.mxu1 %v8301_v4  ;;  %6489 = vmatprep.subr.bf16.mxu0 %v8304_v59  ;;  %v8365_v4 = vld [vmem:[#allocation26 + $0x6a8] ss:$28 sps:$4 sm:$0xff]   ;;  %v8362_v59 = vld [vmem:[#allocation26 + $0x320] ss:$28 sps:$4 sm:$0xff]  }
 0x581   :  { %7627 = vmatprep.subr.bf16.mxu1 %v8305_v22  ;;  %v8366_v22 = vld [vmem:[#allocation26 + $0x4e8] ss:$28 sps:$4 sm:$0xff]  }
 0x583   :  { %6490 = vmatpush1.bf16.msra.mxu0 %v8302_v5  ;;  %v8369_v5 = vld [vmem:[#allocation26 + $0x35c] ss:$28 sps:$4 sm:$0xff]  }
 0x584   :  { %7628 = vmatpush3.bf16.msra.mxu1 %v8306_v8  ;;  %6491 = vmatprep.subr.bf16.mxu0 %v8309_v17  ;;  %v8370_v8 = vld [vmem:[#allocation26 + $0x6e0] ss:$28 sps:$4 sm:$0xff]   ;;  %v8367_v17 = vld [vmem:[#allocation26 + $0x358] ss:$28 sps:$4 sm:$0xff]  }
 0x585   :  { %7629 = vmatprep.subr.bf16.mxu1 %v8310_v9  ;;  %v8371_v9 = vld [vmem:[#allocation26 + $0x520] ss:$28 sps:$4 sm:$0xff]  }
 0x587   :  { %6492 = vmatpush1.bf16.msra.mxu0 %v8307_v47  ;;  %v8374_v47 = vld [vmem:[#allocation26 + $0x394] ss:$28 sps:$4 sm:$0xff]  }
 0x588   :  { %7630 = vmatpush3.bf16.msra.mxu1 %v8311_v32  ;;  %6493 = vmatprep.subr.bf16.mxu0 %v8314_v31  ;;  %v8375_v32 = vld [vmem:[#allocation26 + $0x8d8] ss:$28 sps:$4 sm:$0xff]   ;;  %v8372_v31 = vld [vmem:[#allocation26 + $0x390] ss:$28 sps:$4 sm:$0xff]  }
 0x589   :  { %7631 = vmatprep.subr.bf16.mxu1 %v8315_v18  ;;  %v8376_v18 = vld [vmem:[#allocation26 + $0x718] ss:$28 sps:$4 sm:$0xff]  }
 0x58b   :  { %6494 = vmatpush1.bf16.msra.mxu0 %v8312_v40  ;;  %v8379_v40 = vld [vmem:[#allocation26 + $0x3cc] ss:$28 sps:$4 sm:$0xff]  }
 0x58c   :  { %7632 = vmatpush3.bf16.msra.mxu1 %v8316_v12  ;;  %6495 = vmatprep.subr.bf16.mxu0 %v8319_v10  ;;  %v8380_v12 = vld [vmem:[#allocation26 + $0x910] ss:$28 sps:$4 sm:$0xff]   ;;  %v8377_v10 = vld [vmem:[#allocation26 + $0x3c8] ss:$28 sps:$4 sm:$0xff]  }
 0x58d   :  { %7633 = vmatprep.subr.bf16.mxu1 %v8320_v14  ;;  %v8381_v14 = vld [vmem:[#allocation26 + $0x750] ss:$28 sps:$4 sm:$0xff]  }
 0x58f   :  { %6496 = vmatpush1.bf16.msra.mxu0 %v8317_v20  ;;  %v8384_v20 = vld [vmem:[#allocation26 + $0x404] ss:$28 sps:$4 sm:$0xff]  }
 0x590   :  { %7634 = vmatpush3.bf16.msra.mxu1 %v8321_v23  ;;  %6497 = vmatprep.subr.bf16.mxu0 %v8324_v25  ;;  %v8385_v23 = vld [vmem:[#allocation26 + $0x948] ss:$28 sps:$4 sm:$0xff]   ;;  %v8382_v25 = vld [vmem:[#allocation26 + $0x400] ss:$28 sps:$4 sm:$0xff]  }
 0x591   :  { %7635 = vmatprep.subr.bf16.mxu1 %v8325_v26  ;;  %v8389_v26 = vld [vmem:[#allocation26 + $0x43c] ss:$28 sps:$4 sm:$0xff]  }
 0x593   :  { %6498 = vmatpush1.bf16.msra.mxu0 %v8322_v28  ;;  %v8390_v28 = vld [vmem:[#allocation26 + $0x980] ss:$28 sps:$4 sm:$0xff]  }
 0x594   :  { %7636 = vmatpush3.bf16.msra.mxu1 %v8326_v29  ;;  %6499 = vmatprep.subr.bf16.mxu0 %v8329_v11  ;;  %v8387_v29 = vld [vmem:[#allocation26 + $0x438] ss:$28 sps:$4 sm:$0xff]  }
 0x595   :  { %7637 = vmatprep.subr.bf16.mxu1 %v8330_v30  ;;  %v8394_v11 = vld [vmem:[#allocation26 + $0x474] ss:$28 sps:$4 sm:$0xff]  }
 0x596   :  { %v8395_v30 = vld [vmem:[#allocation26 + $0x9b8] ss:$28 sps:$4 sm:$0xff]  }
 0x597   :  { %6500 = vmatpush1.bf16.msra.mxu0 %v8327_v54  ;;  %v8392_v54 = vld [vmem:[#allocation26 + $0x470] ss:$28 sps:$4 sm:$0xff]  }
 0x598   :  { %7638 = vmatpush3.bf16.msra.mxu1 %v8331_v34  ;;  %6501 = vmatprep.subr.bf16.mxu0 %v8334_v38  ;;  %v8396_v34 = vld [vmem:[#allocation26 + $0x7f8] ss:$28 sps:$4 sm:$0xff]   ;;  %v8399_v38 = vld [vmem:[#allocation26 + $0x4ac] ss:$28 sps:$4 sm:$0xff]  }
 0x599   :  { %7645 = vmatprep.subr.bf16.mxu1 %v8335_v41  ;;  %v8400_v41 = vld [vmem:[#allocation26 + $0x9f0] ss:$28 sps:$4 sm:$0xff]  }
 0x59b   :  { %6682 = vmatmul.mubr.bf16.vlgmr.msra.gmra.mrb[24].mxu1 %v9509_v24  ;;  %6502 = vmatpush1.bf16.msra.mxu0 %v8332_v42  ;;  %v8397_v42 = vld [vmem:[#allocation26 + $0x4a8] ss:$28 sps:$4 sm:$0xff]  }
 0x59c   :  { %7646 = vmatpush3.bf16.msra.mxu1 %v8336_v43  ;;  %6721 = vmatprep.mubr.bf16.mxu1 %v9515_v27  ;;  %v8401_v43 = vld [vmem:[#allocation26 + $0x830] ss:$28 sps:$4 sm:$0xff]  }
 0x59d   :  { %6503 = vmatprep.subr.bf16.mxu0 %v8339_v44  ;;  %7647 = vmatprep.subr.bf16.mxu1 %v8340_v33  ;;  %v8404_v44 = vld [vmem:[#allocation26 + $0x4e4] ss:$28 sps:$4 sm:$0xff]  }
 0x59e   :  { %v8405_v33 = vld [vmem:[#allocation26 + $0xa28] ss:$28 sps:$4 sm:$0xff]  }
 0x59f   :  { %6504 = vmatpush1.bf16.msra.mxu0 %v8337_v45  ;;  %v8402_v45 = vld [vmem:[#allocation26 + $0x4e0] ss:$28 sps:$4 sm:$0xff]  }
 0x5a0   :  { %7648 = vmatpush3.bf16.msra.mxu1 %v8341_v7  ;;  %6505 = vmatprep.subr.bf16.mxu0 %v8344_v46  ;;  %v8406_v7 = vld [vmem:[#allocation26 + $0x868] ss:$28 sps:$4 sm:$0xff]   ;;  %v8409_v46 = vld [vmem:[#allocation26 + $0x51c] ss:$28 sps:$4 sm:$0xff]  }
 0x5a1   :  { %7649 = vmatprep.subr.bf16.mxu1 %v8345_v21  ;;  %v8410_v21 = vld [vmem:[#allocation26 + $0xa60] ss:$28 sps:$4 sm:$0xff]  }
 0x5a3   :  { %6506 = vmatpush1.bf16.msra.mxu0 %v8342_v39  ;;  %v8407_v39 = vld [vmem:[#allocation26 + $0x518] ss:$28 sps:$4 sm:$0xff]  }
 0x5a4   :  { %7650 = vmatpush3.bf16.msra.mxu1 %v8346_v56  ;;  %6507 = vmatprep.subr.bf16.mxu0 %v8349_v48  ;;  %v8411_v56 = vld [vmem:[#allocation26 + $0x8a0] ss:$28 sps:$4 sm:$0xff]   ;;  %v8414_v48 = vld [vmem:[#allocation26 + $0x554] ss:$28 sps:$4 sm:$0xff]  }
 0x5a5   :  { %7651 = vmatprep.subr.bf16.mxu1 %v8350_v51  ;;  %v8415_v51 = vld [vmem:[#allocation26 + $0xc58] ss:$28 sps:$4 sm:$0xff]  }
 0x5a7   :  { %6508 = vmatpush1.bf16.msra.mxu0 %v8347_v37  ;;  %v8412_v37 = vld [vmem:[#allocation26 + $0x550] ss:$28 sps:$4 sm:$0xff]  }
 0x5a8   :  { %7652 = vmatpush3.bf16.msra.mxu1 %v8351_v52  ;;  %6509 = vmatprep.subr.bf16.mxu0 %v8354_v57  ;;  %v8416_v52 = vld [vmem:[#allocation26 + $0xa98] ss:$28 sps:$4 sm:$0xff]   ;;  %v8419_v57 = vld [vmem:[#allocation26 + $0x58c] ss:$28 sps:$4 sm:$0xff]  }
 0x5a9   :  { %7653 = vmatprep.subr.bf16.mxu1 %v8355_v35  ;;  %v8420_v35 = vld [vmem:[#allocation26 + $0xc90] ss:$28 sps:$4 sm:$0xff]  }
 0x5ab   :  { %6510 = vmatpush1.bf16.msra.mxu0 %v8352_v60  ;;  %v8417_v60 = vld [vmem:[#allocation26 + $0x588] ss:$28 sps:$4 sm:$0xff]  }
 0x5ac   :  { %7654 = vmatpush3.bf16.msra.mxu1 %v8356_v63  ;;  %6511 = vmatprep.subr.bf16.mxu0 %v8359_v58  ;;  %v8421_v63 = vld [vmem:[#allocation26 + $0xad0] ss:$28 sps:$4 sm:$0xff]   ;;  %v8424_v58 = vld [vmem:[#allocation26 + $0x5c4] ss:$28 sps:$4 sm:$0xff]  }
 0x5ad   :  { %7655 = vmatprep.subr.bf16.mxu1 %v8360_v1  ;;  %v8425_v1 = vld [vmem:[#allocation26 + $0xcc8] ss:$28 sps:$4 sm:$0xff]  }
 0x5af   :  { %6512 = vmatpush1.bf16.msra.mxu0 %v8357_v2  ;;  %v8422_v2 = vld [vmem:[#allocation26 + $0x5c0] ss:$28 sps:$4 sm:$0xff]  }
 0x5b0   :  { %7656 = vmatpush3.bf16.msra.mxu1 %v8361_v3  ;;  %6513 = vmatprep.subr.bf16.mxu0 %v8364_v16  ;;  %v8426_v3 = vld [vmem:[#allocation26 + $0xb08] ss:$28 sps:$4 sm:$0xff]   ;;  %v8429_v16 = vld [vmem:[#allocation26 + $0x5fc] ss:$28 sps:$4 sm:$0xff]  }
 0x5b1   :  { %7657 = vmatprep.subr.bf16.mxu1 %v8365_v4  ;;  %v8430_v4 = vld [vmem:[#allocation26 + $0xd00] ss:$28 sps:$4 sm:$0xff]  }
 0x5b3   :  { %6514 = vmatpush1.bf16.msra.mxu0 %v8362_v59  ;;  %v8427_v59 = vld [vmem:[#allocation26 + $0x5f8] ss:$28 sps:$4 sm:$0xff]  }
 0x5b4   :  { %7658 = vmatpush3.bf16.msra.mxu1 %v8366_v22  ;;  %6515 = vmatprep.subr.bf16.mxu0 %v8369_v5  ;;  %v8431_v22 = vld [vmem:[#allocation26 + $0xb40] ss:$28 sps:$4 sm:$0xff]   ;;  %v8434_v5 = vld [vmem:[#allocation26 + $0x634] ss:$28 sps:$4 sm:$0xff]  }
 0x5b5   :  { %7659 = vmatprep.subr.bf16.mxu1 %v8370_v8  ;;  %v8435_v8 = vld [vmem:[#allocation26 + $0xd38] ss:$28 sps:$4 sm:$0xff]  }
 0x5b7   :  { %6516 = vmatpush1.bf16.msra.mxu0 %v8367_v17  ;;  %v8432_v17 = vld [vmem:[#allocation26 + $0x630] ss:$28 sps:$4 sm:$0xff]  }
 0x5b8   :  { %7660 = vmatpush3.bf16.msra.mxu1 %v8371_v9  ;;  %6526 = vmatprep.subr.bf16.mxu0 %v8374_v47  ;;  %v8436_v9 = vld [vmem:[#allocation26 + $0xb78] ss:$28 sps:$4 sm:$0xff]   ;;  %v8439_v47 = vld [vmem:[#allocation26 + $0x66c] ss:$28 sps:$4 sm:$0xff]  }
 0x5b9   :  { %7667 = vmatprep.subr.bf16.mxu1 %v8375_v32  ;;  %v8440_v32 = vld [vmem:[#allocation26 + $0xd70] ss:$28 sps:$4 sm:$0xff]  }
 0x5ba   :  { %6518 = vmatmul.mubr.bf16.vlgmr.msra.gmra.mrb[16].mxu0 %v9509_v24  ;;  %v8386_v24 = vld [vmem:[#allocation26 + $0x788] ss:$28 sps:$4 sm:$0xff]  }
 0x5bb   :  { %6722 = vmatmul.mubr.bf16.vlgmr.msra.gmra.mrb[28].mxu1 %v9533_v0  ;;  %6527 = vmatpush1.bf16.msra.mxu0 %v8372_v31  ;;  %v8437_v31 = vld [vmem:[#allocation26 + $0x668] ss:$28 sps:$4 sm:$0xff]  }
 0x5bc   :  { %6558 = vmatprep.mubr.bf16.mxu0 %v9515_v27  ;;  %7668 = vmatpush3.bf16.msra.mxu1 %v8376_v18  ;;  %v8391_v27 = vld [vmem:[#allocation26 + $0x7c0] ss:$28 sps:$4 sm:$0xff]   ;;  %v8441_v18 = vld [vmem:[#allocation26 + $0xbb0] ss:$28 sps:$4 sm:$0xff]  }
 0x5bd   :  { %6761 = vmatprep.mubr.bf16.mxu1 %v9597_v36  ;;  %6528 = vmatprep.subr.bf16.mxu0 %v8379_v40  ;;  %v8444_v40 = vld [vmem:[#allocation26 + $0x6a4] ss:$28 sps:$4 sm:$0xff]  }
 0x5be   :  { %7669 = vmatprep.subr.bf16.mxu1 %v8380_v12  ;;  %v8445_v12 = vld [vmem:[#allocation26 + $0xda8] ss:$28 sps:$4 sm:$0xff]  }
 0x5bf   :  { %6529 = vmatpush1.bf16.msra.mxu0 %v8377_v10  ;;  %v8442_v10 = vld [vmem:[#allocation26 + $0x6a0] ss:$28 sps:$4 sm:$0xff]  }
 0x5c0   :  { %7670 = vmatpush3.bf16.msra.mxu1 %v8381_v14  ;;  %6530 = vmatprep.subr.bf16.mxu0 %v8384_v20  ;;  %v8446_v14 = vld [vmem:[#allocation26 + $0xbe8] ss:$28 sps:$4 sm:$0xff]   ;;  %v8449_v20 = vld [vmem:[#allocation26 + $0x6dc] ss:$28 sps:$4 sm:$0xff]  }
 0x5c1   :  { %7671 = vmatprep.subr.bf16.mxu1 %v8385_v23  ;;  %v8450_v23 = vld [vmem:[#allocation26 + $0xde0] ss:$28 sps:$4 sm:$0xff]  }
 0x5c3   :  { %6531 = vmatpush1.bf16.msra.mxu0 %v8382_v25  ;;  %v8447_v25 = vld [vmem:[#allocation26 + $0x6d8] ss:$28 sps:$4 sm:$0xff]  }
 0x5c4   :  { %7672 = vmatpush3.bf16.msra.mxu1 %v8386_v24  ;;  %6532 = vmatprep.subr.bf16.mxu0 %v8389_v26  ;;  %v8451_v24 = vld [vmem:[#allocation26 + $0xc20] ss:$28 sps:$4 sm:$0xff]   ;;  %v8454_v26 = vld [vmem:[#allocation26 + $0x714] ss:$28 sps:$4 sm:$0xff]  }
 0x5c5   :  { %7673 = vmatprep.subr.bf16.mxu1 %v8390_v28  ;;  %v8452_v28 = vld [vmem:[#allocation26 + $0x710] ss:$28 sps:$4 sm:$0xff]  }
 0x5c7   :  { %6533 = vmatpush1.bf16.msra.mxu0 %v8387_v29  ;;  %v8457_v29 = vld [vmem:[#allocation26 + $0x74c] ss:$28 sps:$4 sm:$0xff]  }
 0x5c8   :  { %7674 = vmatpush3.bf16.msra.mxu1 %v8391_v27  ;;  %6534 = vmatprep.subr.bf16.mxu0 %v8394_v11  ;;  %v8455_v27 = vld [vmem:[#allocation26 + $0x748] ss:$28 sps:$4 sm:$0xff]  }
 0x5c9   :  { %7675 = vmatprep.subr.bf16.mxu1 %v8395_v30  ;;  %v8460_v11 = vld [vmem:[#allocation26 + $0x784] ss:$28 sps:$4 sm:$0xff]  }
 0x5ca   :  { %v8458_v30 = vld [vmem:[#allocation26 + $0x780] ss:$28 sps:$4 sm:$0xff]  }
 0x5cb   :  { %6535 = vmatpush1.bf16.msra.mxu0 %v8392_v54  ;;  %v8463_v54 = vld [vmem:[#allocation26 + $0x7bc] ss:$28 sps:$4 sm:$0xff]  }
 0x5cc   :  { %7676 = vmatpush3.bf16.msra.mxu1 %v8396_v34  ;;  %6536 = vmatprep.subr.bf16.mxu0 %v8399_v38  ;;  %v8461_v34 = vld [vmem:[#allocation26 + $0x7b8] ss:$28 sps:$4 sm:$0xff]  }
 0x5cd   :  { %7677 = vmatprep.subr.bf16.mxu1 %v8400_v41  ;;  %v8466_v38 = vld [vmem:[#allocation26 + $0x7f4] ss:$28 sps:$4 sm:$0xff]  }
 0x5ce   :  { %v8464_v41 = vld [vmem:[#allocation26 + $0x7f0] ss:$28 sps:$4 sm:$0xff]  }
 0x5cf   :  { %6537 = vmatpush1.bf16.msra.mxu0 %v8397_v42  ;;  %v8467_v42 = vld [vmem:[#allocation26 + $0x828] ss:$28 sps:$4 sm:$0xff]  }
 0x5d0   :  { %7678 = vmatpush3.bf16.msra.mxu1 %v8401_v43  ;;  %6538 = vmatprep.subr.bf16.mxu0 %v8404_v44  ;;  %v8472_v43 = vld [vmem:[#allocation26 + $0x864] ss:$28 sps:$4 sm:$0xff]   ;;  %v8475_v44 = vld [vmem:[#allocation26 + $0x89c] ss:$28 sps:$4 sm:$0xff]  }
 0x5d1   :  { %7679 = vmatprep.subr.bf16.mxu1 %v8405_v33  ;;  %v8473_v33 = vld [vmem:[#allocation26 + $0x898] ss:$28 sps:$4 sm:$0xff]  }
 0x5d3   :  { %6539 = vmatpush1.bf16.msra.mxu0 %v8402_v45  ;;  %v8478_v45 = vld [vmem:[#allocation26 + $0x8d4] ss:$28 sps:$4 sm:$0xff]  }
 0x5d4   :  { %7680 = vmatpush3.bf16.msra.mxu1 %v8406_v7  ;;  %6540 = vmatprep.subr.bf16.mxu0 %v8409_v46  ;;  %v8476_v7 = vld [vmem:[#allocation26 + $0x8d0] ss:$28 sps:$4 sm:$0xff]  }
 0x5d5   :  { %7681 = vmatprep.subr.bf16.mxu1 %v8410_v21  ;;  %v8481_v46 = vld [vmem:[#allocation26 + $0x90c] ss:$28 sps:$4 sm:$0xff]  }
 0x5d6   :  { %v8479_v21 = vld [vmem:[#allocation26 + $0x908] ss:$28 sps:$4 sm:$0xff]  }
 0x5d7   :  { %6541 = vmatpush1.bf16.msra.mxu0 %v8407_v39  ;;  %v8484_v39 = vld [vmem:[#allocation26 + $0x944] ss:$28 sps:$4 sm:$0xff]  }
 0x5d8   :  { %7682 = vmatpush3.bf16.msra.mxu1 %v8411_v56  ;;  %6542 = vmatprep.subr.bf16.mxu0 %v8414_v48  ;;  %v8482_v56 = vld [vmem:[#allocation26 + $0x940] ss:$28 sps:$4 sm:$0xff]  }
 0x5d9   :  { %7689 = vmatprep.subr.bf16.mxu1 %v8415_v51  ;;  %v8487_v48 = vld [vmem:[#allocation26 + $0x97c] ss:$28 sps:$4 sm:$0xff]  }
 0x5da   :  { %v8485_v51 = vld [vmem:[#allocation26 + $0x978] ss:$28 sps:$4 sm:$0xff]  }
 0x5db   :  { %6762 = vmatmul.mubr.bf16.vlgmr.msra.gmra.mrb[32].mxu1 %v9599_v15  ;;  %6543 = vmatpush1.bf16.msra.mxu0 %v8412_v37  ;;  %v8490_v37 = vld [vmem:[#allocation26 + $0x9b4] ss:$28 sps:$4 sm:$0xff]  }
 0x5dc   :  { %7690 = vmatpush3.bf16.msra.mxu1 %v8416_v52  ;;  %6801 = vmatprep.mubr.bf16.mxu1 %v9605_v19  ;;  %v8488_v52 = vld [vmem:[#allocation26 + $0x9b0] ss:$28 sps:$4 sm:$0xff]  }
 0x5dd   :  { %6544 = vmatprep.subr.bf16.mxu0 %v8419_v57  ;;  %7691 = vmatprep.subr.bf16.mxu1 %v8420_v35  ;;  %v8493_v57 = vld [vmem:[#allocation26 + $0x9ec] ss:$28 sps:$4 sm:$0xff]  }
 0x5de   :  { %v8491_v35 = vld [vmem:[#allocation26 + $0x9e8] ss:$28 sps:$4 sm:$0xff]  }
 0x5df   :  { %6545 = vmatpush1.bf16.msra.mxu0 %v8417_v60  ;;  %v8496_v60 = vld [vmem:[#allocation26 + $0xa24] ss:$28 sps:$4 sm:$0xff]  }
 0x5e0   :  { %7692 = vmatpush3.bf16.msra.mxu1 %v8421_v63  ;;  %6546 = vmatprep.subr.bf16.mxu0 %v8424_v58  ;;  %v8494_v63 = vld [vmem:[#allocation26 + $0xa20] ss:$28 sps:$4 sm:$0xff]  }
 0x5e1   :  { %7693 = vmatprep.subr.bf16.mxu1 %v8425_v1  ;;  %v8499_v58 = vld [vmem:[#allocation26 + $0xa5c] ss:$28 sps:$4 sm:$0xff]  }
 0x5e2   :  { %v8497_v1 = vld [vmem:[#allocation26 + $0xa58] ss:$28 sps:$4 sm:$0xff]  }
 0x5e3   :  { %6547 = vmatpush1.bf16.msra.mxu0 %v8422_v2  ;;  %v8502_v2 = vld [vmem:[#allocation26 + $0xa94] ss:$28 sps:$4 sm:$0xff]  }
 0x5e4   :  { %7694 = vmatpush3.bf16.msra.mxu1 %v8426_v3  ;;  %6548 = vmatprep.subr.bf16.mxu0 %v8429_v16  ;;  %v8500_v3 = vld [vmem:[#allocation26 + $0xa90] ss:$28 sps:$4 sm:$0xff]  }
 0x5e5   :  { %7695 = vmatprep.subr.bf16.mxu1 %v8430_v4  ;;  %v8505_v16 = vld [vmem:[#allocation26 + $0xacc] ss:$28 sps:$4 sm:$0xff]  }
 0x5e6   :  { %v8503_v4 = vld [vmem:[#allocation26 + $0xac8] ss:$28 sps:$4 sm:$0xff]  }
 0x5e7   :  { %6549 = vmatpush1.bf16.msra.mxu0 %v8427_v59  ;;  %v8508_v59 = vld [vmem:[#allocation26 + $0xb04] ss:$28 sps:$4 sm:$0xff]  }
 0x5e8   :  { %7696 = vmatpush3.bf16.msra.mxu1 %v8431_v22  ;;  %6550 = vmatprep.subr.bf16.mxu0 %v8434_v5  ;;  %v8506_v22 = vld [vmem:[#allocation26 + $0xb00] ss:$28 sps:$4 sm:$0xff]  }
 0x5e9   :  { %7697 = vmatprep.subr.bf16.mxu1 %v8435_v8  ;;  %v8511_v5 = vld [vmem:[#allocation26 + $0xb3c] ss:$28 sps:$4 sm:$0xff]  }
 0x5ea   :  { %v8509_v8 = vld [vmem:[#allocation26 + $0xb38] ss:$28 sps:$4 sm:$0xff]  }
 0x5eb   :  { %6551 = vmatpush1.bf16.msra.mxu0 %v8432_v17  ;;  %v8514_v17 = vld [vmem:[#allocation26 + $0xb74] ss:$28 sps:$4 sm:$0xff]  }
 0x5ec   :  { %7698 = vmatpush3.bf16.msra.mxu1 %v8436_v9  ;;  %6552 = vmatprep.subr.bf16.mxu0 %v8439_v47  ;;  %v8512_v9 = vld [vmem:[#allocation26 + $0xb70] ss:$28 sps:$4 sm:$0xff]   ;;  %v9631_v47 = vld [vmem:[#allocation28] sm:$0xff] }
 0x5ed   :  { %7699 = vmatprep.subr.bf16.mxu1 %v8440_v32  ;;  %v3829_v32 = vrot.slane %v9631_v47, %v9410_v53 }
 0x5ef   :  { %6553 = vmatpush1.bf16.msra.mxu0 %v8437_v31  ;;  %v3825_v31 = vrot.slane %v9631_v47, %v9363_v50 }
 0x5f0   :  { %7700 = vmatpush3.bf16.msra.mxu1 %v8441_v18  ;;  %6554 = vmatprep.subr.bf16.mxu0 %v8444_v40  ;;  %v3833_v18 = vrot.slane %v9631_v47, %v9415_v55  ;;  %v8515_v40 = vld [vmem:[#allocation26 + $0xba8] ss:$28 sps:$4 sm:$0xff]   ;;  %v8523_v55 = vld [vmem:[#allocation26 + $0xc1c] ss:$28 sps:$4 sm:$0xff]  }
 0x5f1   :  { %7701 = vmatprep.subr.bf16.mxu1 %v8445_v12  ;;  %v8520_v12 = vld [vmem:[#allocation26 + $0xbe4] ss:$28 sps:$4 sm:$0xff]  }
 0x5f3   :  { %6555 = vmatpush1.bf16.msra.mxu0 %v8442_v10 }
 0x5f4   :  { %7702 = vmatpush3.bf16.msra.mxu1 %v8446_v14  ;;  %6556 = vmatprep.subr.bf16.mxu0 %v8449_v20 }
 0x5f5   :  { %7703 = vmatprep.subr.bf16.mxu1 %v8450_v23 }
 0x5f7   :  { %6557 = vmatpush1.bf16.msra.mxu0 %v8447_v25 }
 0x5f8   :  { %7704 = vmatpush3.bf16.msra.mxu1 %v8451_v24  ;;  %6567 = vmatprep.subr.bf16.mxu0 %v8454_v26 }
 0x5fa   :  { %6559 = vmatmul.mubr.bf16.vlgmr.msra.gmra.mrb[16].mxu0 %v9533_v0  ;;  %v8469_v0 = vld [vmem:[#allocation26 + $0x82c] ss:$28 sps:$4 sm:$0xff]  }
 0x5fb   :  { %6802 = vmatmul.mubr.bf16.vlgmr.msra.gmra.mrb[36].mxu1 %v9612_v13  ;;  %6568 = vmatpush1.bf16.msra.mxu0 %v8452_v28 }
 0x5fc   :  { %6599 = vmatprep.mubr.bf16.mxu0 %v9597_v36  ;;  %6569 = vmatprep.subr.bf16.mxu0 %v8457_v29  ;;  %v8470_v36 = vld [vmem:[#allocation26 + $0x860] ss:$28 sps:$4 sm:$0xff]  }
 0x5fd   :  { %v8518_v29 = vld [vmem:[#allocation26 + $0xbe0] ss:$28 sps:$4 sm:$0xff]  }
 0x5ff   :  { %6570 = vmatpush1.bf16.msra.mxu0 %v8455_v27 }
 0x600   :  { %6571 = vmatprep.subr.bf16.mxu0 %v8460_v11  ;;  %v8521_v11 = vld [vmem:[#allocation26 + $0xc18] ss:$28 sps:$4 sm:$0xff]  }
 0x603   :  { %6572 = vmatpush1.bf16.msra.mxu0 %v8458_v30  ;;  %v8526_v30 = vld [vmem:[#allocation26 + $0xc54] ss:$28 sps:$4 sm:$0xff]  }
 0x604   :  { %6573 = vmatprep.subr.bf16.mxu0 %v8463_v54  ;;  %v8524_v54 = vld [vmem:[#allocation26 + $0xc50] ss:$28 sps:$4 sm:$0xff]  }
 0x607   :  { %6574 = vmatpush1.bf16.msra.mxu0 %v8461_v34  ;;  %v8529_v34 = vld [vmem:[#allocation26 + $0xc8c] ss:$28 sps:$4 sm:$0xff]  }
 0x608   :  { %6575 = vmatprep.subr.bf16.mxu0 %v8466_v38 }
 0x60b   :  { %6576 = vmatpush1.bf16.msra.mxu0 %v8464_v41 }
 0x60c   :  { %6577 = vmatprep.subr.bf16.mxu0 %v8469_v0  ;;  %v8527_v0 = vld [vmem:[#allocation26 + $0xc88] ss:$28 sps:$4 sm:$0xff]  }
 0x60f   :  { %6578 = vmatpush1.bf16.msra.mxu0 %v8467_v42 }
 0x610   :  { %6579 = vmatprep.subr.bf16.mxu0 %v8472_v43  ;;  %v8532_v43 = vld [vmem:[#allocation26 + $0xcc4] ss:$28 sps:$4 sm:$0xff]  }
 0x613   :  { %6580 = vmatpush1.bf16.msra.mxu0 %v8470_v36 }
 0x614   :  { %6581 = vmatprep.subr.bf16.mxu0 %v8475_v44  ;;  %v8530_v44 = vld [vmem:[#allocation26 + $0xcc0] ss:$28 sps:$4 sm:$0xff]  }
 0x617   :  { %6582 = vmatpush1.bf16.msra.mxu0 %v8473_v33  ;;  %v8535_v33 = vld [vmem:[#allocation26 + $0xcfc] ss:$28 sps:$4 sm:$0xff]  }
 0x618   :  { %6583 = vmatprep.subr.bf16.mxu0 %v8478_v45  ;;  %v8533_v45 = vld [vmem:[#allocation26 + $0xcf8] ss:$28 sps:$4 sm:$0xff]  }
 0x61b   :  { %6584 = vmatpush1.bf16.msra.mxu0 %v8476_v7  ;;  %v8538_v7 = vld [vmem:[#allocation26 + $0xd34] ss:$28 sps:$4 sm:$0xff]  }
 0x61c   :  { %6585 = vmatprep.subr.bf16.mxu0 %v8481_v46  ;;  %v8536_v46 = vld [vmem:[#allocation26 + $0xd30] ss:$28 sps:$4 sm:$0xff]  }
 0x61f   :  { %6586 = vmatpush1.bf16.msra.mxu0 %v8479_v21  ;;  %v8541_v21 = vld [vmem:[#allocation26 + $0xd6c] ss:$28 sps:$4 sm:$0xff]  }
 0x620   :  { %6587 = vmatprep.subr.bf16.mxu0 %v8484_v39  ;;  %v8539_v39 = vld [vmem:[#allocation26 + $0xd68] ss:$28 sps:$4 sm:$0xff]  }
 0x623   :  { %6588 = vmatpush1.bf16.msra.mxu0 %v8482_v56  ;;  %v8544_v56 = vld [vmem:[#allocation26 + $0xda4] ss:$28 sps:$4 sm:$0xff]  }
 0x624   :  { %6589 = vmatprep.subr.bf16.mxu0 %v8487_v48 }
 0x627   :  { %6590 = vmatpush1.bf16.msra.mxu0 %v8485_v51 }
 0x628   :  { %6591 = vmatprep.subr.bf16.mxu0 %v8490_v37  ;;  %v8542_v37 = vld [vmem:[#allocation26 + $0xda0] ss:$28 sps:$4 sm:$0xff]  }
 0x62b   :  { %6592 = vmatpush1.bf16.msra.mxu0 %v8488_v52 }
 0x62c   :  { %6593 = vmatprep.subr.bf16.mxu0 %v8493_v57 }
 0x62f   :  { %6594 = vmatpush1.bf16.msra.mxu0 %v8491_v35  ;;  %v8547_v35 = vld [vmem:[#allocation26 + $0xddc] ss:$28 sps:$4 sm:$0xff]  }
 0x630   :  { %6595 = vmatprep.subr.bf16.mxu0 %v8496_v60 }
 0x633   :  { %6596 = vmatpush1.bf16.msra.mxu0 %v8494_v63  ;;  %v8545_v63 = vld [vmem:[#allocation26 + $0xdd8] ss:$28 sps:$4 sm:$0xff]  }
 0x634   :  { %6597 = vmatprep.subr.bf16.mxu0 %v8499_v58  ;;  %v3845_v58 = vrot.slane %v9631_v47, %v9554_v6 }
 0x637   :  { %6598 = vmatpush1.bf16.msra.mxu0 %v8497_v1 }
 0x638   :  { %6608 = vmatprep.subr.bf16.mxu0 %v8502_v2 }
 0x63a   :  { %6600 = vmatmul.mubr.bf16.vlgmr.msra.gmra.mrb[16].mxu0 %v9599_v15  ;;  %v8517_v15 = vld [vmem:[#allocation26 + $0xbac] ss:$28 sps:$4 sm:$0xff]  }
 0x63b   :  { %6609 = vmatpush1.bf16.msra.mxu0 %v8500_v3  ;;  %6640 = vmatprep.mubr.bf16.mxu0 %v9605_v19  ;;  %v3821_v19 = vrot.slane %v9631_v47, %v9360_v49 }
 0x63c   :  { %6610 = vmatprep.subr.bf16.mxu0 %v8505_v16 }
 0x63f   :  { %6611 = vmatpush1.bf16.msra.mxu0 %v8503_v4 }
 0x640   :  { %6612 = vmatprep.subr.bf16.mxu0 %v8508_v59 }
 0x643   :  { %6613 = vmatpush1.bf16.msra.mxu0 %v8506_v22 }
 0x644   :  { %6614 = vmatprep.subr.bf16.mxu0 %v8511_v5 }
 0x647   :  { %6615 = vmatpush1.bf16.msra.mxu0 %v8509_v8 }
 0x648   :  { %6616 = vmatprep.subr.bf16.mxu0 %v8514_v17 }
 0x64b   :  { %6617 = vmatpush1.bf16.msra.mxu0 %v8512_v9 }
 0x64c   :  { %6618 = vmatprep.subr.bf16.mxu0 %v8517_v15 }
 0x64d   :  { %v6314_v10 = vpop.f32.mrb[12].mxu0  ;;  %v6478_v14 = vpop.f32.mrb[20].mxu1 }
 0x64e   :  { %v7719_v20 = vadd.f32 %v6314_v10, %v3821_v19  ;;  %v7721_v23 = vadd.f32 %v6478_v14, %v3829_v32  ;;  %v6316_v25 = vpop.f32.mrb[13].mxu0  ;;  %v6480_v24 = vpop.f32.mrb[21].mxu1  ;;  %v3837_v10 = vrot.slane %v9631_v47, %v9525_v61  ;;  %v3841_v14 = vrot.slane %v9631_v47, %v9528_v62 }
 0x64f   :  { %v7720_v49 = vadd.f32 %v6316_v25, %v3825_v31  ;;  %v7722_v26 = vadd.f32 %v6480_v24, %v3833_v18  ;;  %v6318_v28 = vpop.f32.mrb[14].mxu0  ;;  %v6482_v53 = vpop.f32.mrb[22].mxu1  ;;  %6619 = vmatpush1.bf16.msra.mxu0 %v8515_v40 }
 0x650   :  { %8576 = vtanh.f32 %v7719_v20  ;;  %v6319_v50 = vpop.f32.mrb[15].mxu0  ;;  %v6483_v27 = vpop.f32.mrb[23].mxu1  ;;  %6620 = vmatprep.subr.bf16.mxu0 %v8520_v12 }
 0x651   :  { %8578 = vtanh.f32 %v7721_v23 }
 0x652   :  { %8580 = vtanh.f32 %v7720_v49 }
 0x653   :  { %8582 = vtanh.f32 %v7722_v26  ;;  %6621 = vmatpush1.bf16.msra.mxu0 %v8518_v29 }
 0x654   :  { %6622 = vmatprep.subr.bf16.mxu0 %v8523_v55 }
 0x657   :  { %6623 = vmatpush1.bf16.msra.mxu0 %v8521_v11 }
 0x658   :  { %6624 = vmatprep.subr.bf16.mxu0 %v8526_v30 }
 0x65a   :  { %v8577_v38 = vpop.eup %8576 }
 0x65b   :  { %v8579_v41 = vpop.eup %8578  ;;  %6816 = vst [vmem:[#allocation29] sm:$0xff] %v8577_v38  ;;  %6625 = vmatpush1.bf16.msra.mxu0 %v8524_v54 }
 0x65c   :  { %v8581_v42 = vpop.eup %8580  ;;  %6818 = vst [vmem:[#allocation29 + $0x10] sm:$0xff] %v8579_v41  ;;  %6626 = vmatprep.subr.bf16.mxu0 %v8529_v34 }
 0x65d   :  { %v8583_v36 = vpop.eup %8582  ;;  %6817 = vst [vmem:[#allocation29 + $0x8] sm:$0xff] %v8581_v42 }
 0x65e   :  { %6819 = vst [vmem:[#allocation29 + $0x18] sm:$0xff] %v8583_v36 }
 0x65f   :  { %6627 = vmatpush1.bf16.msra.mxu0 %v8527_v0 }
 0x660   :  { %6628 = vmatprep.subr.bf16.mxu0 %v8532_v43 }
 0x663   :  { %6629 = vmatpush1.bf16.msra.mxu0 %v8530_v44 }
 0x664   :  { %6630 = vmatprep.subr.bf16.mxu0 %v8535_v33 }
 0x667   :  { %6631 = vmatpush1.bf16.msra.mxu0 %v8533_v45 }
 0x668   :  { %6632 = vmatprep.subr.bf16.mxu0 %v8538_v7 }
 0x66b   :  { %6633 = vmatpush1.bf16.msra.mxu0 %v8536_v46 }
 0x66c   :  { %6634 = vmatprep.subr.bf16.mxu0 %v8541_v21 }
 0x66e   :  { %v7639_v48 = vpop.f32.mrb[24].mxu1 }
 0x66f   :  { %v7640_v51 = vpop.f32.mrb[25].mxu1  ;;  %6635 = vmatpush1.bf16.msra.mxu0 %v8539_v39 }
 0x670   :  { %v7641_v52 = vadd.f32 %v7640_v51, %v7639_v48  ;;  %v7642_v57 = vpop.f32.mrb[26].mxu1  ;;  %6636 = vmatprep.subr.bf16.mxu0 %v8544_v56 }
 0x671   :  { %v7643_v60 = vpop.f32.mrb[27].mxu1 }
 0x672   :  { %v6684_v3 = vadd.f32 %v7641_v52, %v3845_v58 }
 0x673   :  { %6637 = vmatpush1.bf16.msra.mxu0 %v8542_v37 }
 0x674   :  { %6638 = vmatprep.subr.bf16.mxu0 %v8547_v35 }
 0x677   :  { %6639 = vmatpush1.bf16.msra.mxu0 %v8545_v63 }
 0x67a   :  { %6641 = vmatmul.mubr.bf16.vlgmr.msra.gmra.mrb[16].mxu0 %v9612_v13 }
 0x68e   :  { %v7661_v1 = vpop.f32.mrb[28].mxu1 }
 0x68f   :  { %v7662_v2 = vpop.f32.mrb[29].mxu1 }
 0x690   :  { %v7663_v16 = vadd.f32 %v7662_v2, %v7661_v1  ;;  %v7664_v4 = vpop.f32.mrb[30].mxu1 }
 0x691   :  { %v7665_v59 = vpop.f32.mrb[31].mxu1 }
 0x692   :  { %v6724_v22 = vadd.f32 %v7663_v16, %v6684_v3 }
 0x6ae   :  { %v7683_v5 = vpop.f32.mrb[32].mxu1 }
 0x6af   :  { %v7684_v8 = vpop.f32.mrb[33].mxu1 }
 0x6b0   :  { %v7685_v17 = vadd.f32 %v7684_v8, %v7683_v5  ;;  %v7686_v9 = vpop.f32.mrb[34].mxu1 }
 0x6b1   :  { %v7687_v15 = vpop.f32.mrb[35].mxu1 }
 0x6b2   :  { %v6764_v19 = vadd.f32 %v7685_v17, %v6724_v22 }
 0x6ce   :  { %v7705_v32 = vpop.f32.mrb[36].mxu1 }
 0x6cf   :  { %v7706_v31 = vpop.f32.mrb[37].mxu1 }
 0x6d0   :  { %v7707_v18 = vadd.f32 %v7706_v31, %v7705_v32  ;;  %v7708_v13 = vpop.f32.mrb[38].mxu1 }
 0x6d1   :  { %v7709_v40 = vpop.f32.mrb[39].mxu1 }
 0x6d2   :  { %v6804_v12 = vadd.f32 %v7707_v18, %v6764_v19 }
 0x6d4   :  { %8584 = vtanh.f32 %v6804_v12 }
 0x6de   :  { %v8585_v6 = vpop.eup %8584 }
 0x6df   :  { %6822 = vst [vmem:[#allocation29 + $0x30] sm:$0xff] %v8585_v6 }
 0x74d   :  { %v6642_v20 = vpop.f32.mrb[16].mxu0 }
 0x74e   :  { %v7723_v23 = vadd.f32 %v6642_v20, %v3837_v10  ;;  %v6644_v25 = vpop.f32.mrb[17].mxu0 }
 0x74f   :  { %v7724_v24 = vadd.f32 %v6644_v25, %v3841_v14  ;;  %v6646_v49 = vpop.f32.mrb[18].mxu0 }
 0x750   :  { %8586 = vtanh.f32 %v7723_v23  ;;  %v6647_v26 = vpop.f32.mrb[19].mxu0 }
 0x751   :  { %8588 = vtanh.f32 %v7724_v24 }
 0x75a   :  { %v8587_v28 = vpop.eup %8586 }
 0x75b   :  { %v8589_v53 = vpop.eup %8588  ;;  %6820 = vst [vmem:[#allocation29 + $0x20] sm:$0xff] %v8587_v28 }
 0x75c   :  { %6821 = vst [vmem:[#allocation29 + $0x28] sm:$0xff] %v8589_v53 }
 0x75d   :  { %8977 = shalt.err (!%p8974_p0)
}
 0x75e   :  { %s8978_s9 = scalar_lea.hbm %s9677_s17, 896 }
 0x75f   :  { %p8979_p1 = scmp.ne.s32.totalorder %s9677_s17, %s8978_s9  ;;  %p8982_p2 = scmp.lt.u32.totalorder %s8978_s9, %s9677_s17 }
 0x761   :  { %p8984_p3 = pnand %p8982_p2, %p8979_p1 }
 0x763   :  { %8987 = shalt.err (!%p8984_p3)
}
 0x764   :  { %6832 = dma.vmem_to_hbm [thread:$0]  %s6830_s20, 896, %s9677_s17, [#allocation4]  }
 0x765   :  { %9006 = dma.done.wait [#allocation4], 896  }
 0x766   :  { %9007 = vsyncadd [#allocation4], 4294966400 }
 0x767   :  { %6836 = vsyncpa [#allocation3], 1 }
 0x768   :  { %6837 = vsyncpa [#allocation6], 1 }
 0x769   :  { %6838 = vsyncpa [#allocation9], 1 }
 0x76a   :  { %6839 = vsyncpa [#allocation12], 1 }
 0x76b   :  { %6840 = vsyncpa [#allocation15], 1 }
 0x76c   :  { %6841 = vsyncpa [#allocation18], 1 }
 0x76d   :  { %6842 = vsyncpa [#allocation21], 1 }
 0x76e   :  { %6843 = vsyncpa [#allocation24], 1 }
 0x76f   :  { %6844 = vsyncpa [#allocation27], 1 }
 0x770   :  { %6845 = vsyncpa [#allocation4], 1 }

</bundles_post_ra>
